<compile_context>
chip_gen: v7x
topology: tpu7x:2x2x1
jax: 0.10.0
libtpu: 0.0.40
codegen_flags: <defaults>
</compile_context>

<pallas_src>
import math
from functools import partial

import jax
import jax.numpy as jnp
from jax import lax
from jax.experimental import pallas as pl
from jax.experimental.pallas import tpu as pltpu


def _layer_norm(x, g, b, eps=1e-5):
    mu = jnp.mean(x, axis=-1, keepdims=True)
    xc = x - mu
    var = jnp.mean(xc * xc, axis=-1, keepdims=True)
    return xc * lax.rsqrt(var + eps) * g + b


# ----------------------------------------------------------------------------
# Fused Pallas kernel: one sequence (grid step) end-to-end
# ----------------------------------------------------------------------------
def _fused_forward_kernel(x_ref, pos_ref, w_in_ref, rw_all_ref, w_out_ref,
                          vec_ref, ln0_ref, fc1_ref, fc2_ref, out_ref,
                          *, T, H, dh, mlen, d_inner, n_layer):
    D = x_ref.shape[2]
    HD = H * dh
    K = mlen + T                       # key length = zero mems + real tokens
    scale = 1.0 / math.sqrt(dh)

    # classifier's input LayerNorm on this sequence's (T, D) rows
    h = _layer_norm(x_ref[0], ln0_ref[0:1, :], ln0_ref[1:2, :])

    # relative positional projection for ALL layers at once (hoisted); pos_ref
    # already carries T-1 zero pad rows so r_all's trailing rows are zero.
    r_all = jnp.dot(pos_ref[...], rw_all_ref[...],
                    preferred_element_type=jnp.float32)          # (K+T-1, L*HD)

    # causal mask for the real-key block (mem keys are always visible)
    rows = lax.broadcasted_iota(jnp.int32, (T, T), 0)
    cols = lax.broadcasted_iota(jnp.int32, (T, T), 1)
    causal = cols <= rows
    neg = jnp.float32(-1e30)

    for l in range(n_layer):
        w_l = w_in_ref[l]                                        # (D, 3HD+d_inner)
        vl = vec_ref[l]                                          # (8, vw)

        # qkv projection of the T real rows only (zero mems stay implicit)
        qkv = jnp.dot(h, w_l[:, :3 * HD],
                      preferred_element_type=jnp.float32)        # (T, 3HD)
        q = qkv[:, 0:HD]
        k = qkv[:, HD:2 * HD]
        v = qkv[:, 2 * HD:3 * HD]
        # rel-pos bias adds hoisted out of the head loop
        q_rw = q + vl[6:7, :HD]
        q_rr = q + vl[7:8, :HD]
        r_l = r_all[:, l * HD:(l + 1) * HD]                      # (K+T-1, HD)

        head_outs = []
        for hh in range(H):
            cs = slice(hh * dh, (hh + 1) * dh)
            # AC: only the T real keys (zero mem keys give exactly-zero cols)
            ac = lax.dot_general(q_rw[:, cs], k[:, cs],
                                 (((1,), (1,)), ((), ())),
                                 preferred_element_type=jnp.float32)   # (T, T)
            # BD with the Transformer-XL rel-shift fused in:
            #   bd[i, j] = (q_i + r_r_bias) . r[j + T-1-i]
            bd_full = lax.dot_general(q_rr[:, cs], r_l[:, cs],
                                      (((1,), (1,)), ((), ())),
                                      preferred_element_type=jnp.float32)  # (T, K+T-1)
            bd = jnp.concatenate(
                [bd_full[i:i + 1, T - 1 - i:T - 1 - i + K] for i in range(T)],
                axis=0)                                           # (T, K)

            # piecewise softmax: mem columns (AC == 0, never masked) and real
            # columns (AC + causal mask) -- no zero-tile concatenation.
            s_mem = bd[:, :mlen] * scale                          # (T, mlen)
            s_real = (bd[:, mlen:] + ac) * scale                  # (T, T)
            s_real = jnp.where(causal, s_real, neg)
            m = jnp.maximum(jnp.max(s_mem, axis=-1, keepdims=True),
                            jnp.max(s_real, axis=-1, keepdims=True))
            p_mem = jnp.exp(s_mem - m)
            p_real = jnp.exp(s_real - m)
            denom = (jnp.sum(p_mem, axis=-1, keepdims=True)
                     + jnp.sum(p_real, axis=-1, keepdims=True))
            inv = pl.reciprocal(denom, approx=True)
            # mem value rows are zero -> only the real keys contribute
            head_outs.append(
                jnp.dot(p_real, v[:, cs],
                        preferred_element_type=jnp.float32) * inv)       # (T, dh)
        attn_vec = jnp.concatenate(head_outs, axis=1)             # (T, HD)

        attn_out = jnp.dot(attn_vec, w_out_ref[l, 0:HD, :],
                           preferred_element_type=jnp.float32)    # (T, D)
        h = _layer_norm(h + attn_out, vl[0:1, :D], vl[1:2, :D])

        # position-wise FF (post-LN residual)
        ff = jnp.dot(h, w_l[:, 3 * HD:3 * HD + d_inner],
                     preferred_element_type=jnp.float32) + vl[2:3, :d_inner]
        ff = jnp.maximum(ff, 0.0)
        ff = jnp.dot(ff, w_out_ref[l, HD:HD + d_inner, :],
                     preferred_element_type=jnp.float32) + vl[3:4, :D]
        h = _layer_norm(h + ff, vl[4:5, :D], vl[5:6, :D])

    # classifier head on the last token of this sequence
    x_last = h[T - 1:T, :]                                        # (1, D)
    z = jnp.tanh(jnp.dot(x_last, fc1_ref[0:D, :],
                         preferred_element_type=jnp.float32) + fc1_ref[D:D + 1, :])
    fch = fc2_ref.shape[0] - 1
    logits = jnp.dot(z, fc2_ref[0:fch, :],
                     preferred_element_type=jnp.float32) + fc2_ref[fch:fch + 1, :]
    mx = jnp.max(logits, axis=-1, keepdims=True)
    lz = logits - mx
    logp = lz - jnp.log(jnp.sum(jnp.exp(lz), axis=-1, keepdims=True))
    out_ref[...] = logp[None].astype(out_ref.dtype)               # (1, 1, n_cls)


# ----------------------------------------------------------------------------
# Wrapper: embedding gathers + lane-dense param packing, one pallas_call
# ----------------------------------------------------------------------------
def transfo_classifier_forward(params, inputs, tags, *, H, dh, mem_len):
    B, T = inputs.shape
    D = params["word_emb"].shape[1]
    L = len(params["layers"])
    HD = H * dh
    mlen = mem_len
    K = mlen + T

    # TODO(synk): embedding gathers (word/tag lookup) stay in plain JAX; the
    # rest of the forward is a single fused Pallas kernel.
    word = jnp.take(params["word_emb"], inputs, axis=0) * math.sqrt(D)
    tag = jnp.take(params["tag_emb"], tags, axis=0)       # padding_idx=0 row is 0
    x = (word + tag).astype(jnp.float32)                   # (B, T, D)

    # sinusoidal relative positional embedding over positions [K-1 .. 0],
    # padded with T-1 zero rows so the in-kernel rel-shift is a static slice
    pos_seq = jnp.arange(K - 1, -1, -1, dtype=jnp.float32)
    inv_freq = 1.0 / (10000.0 ** (jnp.arange(0, D, 2, dtype=jnp.float32) / D))
    sinusoid = pos_seq[:, None] * inv_freq[None, :]
    pos_emb = jnp.concatenate([jnp.sin(sinusoid), jnp.cos(sinusoid)], axis=-1)
    pos_ext = jnp.concatenate(
        [pos_emb, jnp.zeros((T - 1, D), jnp.float32)], axis=0)    # (K+T-1, D)

    layers = params["layers"]

    def stk(name):
        return jnp.stack([lp[name] for lp in layers]).astype(jnp.float32)

    d_inner = layers[0]["ff_w1"].shape[0]

    # ---- lane-dense packed parameter slabs (fewer prologue DMAs) ----
    w_in = jnp.concatenate([stk("qkv_w").transpose(0, 2, 1),      # (L, D, 3HD)
                            stk("ff_w1").transpose(0, 2, 1)],     # (L, D, d_inner)
                           axis=2)
    r_w_all = jnp.concatenate(
        [lp["r_w"].T.astype(jnp.float32) for lp in layers], axis=1)  # (D, L*HD)
    w_out = jnp.concatenate([stk("o_w").transpose(0, 2, 1),       # (L, HD, D)
                             stk("ff_w2").transpose(0, 2, 1)],    # (L, d_inner, D)
                            axis=1)
    vw = max(D, d_inner, HD)

    def vrow(a):
        return jnp.pad(a, ((0, 0), (0, vw - a.shape[1])))[:, None, :]

    vecs = jnp.concatenate(
        [vrow(stk("ln1_g")), vrow(stk("ln1_b")),
         vrow(stk("ff_b1")), vrow(stk("ff_b2")),
         vrow(stk("ln2_g")), vrow(stk("ln2_b")),
         vrow(stk("r_w_bias").reshape(L, HD)),
         vrow(stk("r_r_bias").reshape(L, HD))], axis=1)           # (L, 8, vw)

    ln0 = jnp.stack([params["ln0_g"], params["ln0_b"]]).astype(jnp.float32)  # (2, D)
    fc1p = jnp.concatenate([params["fc1_w"].T, params["fc1_b"][None, :]],
                           axis=0).astype(jnp.float32)            # (D+1, 64)
    fc2p = jnp.concatenate([params["fc2_w"].T, params["fc2_b"][None, :]],
                           axis=0).astype(jnp.float32)            # (65, n_cls)
    n_cls = fc2p.shape[1]

    def full_spec(a):
        nd = a.ndim
        return pl.BlockSpec(a.shape, lambda b, _nd=nd: (0,) * _nd)

    kernel = partial(_fused_forward_kernel, T=T, H=H, dh=dh, mlen=mlen,
                     d_inner=d_inner, n_layer=L)

    out = pl.pallas_call(
        kernel,
        out_shape=jax.ShapeDtypeStruct((B, 1, n_cls), jnp.float32),
        grid=(B,),
        in_specs=[pl.BlockSpec((1, T, D), lambda b: (b, 0, 0)),
                  full_spec(pos_ext), full_spec(w_in), full_spec(r_w_all),
                  full_spec(w_out), full_spec(vecs), full_spec(ln0),
                  full_spec(fc1p), full_spec(fc2p)],
        out_specs=pl.BlockSpec((1, 1, n_cls), lambda b: (b, 0, 0)),
        compiler_params=pltpu.CompilerParams(
            dimension_semantics=("parallel",)),
    )(x, pos_ext, w_in, r_w_all, w_out, vecs, ln0, fc1p, fc2p)
    return out[:, 0, :]


# ----------------------------------------------------------------------------
# Deterministic parameter init (shapes implied by the module's __init__)
# ----------------------------------------------------------------------------
def init_params(key, *, vocab, D, H, dh, d_inner, n_layer, fc_hidden=64, n_cls=2):
    std = 0.02
    ks = iter(jax.random.split(key, 16 + 8 * n_layer))

    def nrm(shape):
        return std * jax.random.normal(next(ks), shape, dtype=jnp.float32)

    params = {
        "word_emb": nrm((vocab, D)),
        "tag_emb": nrm((3, D)).at[0].set(0.0),                # padding_idx=0
        "ln0_g": jnp.ones((D,), jnp.float32),
        "ln0_b": jnp.zeros((D,), jnp.float32),
        "fc1_w": nrm((fc_hidden, D)),
        "fc1_b": jnp.zeros((fc_hidden,), jnp.float32),
        "fc2_w": nrm((n_cls, fc_hidden)),
        "fc2_b": jnp.zeros((n_cls,), jnp.float32),
        "layers": [],
    }
    for _ in range(n_layer):
        params["layers"].append({
            "qkv_w": nrm((3 * H * dh, D)),
            "r_w": nrm((H * dh, D)),
            "o_w": nrm((D, H * dh)),
            "r_w_bias": nrm((H, dh)),
            "r_r_bias": nrm((H, dh)),
            "ln1_g": jnp.ones((D,), jnp.float32),
            "ln1_b": jnp.zeros((D,), jnp.float32),
            "ff_w1": nrm((d_inner, D)),
            "ff_b1": jnp.zeros((d_inner,), jnp.float32),
            "ff_w2": nrm((D, d_inner)),
            "ff_b2": jnp.zeros((D,), jnp.float32),
            "ln2_g": jnp.ones((D,), jnp.float32),
            "ln2_b": jnp.zeros((D,), jnp.float32),
        })
    return params


if __name__ == "__main__":
    # small config consistent with the module: hidden=32, heads=4 (d_head=8),
    # layers=3, inner=32, mem_len=16, vocab=50, batch=2, seq=8
    V, D, H, dh, d_inner, n_layer = 50, 32, 4, 8, 32, 3
    mem_len = 16
    B, T = 2, 8

    key = jax.random.PRNGKey(0)
    kp, ki, kt = jax.random.split(key, 3)
    params = init_params(kp, vocab=V, D=D, H=H, dh=dh,
                         d_inner=d_inner, n_layer=n_layer)
    inputs = jax.random.randint(ki, (B, T), 1, V, dtype=jnp.int32)
    tags = jax.random.randint(kt, (B, T), 0, 3, dtype=jnp.int32)

    fwd = jax.jit(partial(transfo_classifier_forward, H=H, dh=dh,
                          mem_len=mem_len))
    out = jax.block_until_ready(fwd(params, inputs, tags))
    assert out.shape == (B, 2)
    assert bool(jnp.all(jnp.isfinite(out)))
    # log_softmax rows exponentiate to ~1
    assert bool(jnp.allclose(jnp.exp(out).sum(-1), 1.0, atol=1e-4))
    print("KERNEL_OK")
</pallas_src>

<mosaic_0001>
module attributes {stable_mosaic.version = 11 : i64} {
  func.func @_fused_forward_kernel(%arg0: i32, %arg1: memref<1x8x32xf32, #tpu.memory_space<vmem>>, %arg2: memref<31x32xf32, #tpu.memory_space<vmem>>, %arg3: memref<3x32x128xf32, #tpu.memory_space<vmem>>, %arg4: memref<32x96xf32, #tpu.memory_space<vmem>>, %arg5: memref<3x64x32xf32, #tpu.memory_space<vmem>>, %arg6: memref<3x8x32xf32, #tpu.memory_space<vmem>>, %arg7: memref<2x32xf32, #tpu.memory_space<vmem>>, %arg8: memref<33x64xf32, #tpu.memory_space<vmem>>, %arg9: memref<65x2xf32, #tpu.memory_space<vmem>>, %arg10: memref<1x1x2xf32, #tpu.memory_space<vmem>>) attributes {dimension_semantics = [#tpu.dimension_semantics<parallel>], iteration_bounds = array<i64: 2>, scalar_prefetch = 0 : i64, scratch_operands = 0 : i64, tpu.core_type = #tpu.core_type<tc>, window_params = [{transform_indices = @transform_0, window_bounds = array<i64: 1, 8, 32>}, {pipeline_mode = #tpu.pipeline_mode<synchronous>, transform_indices = @transform_1, window_bounds = array<i64: 31, 32>}, {pipeline_mode = #tpu.pipeline_mode<synchronous>, transform_indices = @transform_2, window_bounds = array<i64: 3, 32, 128>}, {pipeline_mode = #tpu.pipeline_mode<synchronous>, transform_indices = @transform_3, window_bounds = array<i64: 32, 96>}, {pipeline_mode = #tpu.pipeline_mode<synchronous>, transform_indices = @transform_4, window_bounds = array<i64: 3, 64, 32>}, {pipeline_mode = #tpu.pipeline_mode<synchronous>, transform_indices = @transform_5, window_bounds = array<i64: 3, 8, 32>}, {pipeline_mode = #tpu.pipeline_mode<synchronous>, transform_indices = @transform_6, window_bounds = array<i64: 2, 32>}, {pipeline_mode = #tpu.pipeline_mode<synchronous>, transform_indices = @transform_7, window_bounds = array<i64: 33, 64>}, {pipeline_mode = #tpu.pipeline_mode<synchronous>, transform_indices = @transform_8, window_bounds = array<i64: 65, 2>}, {transform_indices = @transform_9, window_bounds = array<i64: 1, 1, 2>}]} {
    %c0 = arith.constant 0 : index
    %c0_0 = arith.constant 0 : index
    %c0_1 = arith.constant 0 : index
    %0 = vector.load %arg1[%c0, %c0_0, %c0_1] : memref<1x8x32xf32, #tpu.memory_space<vmem>>, vector<1x8x32xf32>
    %1 = vector.shape_cast %0 : vector<1x8x32xf32> to vector<8x32xf32>
    %c0_2 = arith.constant 0 : index
    %c0_3 = arith.constant 0 : index
    %2 = vector.load %arg7[%c0_2, %c0_3] : memref<2x32xf32, #tpu.memory_space<vmem>>, vector<1x32xf32>
    %c1 = arith.constant 1 : index
    %c0_4 = arith.constant 0 : index
    %3 = vector.load %arg7[%c1, %c0_4] : memref<2x32xf32, #tpu.memory_space<vmem>>, vector<1x32xf32>
    %cst = arith.constant dense<0.000000e+00> : vector<8xf32>
    %4 = vector.multi_reduction <add>, %1, %cst [1] : vector<8x32xf32> to vector<8xf32>
    %5 = vector.shape_cast %4 : vector<8xf32> to vector<8x1xf32>
    %cst_5 = arith.constant 3.200000e+01 : f32
    %6 = vector.broadcast %cst_5 : f32 to vector<8x1xf32>
    %7 = arith.divf %5, %6 : vector<8x1xf32>
    %8 = vector.broadcast %7 : vector<8x1xf32> to vector<8x32xf32>
    %9 = arith.subf %1, %8 : vector<8x32xf32>
    %10 = arith.mulf %9, %9 : vector<8x32xf32>
    %cst_6 = arith.constant dense<0.000000e+00> : vector<8xf32>
    %11 = vector.multi_reduction <add>, %10, %cst_6 [1] : vector<8x32xf32> to vector<8xf32>
    %12 = vector.shape_cast %11 : vector<8xf32> to vector<8x1xf32>
    %cst_7 = arith.constant 3.200000e+01 : f32
    %13 = vector.broadcast %cst_7 : f32 to vector<8x1xf32>
    %14 = arith.divf %12, %13 : vector<8x1xf32>
    %cst_8 = arith.constant 9.99999974E-6 : f32
    %15 = vector.broadcast %cst_8 : f32 to vector<8x1xf32>
    %16 = arith.addf %14, %15 : vector<8x1xf32>
    %17 = math.rsqrt %16 : vector<8x1xf32>
    %18 = vector.broadcast %17 : vector<8x1xf32> to vector<8x32xf32>
    %19 = arith.mulf %9, %18 : vector<8x32xf32>
    %20 = vector.broadcast %2 : vector<1x32xf32> to vector<8x32xf32>
    %21 = arith.mulf %19, %20 : vector<8x32xf32>
    %22 = vector.broadcast %3 : vector<1x32xf32> to vector<8x32xf32>
    %23 = arith.addf %21, %22 : vector<8x32xf32>
    %c0_9 = arith.constant 0 : index
    %c0_10 = arith.constant 0 : index
    %24 = vector.load %arg2[%c0_9, %c0_10] : memref<31x32xf32, #tpu.memory_space<vmem>>, vector<31x32xf32>
    %c0_11 = arith.constant 0 : index
    %c0_12 = arith.constant 0 : index
    %25 = vector.load %arg4[%c0_11, %c0_12] : memref<32x96xf32, #tpu.memory_space<vmem>>, vector<32x96xf32>
    %cst_13 = arith.constant dense<0.000000e+00> : vector<31x96xf32>
    %26 = tpu.matmul %24, %25, %cst_13 {dimension_numbers = #tpu.dot_dimension_numbers<[1], [0], [0], [1], [0, 0, 1, 1], [], []>} : vector<31x32xf32>, vector<32x96xf32>, vector<31x96xf32> -> vector<31x96xf32>
    %27 = tpu.iota {dimensions = array<i32: 0>} : vector<8x8xi32>
    %28 = tpu.iota {dimensions = array<i32: 1>} : vector<8x8xi32>
    %29 = arith.cmpi sle, %28, %27 : vector<8x8xi32>
    %c0_14 = arith.constant 0 : index
    %c0_15 = arith.constant 0 : index
    %c0_16 = arith.constant 0 : index
    %30 = vector.load %arg3[%c0_14, %c0_15, %c0_16] : memref<3x32x128xf32, #tpu.memory_space<vmem>>, vector<1x32x128xf32>
    %31 = vector.shape_cast %30 : vector<1x32x128xf32> to vector<32x128xf32>
    %c0_17 = arith.constant 0 : index
    %c0_18 = arith.constant 0 : index
    %c0_19 = arith.constant 0 : index
    %32 = vector.load %arg6[%c0_17, %c0_18, %c0_19] : memref<3x8x32xf32, #tpu.memory_space<vmem>>, vector<1x8x32xf32>
    %33 = vector.shape_cast %32 : vector<1x8x32xf32> to vector<8x32xf32>
    %34 = vector.extract_strided_slice %31 {offsets = [0, 0], sizes = [32, 96], strides = [1, 1]} : vector<32x128xf32> to vector<32x96xf32>
    %cst_20 = arith.constant dense<0.000000e+00> : vector<8x96xf32>
    %35 = tpu.matmul %23, %34, %cst_20 {dimension_numbers = #tpu.dot_dimension_numbers<[1], [0], [0], [1], [0, 0, 1, 1], [], []>} : vector<8x32xf32>, vector<32x96xf32>, vector<8x96xf32> -> vector<8x96xf32>
    %36 = vector.extract_strided_slice %35 {offsets = [0, 0], sizes = [8, 32], strides = [1, 1]} : vector<8x96xf32> to vector<8x32xf32>
    %37 = vector.extract_strided_slice %35 {offsets = [0, 32], sizes = [8, 32], strides = [1, 1]} : vector<8x96xf32> to vector<8x32xf32>
    %38 = vector.extract_strided_slice %35 {offsets = [0, 64], sizes = [8, 32], strides = [1, 1]} : vector<8x96xf32> to vector<8x32xf32>
    %39 = vector.extract_strided_slice %33 {offsets = [6, 0], sizes = [1, 32], strides = [1, 1]} : vector<8x32xf32> to vector<1x32xf32>
    %40 = vector.broadcast %39 : vector<1x32xf32> to vector<8x32xf32>
    %41 = arith.addf %36, %40 : vector<8x32xf32>
    %42 = vector.extract_strided_slice %33 {offsets = [7, 0], sizes = [1, 32], strides = [1, 1]} : vector<8x32xf32> to vector<1x32xf32>
    %43 = vector.broadcast %42 : vector<1x32xf32> to vector<8x32xf32>
    %44 = arith.addf %36, %43 : vector<8x32xf32>
    %45 = vector.extract_strided_slice %26 {offsets = [0, 0], sizes = [31, 32], strides = [1, 1]} : vector<31x96xf32> to vector<31x32xf32>
    %46 = vector.extract_strided_slice %41 {offsets = [0, 0], sizes = [8, 8], strides = [1, 1]} : vector<8x32xf32> to vector<8x8xf32>
    %47 = vector.extract_strided_slice %37 {offsets = [0, 0], sizes = [8, 8], strides = [1, 1]} : vector<8x32xf32> to vector<8x8xf32>
    %cst_21 = arith.constant dense<0.000000e+00> : vector<8x8xf32>
    %48 = tpu.matmul %46, %47, %cst_21 {dimension_numbers = #tpu.dot_dimension_numbers<[1], [1], [0], [0], [0, 0, 1, 0], [], []>} : vector<8x8xf32>, vector<8x8xf32>, vector<8x8xf32> -> vector<8x8xf32>
    %49 = vector.extract_strided_slice %44 {offsets = [0, 0], sizes = [8, 8], strides = [1, 1]} : vector<8x32xf32> to vector<8x8xf32>
    %50 = vector.extract_strided_slice %45 {offsets = [0, 0], sizes = [31, 8], strides = [1, 1]} : vector<31x32xf32> to vector<31x8xf32>
    %cst_22 = arith.constant dense<0.000000e+00> : vector<8x31xf32>
    %51 = tpu.matmul %49, %50, %cst_22 {dimension_numbers = #tpu.dot_dimension_numbers<[1], [1], [0], [0], [0, 0, 1, 0], [], []>} : vector<8x8xf32>, vector<31x8xf32>, vector<8x31xf32> -> vector<8x31xf32>
    %52 = vector.extract_strided_slice %51 {offsets = [0, 7], sizes = [1, 24], strides = [1, 1]} : vector<8x31xf32> to vector<1x24xf32>
    %53 = vector.extract_strided_slice %51 {offsets = [1, 6], sizes = [1, 24], strides = [1, 1]} : vector<8x31xf32> to vector<1x24xf32>
    %54 = vector.extract_strided_slice %51 {offsets = [2, 5], sizes = [1, 24], strides = [1, 1]} : vector<8x31xf32> to vector<1x24xf32>
    %55 = vector.extract_strided_slice %51 {offsets = [3, 4], sizes = [1, 24], strides = [1, 1]} : vector<8x31xf32> to vector<1x24xf32>
    %56 = vector.extract_strided_slice %51 {offsets = [4, 3], sizes = [1, 24], strides = [1, 1]} : vector<8x31xf32> to vector<1x24xf32>
    %57 = vector.extract_strided_slice %51 {offsets = [5, 2], sizes = [1, 24], strides = [1, 1]} : vector<8x31xf32> to vector<1x24xf32>
    %58 = vector.extract_strided_slice %51 {offsets = [6, 1], sizes = [1, 24], strides = [1, 1]} : vector<8x31xf32> to vector<1x24xf32>
    %59 = vector.extract_strided_slice %51 {offsets = [7, 0], sizes = [1, 24], strides = [1, 1]} : vector<8x31xf32> to vector<1x24xf32>
    %60 = tpu.concatenate %52, %53, %54, %55, %56, %57, %58, %59 in 0 : vector<1x24xf32>, vector<1x24xf32>, vector<1x24xf32>, vector<1x24xf32>, vector<1x24xf32>, vector<1x24xf32>, vector<1x24xf32>, vector<1x24xf32> -> vector<8x24xf32>
    %61 = vector.extract_strided_slice %60 {offsets = [0, 0], sizes = [8, 16], strides = [1, 1]} : vector<8x24xf32> to vector<8x16xf32>
    %cst_23 = arith.constant 0.353553385 : f32
    %62 = vector.broadcast %cst_23 : f32 to vector<8x16xf32>
    %63 = arith.mulf %61, %62 : vector<8x16xf32>
    %64 = vector.extract_strided_slice %60 {offsets = [0, 16], sizes = [8, 8], strides = [1, 1]} : vector<8x24xf32> to vector<8x8xf32>
    %65 = arith.addf %64, %48 : vector<8x8xf32>
    %cst_24 = arith.constant 0.353553385 : f32
    %66 = vector.broadcast %cst_24 : f32 to vector<8x8xf32>
    %67 = arith.mulf %65, %66 : vector<8x8xf32>
    %cst_25 = arith.constant -1.000000e+30 : f32
    %68 = vector.broadcast %cst_25 : f32 to vector<8x8xf32>
    %69 = arith.select %29, %67, %68 : vector<8x8xi1>, vector<8x8xf32>
    %cst_26 = arith.constant dense<0xFF800000> : vector<8xf32>
    %70 = vector.multi_reduction <maximumf>, %63, %cst_26 [1] : vector<8x16xf32> to vector<8xf32>
    %71 = vector.shape_cast %70 : vector<8xf32> to vector<8x1xf32>
    %cst_27 = arith.constant dense<0xFF800000> : vector<8xf32>
    %72 = vector.multi_reduction <maximumf>, %69, %cst_27 [1] : vector<8x8xf32> to vector<8xf32>
    %73 = vector.shape_cast %72 : vector<8xf32> to vector<8x1xf32>
    %74 = arith.maximumf %71, %73 : vector<8x1xf32>
    %75 = vector.broadcast %74 : vector<8x1xf32> to vector<8x16xf32>
    %76 = arith.subf %63, %75 : vector<8x16xf32>
    %77 = math.exp %76 : vector<8x16xf32>
    %78 = vector.broadcast %74 : vector<8x1xf32> to vector<8x8xf32>
    %79 = arith.subf %69, %78 : vector<8x8xf32>
    %80 = math.exp %79 : vector<8x8xf32>
    %cst_28 = arith.constant dense<0.000000e+00> : vector<8xf32>
    %81 = vector.multi_reduction <add>, %77, %cst_28 [1] : vector<8x16xf32> to vector<8xf32>
    %82 = vector.shape_cast %81 : vector<8xf32> to vector<8x1xf32>
    %cst_29 = arith.constant dense<0.000000e+00> : vector<8xf32>
    %83 = vector.multi_reduction <add>, %80, %cst_29 [1] : vector<8x8xf32> to vector<8xf32>
    %84 = vector.shape_cast %83 : vector<8xf32> to vector<8x1xf32>
    %85 = arith.addf %82, %84 : vector<8x1xf32>
    %86 = tpu.reciprocal %85 {approx = true} : vector<8x1xf32> -> vector<8x1xf32>
    %87 = vector.extract_strided_slice %38 {offsets = [0, 0], sizes = [8, 8], strides = [1, 1]} : vector<8x32xf32> to vector<8x8xf32>
    %cst_30 = arith.constant dense<0.000000e+00> : vector<8x8xf32>
    %88 = tpu.matmul %80, %87, %cst_30 {dimension_numbers = #tpu.dot_dimension_numbers<[1], [0], [0], [1], [0, 0, 1, 1], [], []>} : vector<8x8xf32>, vector<8x8xf32>, vector<8x8xf32> -> vector<8x8xf32>
    %89 = vector.broadcast %86 : vector<8x1xf32> to vector<8x8xf32>
    %90 = arith.mulf %88, %89 : vector<8x8xf32>
    %91 = vector.extract_strided_slice %41 {offsets = [0, 8], sizes = [8, 8], strides = [1, 1]} : vector<8x32xf32> to vector<8x8xf32>
    %92 = vector.extract_strided_slice %37 {offsets = [0, 8], sizes = [8, 8], strides = [1, 1]} : vector<8x32xf32> to vector<8x8xf32>
    %cst_31 = arith.constant dense<0.000000e+00> : vector<8x8xf32>
    %93 = tpu.matmul %91, %92, %cst_31 {dimension_numbers = #tpu.dot_dimension_numbers<[1], [1], [0], [0], [0, 0, 1, 0], [], []>} : vector<8x8xf32>, vector<8x8xf32>, vector<8x8xf32> -> vector<8x8xf32>
    %94 = vector.extract_strided_slice %44 {offsets = [0, 8], sizes = [8, 8], strides = [1, 1]} : vector<8x32xf32> to vector<8x8xf32>
    %95 = vector.extract_strided_slice %45 {offsets = [0, 8], sizes = [31, 8], strides = [1, 1]} : vector<31x32xf32> to vector<31x8xf32>
    %cst_32 = arith.constant dense<0.000000e+00> : vector<8x31xf32>
    %96 = tpu.matmul %94, %95, %cst_32 {dimension_numbers = #tpu.dot_dimension_numbers<[1], [1], [0], [0], [0, 0, 1, 0], [], []>} : vector<8x8xf32>, vector<31x8xf32>, vector<8x31xf32> -> vector<8x31xf32>
    %97 = vector.extract_strided_slice %96 {offsets = [0, 7], sizes = [1, 24], strides = [1, 1]} : vector<8x31xf32> to vector<1x24xf32>
    %98 = vector.extract_strided_slice %96 {offsets = [1, 6], sizes = [1, 24], strides = [1, 1]} : vector<8x31xf32> to vector<1x24xf32>
    %99 = vector.extract_strided_slice %96 {offsets = [2, 5], sizes = [1, 24], strides = [1, 1]} : vector<8x31xf32> to vector<1x24xf32>
    %100 = vector.extract_strided_slice %96 {offsets = [3, 4], sizes = [1, 24], strides = [1, 1]} : vector<8x31xf32> to vector<1x24xf32>
    %101 = vector.extract_strided_slice %96 {offsets = [4, 3], sizes = [1, 24], strides = [1, 1]} : vector<8x31xf32> to vector<1x24xf32>
    %102 = vector.extract_strided_slice %96 {offsets = [5, 2], sizes = [1, 24], strides = [1, 1]} : vector<8x31xf32> to vector<1x24xf32>
    %103 = vector.extract_strided_slice %96 {offsets = [6, 1], sizes = [1, 24], strides = [1, 1]} : vector<8x31xf32> to vector<1x24xf32>
    %104 = vector.extract_strided_slice %96 {offsets = [7, 0], sizes = [1, 24], strides = [1, 1]} : vector<8x31xf32> to vector<1x24xf32>
    %105 = tpu.concatenate %97, %98, %99, %100, %101, %102, %103, %104 in 0 : vector<1x24xf32>, vector<1x24xf32>, vector<1x24xf32>, vector<1x24xf32>, vector<1x24xf32>, vector<1x24xf32>, vector<1x24xf32>, vector<1x24xf32> -> vector<8x24xf32>
    %106 = vector.extract_strided_slice %105 {offsets = [0, 0], sizes = [8, 16], strides = [1, 1]} : vector<8x24xf32> to vector<8x16xf32>
    %cst_33 = arith.constant 0.353553385 : f32
    %107 = vector.broadcast %cst_33 : f32 to vector<8x16xf32>
    %108 = arith.mulf %106, %107 : vector<8x16xf32>
    %109 = vector.extract_strided_slice %105 {offsets = [0, 16], sizes = [8, 8], strides = [1, 1]} : vector<8x24xf32> to vector<8x8xf32>
    %110 = arith.addf %109, %93 : vector<8x8xf32>
    %cst_34 = arith.constant 0.353553385 : f32
    %111 = vector.broadcast %cst_34 : f32 to vector<8x8xf32>
    %112 = arith.mulf %110, %111 : vector<8x8xf32>
    %cst_35 = arith.constant -1.000000e+30 : f32
    %113 = vector.broadcast %cst_35 : f32 to vector<8x8xf32>
    %114 = arith.select %29, %112, %113 : vector<8x8xi1>, vector<8x8xf32>
    %cst_36 = arith.constant dense<0xFF800000> : vector<8xf32>
    %115 = vector.multi_reduction <maximumf>, %108, %cst_36 [1] : vector<8x16xf32> to vector<8xf32>
    %116 = vector.shape_cast %115 : vector<8xf32> to vector<8x1xf32>
    %cst_37 = arith.constant dense<0xFF800000> : vector<8xf32>
    %117 = vector.multi_reduction <maximumf>, %114, %cst_37 [1] : vector<8x8xf32> to vector<8xf32>
    %118 = vector.shape_cast %117 : vector<8xf32> to vector<8x1xf32>
    %119 = arith.maximumf %116, %118 : vector<8x1xf32>
    %120 = vector.broadcast %119 : vector<8x1xf32> to vector<8x16xf32>
    %121 = arith.subf %108, %120 : vector<8x16xf32>
    %122 = math.exp %121 : vector<8x16xf32>
    %123 = vector.broadcast %119 : vector<8x1xf32> to vector<8x8xf32>
    %124 = arith.subf %114, %123 : vector<8x8xf32>
    %125 = math.exp %124 : vector<8x8xf32>
    %cst_38 = arith.constant dense<0.000000e+00> : vector<8xf32>
    %126 = vector.multi_reduction <add>, %122, %cst_38 [1] : vector<8x16xf32> to vector<8xf32>
    %127 = vector.shape_cast %126 : vector<8xf32> to vector<8x1xf32>
    %cst_39 = arith.constant dense<0.000000e+00> : vector<8xf32>
    %128 = vector.multi_reduction <add>, %125, %cst_39 [1] : vector<8x8xf32> to vector<8xf32>
    %129 = vector.shape_cast %128 : vector<8xf32> to vector<8x1xf32>
    %130 = arith.addf %127, %129 : vector<8x1xf32>
    %131 = tpu.reciprocal %130 {approx = true} : vector<8x1xf32> -> vector<8x1xf32>
    %132 = vector.extract_strided_slice %38 {offsets = [0, 8], sizes = [8, 8], strides = [1, 1]} : vector<8x32xf32> to vector<8x8xf32>
    %cst_40 = arith.constant dense<0.000000e+00> : vector<8x8xf32>
    %133 = tpu.matmul %125, %132, %cst_40 {dimension_numbers = #tpu.dot_dimension_numbers<[1], [0], [0], [1], [0, 0, 1, 1], [], []>} : vector<8x8xf32>, vector<8x8xf32>, vector<8x8xf32> -> vector<8x8xf32>
    %134 = vector.broadcast %131 : vector<8x1xf32> to vector<8x8xf32>
    %135 = arith.mulf %133, %134 : vector<8x8xf32>
    %136 = vector.extract_strided_slice %41 {offsets = [0, 16], sizes = [8, 8], strides = [1, 1]} : vector<8x32xf32> to vector<8x8xf32>
    %137 = vector.extract_strided_slice %37 {offsets = [0, 16], sizes = [8, 8], strides = [1, 1]} : vector<8x32xf32> to vector<8x8xf32>
    %cst_41 = arith.constant dense<0.000000e+00> : vector<8x8xf32>
    %138 = tpu.matmul %136, %137, %cst_41 {dimension_numbers = #tpu.dot_dimension_numbers<[1], [1], [0], [0], [0, 0, 1, 0], [], []>} : vector<8x8xf32>, vector<8x8xf32>, vector<8x8xf32> -> vector<8x8xf32>
    %139 = vector.extract_strided_slice %44 {offsets = [0, 16], sizes = [8, 8], strides = [1, 1]} : vector<8x32xf32> to vector<8x8xf32>
    %140 = vector.extract_strided_slice %45 {offsets = [0, 16], sizes = [31, 8], strides = [1, 1]} : vector<31x32xf32> to vector<31x8xf32>
    %cst_42 = arith.constant dense<0.000000e+00> : vector<8x31xf32>
    %141 = tpu.matmul %139, %140, %cst_42 {dimension_numbers = #tpu.dot_dimension_numbers<[1], [1], [0], [0], [0, 0, 1, 0], [], []>} : vector<8x8xf32>, vector<31x8xf32>, vector<8x31xf32> -> vector<8x31xf32>
    %142 = vector.extract_strided_slice %141 {offsets = [0, 7], sizes = [1, 24], strides = [1, 1]} : vector<8x31xf32> to vector<1x24xf32>
    %143 = vector.extract_strided_slice %141 {offsets = [1, 6], sizes = [1, 24], strides = [1, 1]} : vector<8x31xf32> to vector<1x24xf32>
    %144 = vector.extract_strided_slice %141 {offsets = [2, 5], sizes = [1, 24], strides = [1, 1]} : vector<8x31xf32> to vector<1x24xf32>
    %145 = vector.extract_strided_slice %141 {offsets = [3, 4], sizes = [1, 24], strides = [1, 1]} : vector<8x31xf32> to vector<1x24xf32>
    %146 = vector.extract_strided_slice %141 {offsets = [4, 3], sizes = [1, 24], strides = [1, 1]} : vector<8x31xf32> to vector<1x24xf32>
    %147 = vector.extract_strided_slice %141 {offsets = [5, 2], sizes = [1, 24], strides = [1, 1]} : vector<8x31xf32> to vector<1x24xf32>
    %148 = vector.extract_strided_slice %141 {offsets = [6, 1], sizes = [1, 24], strides = [1, 1]} : vector<8x31xf32> to vector<1x24xf32>
    %149 = vector.extract_strided_slice %141 {offsets = [7, 0], sizes = [1, 24], strides = [1, 1]} : vector<8x31xf32> to vector<1x24xf32>
    %150 = tpu.concatenate %142, %143, %144, %145, %146, %147, %148, %149 in 0 : vector<1x24xf32>, vector<1x24xf32>, vector<1x24xf32>, vector<1x24xf32>, vector<1x24xf32>, vector<1x24xf32>, vector<1x24xf32>, vector<1x24xf32> -> vector<8x24xf32>
    %151 = vector.extract_strided_slice %150 {offsets = [0, 0], sizes = [8, 16], strides = [1, 1]} : vector<8x24xf32> to vector<8x16xf32>
    %cst_43 = arith.constant 0.353553385 : f32
    %152 = vector.broadcast %cst_43 : f32 to vector<8x16xf32>
    %153 = arith.mulf %151, %152 : vector<8x16xf32>
    %154 = vector.extract_strided_slice %150 {offsets = [0, 16], sizes = [8, 8], strides = [1, 1]} : vector<8x24xf32> to vector<8x8xf32>
    %155 = arith.addf %154, %138 : vector<8x8xf32>
    %cst_44 = arith.constant 0.353553385 : f32
    %156 = vector.broadcast %cst_44 : f32 to vector<8x8xf32>
    %157 = arith.mulf %155, %156 : vector<8x8xf32>
    %cst_45 = arith.constant -1.000000e+30 : f32
    %158 = vector.broadcast %cst_45 : f32 to vector<8x8xf32>
    %159 = arith.select %29, %157, %158 : vector<8x8xi1>, vector<8x8xf32>
    %cst_46 = arith.constant dense<0xFF800000> : vector<8xf32>
    %160 = vector.multi_reduction <maximumf>, %153, %cst_46 [1] : vector<8x16xf32> to vector<8xf32>
    %161 = vector.shape_cast %160 : vector<8xf32> to vector<8x1xf32>
    %cst_47 = arith.constant dense<0xFF800000> : vector<8xf32>
    %162 = vector.multi_reduction <maximumf>, %159, %cst_47 [1] : vector<8x8xf32> to vector<8xf32>
    %163 = vector.shape_cast %162 : vector<8xf32> to vector<8x1xf32>
    %164 = arith.maximumf %161, %163 : vector<8x1xf32>
    %165 = vector.broadcast %164 : vector<8x1xf32> to vector<8x16xf32>
    %166 = arith.subf %153, %165 : vector<8x16xf32>
    %167 = math.exp %166 : vector<8x16xf32>
    %168 = vector.broadcast %164 : vector<8x1xf32> to vector<8x8xf32>
    %169 = arith.subf %159, %168 : vector<8x8xf32>
    %170 = math.exp %169 : vector<8x8xf32>
    %cst_48 = arith.constant dense<0.000000e+00> : vector<8xf32>
    %171 = vector.multi_reduction <add>, %167, %cst_48 [1] : vector<8x16xf32> to vector<8xf32>
    %172 = vector.shape_cast %171 : vector<8xf32> to vector<8x1xf32>
    %cst_49 = arith.constant dense<0.000000e+00> : vector<8xf32>
    %173 = vector.multi_reduction <add>, %170, %cst_49 [1] : vector<8x8xf32> to vector<8xf32>
    %174 = vector.shape_cast %173 : vector<8xf32> to vector<8x1xf32>
    %175 = arith.addf %172, %174 : vector<8x1xf32>
    %176 = tpu.reciprocal %175 {approx = true} : vector<8x1xf32> -> vector<8x1xf32>
    %177 = vector.extract_strided_slice %38 {offsets = [0, 16], sizes = [8, 8], strides = [1, 1]} : vector<8x32xf32> to vector<8x8xf32>
    %cst_50 = arith.constant dense<0.000000e+00> : vector<8x8xf32>
    %178 = tpu.matmul %170, %177, %cst_50 {dimension_numbers = #tpu.dot_dimension_numbers<[1], [0], [0], [1], [0, 0, 1, 1], [], []>} : vector<8x8xf32>, vector<8x8xf32>, vector<8x8xf32> -> vector<8x8xf32>
    %179 = vector.broadcast %176 : vector<8x1xf32> to vector<8x8xf32>
    %180 = arith.mulf %178, %179 : vector<8x8xf32>
    %181 = vector.extract_strided_slice %41 {offsets = [0, 24], sizes = [8, 8], strides = [1, 1]} : vector<8x32xf32> to vector<8x8xf32>
    %182 = vector.extract_strided_slice %37 {offsets = [0, 24], sizes = [8, 8], strides = [1, 1]} : vector<8x32xf32> to vector<8x8xf32>
    %cst_51 = arith.constant dense<0.000000e+00> : vector<8x8xf32>
    %183 = tpu.matmul %181, %182, %cst_51 {dimension_numbers = #tpu.dot_dimension_numbers<[1], [1], [0], [0], [0, 0, 1, 0], [], []>} : vector<8x8xf32>, vector<8x8xf32>, vector<8x8xf32> -> vector<8x8xf32>
    %184 = vector.extract_strided_slice %44 {offsets = [0, 24], sizes = [8, 8], strides = [1, 1]} : vector<8x32xf32> to vector<8x8xf32>
    %185 = vector.extract_strided_slice %45 {offsets = [0, 24], sizes = [31, 8], strides = [1, 1]} : vector<31x32xf32> to vector<31x8xf32>
    %cst_52 = arith.constant dense<0.000000e+00> : vector<8x31xf32>
    %186 = tpu.matmul %184, %185, %cst_52 {dimension_numbers = #tpu.dot_dimension_numbers<[1], [1], [0], [0], [0, 0, 1, 0], [], []>} : vector<8x8xf32>, vector<31x8xf32>, vector<8x31xf32> -> vector<8x31xf32>
    %187 = vector.extract_strided_slice %186 {offsets = [0, 7], sizes = [1, 24], strides = [1, 1]} : vector<8x31xf32> to vector<1x24xf32>
    %188 = vector.extract_strided_slice %186 {offsets = [1, 6], sizes = [1, 24], strides = [1, 1]} : vector<8x31xf32> to vector<1x24xf32>
    %189 = vector.extract_strided_slice %186 {offsets = [2, 5], sizes = [1, 24], strides = [1, 1]} : vector<8x31xf32> to vector<1x24xf32>
    %190 = vector.extract_strided_slice %186 {offsets = [3, 4], sizes = [1, 24], strides = [1, 1]} : vector<8x31xf32> to vector<1x24xf32>
    %191 = vector.extract_strided_slice %186 {offsets = [4, 3], sizes = [1, 24], strides = [1, 1]} : vector<8x31xf32> to vector<1x24xf32>
    %192 = vector.extract_strided_slice %186 {offsets = [5, 2], sizes = [1, 24], strides = [1, 1]} : vector<8x31xf32> to vector<1x24xf32>
    %193 = vector.extract_strided_slice %186 {offsets = [6, 1], sizes = [1, 24], strides = [1, 1]} : vector<8x31xf32> to vector<1x24xf32>
    %194 = vector.extract_strided_slice %186 {offsets = [7, 0], sizes = [1, 24], strides = [1, 1]} : vector<8x31xf32> to vector<1x24xf32>
    %195 = tpu.concatenate %187, %188, %189, %190, %191, %192, %193, %194 in 0 : vector<1x24xf32>, vector<1x24xf32>, vector<1x24xf32>, vector<1x24xf32>, vector<1x24xf32>, vector<1x24xf32>, vector<1x24xf32>, vector<1x24xf32> -> vector<8x24xf32>
    %196 = vector.extract_strided_slice %195 {offsets = [0, 0], sizes = [8, 16], strides = [1, 1]} : vector<8x24xf32> to vector<8x16xf32>
    %cst_53 = arith.constant 0.353553385 : f32
    %197 = vector.broadcast %cst_53 : f32 to vector<8x16xf32>
    %198 = arith.mulf %196, %197 : vector<8x16xf32>
    %199 = vector.extract_strided_slice %195 {offsets = [0, 16], sizes = [8, 8], strides = [1, 1]} : vector<8x24xf32> to vector<8x8xf32>
    %200 = arith.addf %199, %183 : vector<8x8xf32>
    %cst_54 = arith.constant 0.353553385 : f32
    %201 = vector.broadcast %cst_54 : f32 to vector<8x8xf32>
    %202 = arith.mulf %200, %201 : vector<8x8xf32>
    %cst_55 = arith.constant -1.000000e+30 : f32
    %203 = vector.broadcast %cst_55 : f32 to vector<8x8xf32>
    %204 = arith.select %29, %202, %203 : vector<8x8xi1>, vector<8x8xf32>
    %cst_56 = arith.constant dense<0xFF800000> : vector<8xf32>
    %205 = vector.multi_reduction <maximumf>, %198, %cst_56 [1] : vector<8x16xf32> to vector<8xf32>
    %206 = vector.shape_cast %205 : vector<8xf32> to vector<8x1xf32>
    %cst_57 = arith.constant dense<0xFF800000> : vector<8xf32>
    %207 = vector.multi_reduction <maximumf>, %204, %cst_57 [1] : vector<8x8xf32> to vector<8xf32>
    %208 = vector.shape_cast %207 : vector<8xf32> to vector<8x1xf32>
    %209 = arith.maximumf %206, %208 : vector<8x1xf32>
    %210 = vector.broadcast %209 : vector<8x1xf32> to vector<8x16xf32>
    %211 = arith.subf %198, %210 : vector<8x16xf32>
    %212 = math.exp %211 : vector<8x16xf32>
    %213 = vector.broadcast %209 : vector<8x1xf32> to vector<8x8xf32>
    %214 = arith.subf %204, %213 : vector<8x8xf32>
    %215 = math.exp %214 : vector<8x8xf32>
    %cst_58 = arith.constant dense<0.000000e+00> : vector<8xf32>
    %216 = vector.multi_reduction <add>, %212, %cst_58 [1] : vector<8x16xf32> to vector<8xf32>
    %217 = vector.shape_cast %216 : vector<8xf32> to vector<8x1xf32>
    %cst_59 = arith.constant dense<0.000000e+00> : vector<8xf32>
    %218 = vector.multi_reduction <add>, %215, %cst_59 [1] : vector<8x8xf32> to vector<8xf32>
    %219 = vector.shape_cast %218 : vector<8xf32> to vector<8x1xf32>
    %220 = arith.addf %217, %219 : vector<8x1xf32>
    %221 = tpu.reciprocal %220 {approx = true} : vector<8x1xf32> -> vector<8x1xf32>
    %222 = vector.extract_strided_slice %38 {offsets = [0, 24], sizes = [8, 8], strides = [1, 1]} : vector<8x32xf32> to vector<8x8xf32>
    %cst_60 = arith.constant dense<0.000000e+00> : vector<8x8xf32>
    %223 = tpu.matmul %215, %222, %cst_60 {dimension_numbers = #tpu.dot_dimension_numbers<[1], [0], [0], [1], [0, 0, 1, 1], [], []>} : vector<8x8xf32>, vector<8x8xf32>, vector<8x8xf32> -> vector<8x8xf32>
    %224 = vector.broadcast %221 : vector<8x1xf32> to vector<8x8xf32>
    %225 = arith.mulf %223, %224 : vector<8x8xf32>
    %226 = tpu.concatenate %90, %135, %180, %225 in 1 : vector<8x8xf32>, vector<8x8xf32>, vector<8x8xf32>, vector<8x8xf32> -> vector<8x32xf32>
    %c0_61 = arith.constant 0 : index
    %c0_62 = arith.constant 0 : index
    %c0_63 = arith.constant 0 : index
    %227 = vector.load %arg5[%c0_61, %c0_62, %c0_63] : memref<3x64x32xf32, #tpu.memory_space<vmem>>, vector<1x32x32xf32>
    %228 = vector.shape_cast %227 : vector<1x32x32xf32> to vector<32x32xf32>
    %cst_64 = arith.constant dense<0.000000e+00> : vector<8x32xf32>
    %229 = tpu.matmul %226, %228, %cst_64 {dimension_numbers = #tpu.dot_dimension_numbers<[1], [0], [0], [1], [0, 0, 1, 1], [], []>} : vector<8x32xf32>, vector<32x32xf32>, vector<8x32xf32> -> vector<8x32xf32>
    %230 = arith.addf %23, %229 : vector<8x32xf32>
    %231 = vector.extract_strided_slice %33 {offsets = [0, 0], sizes = [1, 32], strides = [1, 1]} : vector<8x32xf32> to vector<1x32xf32>
    %232 = vector.extract_strided_slice %33 {offsets = [1, 0], sizes = [1, 32], strides = [1, 1]} : vector<8x32xf32> to vector<1x32xf32>
    %cst_65 = arith.constant dense<0.000000e+00> : vector<8xf32>
    %233 = vector.multi_reduction <add>, %230, %cst_65 [1] : vector<8x32xf32> to vector<8xf32>
    %234 = vector.shape_cast %233 : vector<8xf32> to vector<8x1xf32>
    %cst_66 = arith.constant 3.200000e+01 : f32
    %235 = vector.broadcast %cst_66 : f32 to vector<8x1xf32>
    %236 = arith.divf %234, %235 : vector<8x1xf32>
    %237 = vector.broadcast %236 : vector<8x1xf32> to vector<8x32xf32>
    %238 = arith.subf %230, %237 : vector<8x32xf32>
    %239 = arith.mulf %238, %238 : vector<8x32xf32>
    %cst_67 = arith.constant dense<0.000000e+00> : vector<8xf32>
    %240 = vector.multi_reduction <add>, %239, %cst_67 [1] : vector<8x32xf32> to vector<8xf32>
    %241 = vector.shape_cast %240 : vector<8xf32> to vector<8x1xf32>
    %cst_68 = arith.constant 3.200000e+01 : f32
    %242 = vector.broadcast %cst_68 : f32 to vector<8x1xf32>
    %243 = arith.divf %241, %242 : vector<8x1xf32>
    %cst_69 = arith.constant 9.99999974E-6 : f32
    %244 = vector.broadcast %cst_69 : f32 to vector<8x1xf32>
    %245 = arith.addf %243, %244 : vector<8x1xf32>
    %246 = math.rsqrt %245 : vector<8x1xf32>
    %247 = vector.broadcast %246 : vector<8x1xf32> to vector<8x32xf32>
    %248 = arith.mulf %238, %247 : vector<8x32xf32>
    %249 = vector.broadcast %231 : vector<1x32xf32> to vector<8x32xf32>
    %250 = arith.mulf %248, %249 : vector<8x32xf32>
    %251 = vector.broadcast %232 : vector<1x32xf32> to vector<8x32xf32>
    %252 = arith.addf %250, %251 : vector<8x32xf32>
    %253 = vector.extract_strided_slice %31 {offsets = [0, 96], sizes = [32, 32], strides = [1, 1]} : vector<32x128xf32> to vector<32x32xf32>
    %cst_70 = arith.constant dense<0.000000e+00> : vector<8x32xf32>
    %254 = tpu.matmul %252, %253, %cst_70 {dimension_numbers = #tpu.dot_dimension_numbers<[1], [0], [0], [1], [0, 0, 1, 1], [], []>} : vector<8x32xf32>, vector<32x32xf32>, vector<8x32xf32> -> vector<8x32xf32>
    %255 = vector.extract_strided_slice %33 {offsets = [2, 0], sizes = [1, 32], strides = [1, 1]} : vector<8x32xf32> to vector<1x32xf32>
    %256 = vector.broadcast %255 : vector<1x32xf32> to vector<8x32xf32>
    %257 = arith.addf %254, %256 : vector<8x32xf32>
    %cst_71 = arith.constant 0.000000e+00 : f32
    %258 = vector.broadcast %cst_71 : f32 to vector<8x32xf32>
    %259 = arith.maximumf %257, %258 : vector<8x32xf32>
    %c0_72 = arith.constant 0 : index
    %c32 = arith.constant 32 : index
    %c0_73 = arith.constant 0 : index
    %260 = vector.load %arg5[%c0_72, %c32, %c0_73] : memref<3x64x32xf32, #tpu.memory_space<vmem>>, vector<1x32x32xf32>
    %261 = vector.shape_cast %260 : vector<1x32x32xf32> to vector<32x32xf32>
    %cst_74 = arith.constant dense<0.000000e+00> : vector<8x32xf32>
    %262 = tpu.matmul %259, %261, %cst_74 {dimension_numbers = #tpu.dot_dimension_numbers<[1], [0], [0], [1], [0, 0, 1, 1], [], []>} : vector<8x32xf32>, vector<32x32xf32>, vector<8x32xf32> -> vector<8x32xf32>
    %263 = vector.extract_strided_slice %33 {offsets = [3, 0], sizes = [1, 32], strides = [1, 1]} : vector<8x32xf32> to vector<1x32xf32>
    %264 = vector.broadcast %263 : vector<1x32xf32> to vector<8x32xf32>
    %265 = arith.addf %262, %264 : vector<8x32xf32>
    %266 = arith.addf %252, %265 : vector<8x32xf32>
    %267 = vector.extract_strided_slice %33 {offsets = [4, 0], sizes = [1, 32], strides = [1, 1]} : vector<8x32xf32> to vector<1x32xf32>
    %268 = vector.extract_strided_slice %33 {offsets = [5, 0], sizes = [1, 32], strides = [1, 1]} : vector<8x32xf32> to vector<1x32xf32>
    %cst_75 = arith.constant dense<0.000000e+00> : vector<8xf32>
    %269 = vector.multi_reduction <add>, %266, %cst_75 [1] : vector<8x32xf32> to vector<8xf32>
    %270 = vector.shape_cast %269 : vector<8xf32> to vector<8x1xf32>
    %cst_76 = arith.constant 3.200000e+01 : f32
    %271 = vector.broadcast %cst_76 : f32 to vector<8x1xf32>
    %272 = arith.divf %270, %271 : vector<8x1xf32>
    %273 = vector.broadcast %272 : vector<8x1xf32> to vector<8x32xf32>
    %274 = arith.subf %266, %273 : vector<8x32xf32>
    %275 = arith.mulf %274, %274 : vector<8x32xf32>
    %cst_77 = arith.constant dense<0.000000e+00> : vector<8xf32>
    %276 = vector.multi_reduction <add>, %275, %cst_77 [1] : vector<8x32xf32> to vector<8xf32>
    %277 = vector.shape_cast %276 : vector<8xf32> to vector<8x1xf32>
    %cst_78 = arith.constant 3.200000e+01 : f32
    %278 = vector.broadcast %cst_78 : f32 to vector<8x1xf32>
    %279 = arith.divf %277, %278 : vector<8x1xf32>
    %cst_79 = arith.constant 9.99999974E-6 : f32
    %280 = vector.broadcast %cst_79 : f32 to vector<8x1xf32>
    %281 = arith.addf %279, %280 : vector<8x1xf32>
    %282 = math.rsqrt %281 : vector<8x1xf32>
    %283 = vector.broadcast %282 : vector<8x1xf32> to vector<8x32xf32>
    %284 = arith.mulf %274, %283 : vector<8x32xf32>
    %285 = vector.broadcast %267 : vector<1x32xf32> to vector<8x32xf32>
    %286 = arith.mulf %284, %285 : vector<8x32xf32>
    %287 = vector.broadcast %268 : vector<1x32xf32> to vector<8x32xf32>
    %288 = arith.addf %286, %287 : vector<8x32xf32>
    %c1_80 = arith.constant 1 : index
    %c0_81 = arith.constant 0 : index
    %c0_82 = arith.constant 0 : index
    %289 = vector.load %arg3[%c1_80, %c0_81, %c0_82] : memref<3x32x128xf32, #tpu.memory_space<vmem>>, vector<1x32x128xf32>
    %290 = vector.shape_cast %289 : vector<1x32x128xf32> to vector<32x128xf32>
    %c1_83 = arith.constant 1 : index
    %c0_84 = arith.constant 0 : index
    %c0_85 = arith.constant 0 : index
    %291 = vector.load %arg6[%c1_83, %c0_84, %c0_85] : memref<3x8x32xf32, #tpu.memory_space<vmem>>, vector<1x8x32xf32>
    %292 = vector.shape_cast %291 : vector<1x8x32xf32> to vector<8x32xf32>
    %293 = vector.extract_strided_slice %290 {offsets = [0, 0], sizes = [32, 96], strides = [1, 1]} : vector<32x128xf32> to vector<32x96xf32>
    %cst_86 = arith.constant dense<0.000000e+00> : vector<8x96xf32>
    %294 = tpu.matmul %288, %293, %cst_86 {dimension_numbers = #tpu.dot_dimension_numbers<[1], [0], [0], [1], [0, 0, 1, 1], [], []>} : vector<8x32xf32>, vector<32x96xf32>, vector<8x96xf32> -> vector<8x96xf32>
    %295 = vector.extract_strided_slice %294 {offsets = [0, 0], sizes = [8, 32], strides = [1, 1]} : vector<8x96xf32> to vector<8x32xf32>
    %296 = vector.extract_strided_slice %294 {offsets = [0, 32], sizes = [8, 32], strides = [1, 1]} : vector<8x96xf32> to vector<8x32xf32>
    %297 = vector.extract_strided_slice %294 {offsets = [0, 64], sizes = [8, 32], strides = [1, 1]} : vector<8x96xf32> to vector<8x32xf32>
    %298 = vector.extract_strided_slice %292 {offsets = [6, 0], sizes = [1, 32], strides = [1, 1]} : vector<8x32xf32> to vector<1x32xf32>
    %299 = vector.broadcast %298 : vector<1x32xf32> to vector<8x32xf32>
    %300 = arith.addf %295, %299 : vector<8x32xf32>
    %301 = vector.extract_strided_slice %292 {offsets = [7, 0], sizes = [1, 32], strides = [1, 1]} : vector<8x32xf32> to vector<1x32xf32>
    %302 = vector.broadcast %301 : vector<1x32xf32> to vector<8x32xf32>
    %303 = arith.addf %295, %302 : vector<8x32xf32>
    %304 = vector.extract_strided_slice %26 {offsets = [0, 32], sizes = [31, 32], strides = [1, 1]} : vector<31x96xf32> to vector<31x32xf32>
    %305 = vector.extract_strided_slice %300 {offsets = [0, 0], sizes = [8, 8], strides = [1, 1]} : vector<8x32xf32> to vector<8x8xf32>
    %306 = vector.extract_strided_slice %296 {offsets = [0, 0], sizes = [8, 8], strides = [1, 1]} : vector<8x32xf32> to vector<8x8xf32>
    %cst_87 = arith.constant dense<0.000000e+00> : vector<8x8xf32>
    %307 = tpu.matmul %305, %306, %cst_87 {dimension_numbers = #tpu.dot_dimension_numbers<[1], [1], [0], [0], [0, 0, 1, 0], [], []>} : vector<8x8xf32>, vector<8x8xf32>, vector<8x8xf32> -> vector<8x8xf32>
    %308 = vector.extract_strided_slice %303 {offsets = [0, 0], sizes = [8, 8], strides = [1, 1]} : vector<8x32xf32> to vector<8x8xf32>
    %309 = vector.extract_strided_slice %304 {offsets = [0, 0], sizes = [31, 8], strides = [1, 1]} : vector<31x32xf32> to vector<31x8xf32>
    %cst_88 = arith.constant dense<0.000000e+00> : vector<8x31xf32>
    %310 = tpu.matmul %308, %309, %cst_88 {dimension_numbers = #tpu.dot_dimension_numbers<[1], [1], [0], [0], [0, 0, 1, 0], [], []>} : vector<8x8xf32>, vector<31x8xf32>, vector<8x31xf32> -> vector<8x31xf32>
    %311 = vector.extract_strided_slice %310 {offsets = [0, 7], sizes = [1, 24], strides = [1, 1]} : vector<8x31xf32> to vector<1x24xf32>
    %312 = vector.extract_strided_slice %310 {offsets = [1, 6], sizes = [1, 24], strides = [1, 1]} : vector<8x31xf32> to vector<1x24xf32>
    %313 = vector.extract_strided_slice %310 {offsets = [2, 5], sizes = [1, 24], strides = [1, 1]} : vector<8x31xf32> to vector<1x24xf32>
    %314 = vector.extract_strided_slice %310 {offsets = [3, 4], sizes = [1, 24], strides = [1, 1]} : vector<8x31xf32> to vector<1x24xf32>
    %315 = vector.extract_strided_slice %310 {offsets = [4, 3], sizes = [1, 24], strides = [1, 1]} : vector<8x31xf32> to vector<1x24xf32>
    %316 = vector.extract_strided_slice %310 {offsets = [5, 2], sizes = [1, 24], strides = [1, 1]} : vector<8x31xf32> to vector<1x24xf32>
    %317 = vector.extract_strided_slice %310 {offsets = [6, 1], sizes = [1, 24], strides = [1, 1]} : vector<8x31xf32> to vector<1x24xf32>
    %318 = vector.extract_strided_slice %310 {offsets = [7, 0], sizes = [1, 24], strides = [1, 1]} : vector<8x31xf32> to vector<1x24xf32>
    %319 = tpu.concatenate %311, %312, %313, %314, %315, %316, %317, %318 in 0 : vector<1x24xf32>, vector<1x24xf32>, vector<1x24xf32>, vector<1x24xf32>, vector<1x24xf32>, vector<1x24xf32>, vector<1x24xf32>, vector<1x24xf32> -> vector<8x24xf32>
    %320 = vector.extract_strided_slice %319 {offsets = [0, 0], sizes = [8, 16], strides = [1, 1]} : vector<8x24xf32> to vector<8x16xf32>
    %cst_89 = arith.constant 0.353553385 : f32
    %321 = vector.broadcast %cst_89 : f32 to vector<8x16xf32>
    %322 = arith.mulf %320, %321 : vector<8x16xf32>
    %323 = vector.extract_strided_slice %319 {offsets = [0, 16], sizes = [8, 8], strides = [1, 1]} : vector<8x24xf32> to vector<8x8xf32>
    %324 = arith.addf %323, %307 : vector<8x8xf32>
    %cst_90 = arith.constant 0.353553385 : f32
    %325 = vector.broadcast %cst_90 : f32 to vector<8x8xf32>
    %326 = arith.mulf %324, %325 : vector<8x8xf32>
    %cst_91 = arith.constant -1.000000e+30 : f32
    %327 = vector.broadcast %cst_91 : f32 to vector<8x8xf32>
    %328 = arith.select %29, %326, %327 : vector<8x8xi1>, vector<8x8xf32>
    %cst_92 = arith.constant dense<0xFF800000> : vector<8xf32>
    %329 = vector.multi_reduction <maximumf>, %322, %cst_92 [1] : vector<8x16xf32> to vector<8xf32>
    %330 = vector.shape_cast %329 : vector<8xf32> to vector<8x1xf32>
    %cst_93 = arith.constant dense<0xFF800000> : vector<8xf32>
    %331 = vector.multi_reduction <maximumf>, %328, %cst_93 [1] : vector<8x8xf32> to vector<8xf32>
    %332 = vector.shape_cast %331 : vector<8xf32> to vector<8x1xf32>
    %333 = arith.maximumf %330, %332 : vector<8x1xf32>
    %334 = vector.broadcast %333 : vector<8x1xf32> to vector<8x16xf32>
    %335 = arith.subf %322, %334 : vector<8x16xf32>
    %336 = math.exp %335 : vector<8x16xf32>
    %337 = vector.broadcast %333 : vector<8x1xf32> to vector<8x8xf32>
    %338 = arith.subf %328, %337 : vector<8x8xf32>
    %339 = math.exp %338 : vector<8x8xf32>
    %cst_94 = arith.constant dense<0.000000e+00> : vector<8xf32>
    %340 = vector.multi_reduction <add>, %336, %cst_94 [1] : vector<8x16xf32> to vector<8xf32>
    %341 = vector.shape_cast %340 : vector<8xf32> to vector<8x1xf32>
    %cst_95 = arith.constant dense<0.000000e+00> : vector<8xf32>
    %342 = vector.multi_reduction <add>, %339, %cst_95 [1] : vector<8x8xf32> to vector<8xf32>
    %343 = vector.shape_cast %342 : vector<8xf32> to vector<8x1xf32>
    %344 = arith.addf %341, %343 : vector<8x1xf32>
    %345 = tpu.reciprocal %344 {approx = true} : vector<8x1xf32> -> vector<8x1xf32>
    %346 = vector.extract_strided_slice %297 {offsets = [0, 0], sizes = [8, 8], strides = [1, 1]} : vector<8x32xf32> to vector<8x8xf32>
    %cst_96 = arith.constant dense<0.000000e+00> : vector<8x8xf32>
    %347 = tpu.matmul %339, %346, %cst_96 {dimension_numbers = #tpu.dot_dimension_numbers<[1], [0], [0], [1], [0, 0, 1, 1], [], []>} : vector<8x8xf32>, vector<8x8xf32>, vector<8x8xf32> -> vector<8x8xf32>
    %348 = vector.broadcast %345 : vector<8x1xf32> to vector<8x8xf32>
    %349 = arith.mulf %347, %348 : vector<8x8xf32>
    %350 = vector.extract_strided_slice %300 {offsets = [0, 8], sizes = [8, 8], strides = [1, 1]} : vector<8x32xf32> to vector<8x8xf32>
    %351 = vector.extract_strided_slice %296 {offsets = [0, 8], sizes = [8, 8], strides = [1, 1]} : vector<8x32xf32> to vector<8x8xf32>
    %cst_97 = arith.constant dense<0.000000e+00> : vector<8x8xf32>
    %352 = tpu.matmul %350, %351, %cst_97 {dimension_numbers = #tpu.dot_dimension_numbers<[1], [1], [0], [0], [0, 0, 1, 0], [], []>} : vector<8x8xf32>, vector<8x8xf32>, vector<8x8xf32> -> vector<8x8xf32>
    %353 = vector.extract_strided_slice %303 {offsets = [0, 8], sizes = [8, 8], strides = [1, 1]} : vector<8x32xf32> to vector<8x8xf32>
    %354 = vector.extract_strided_slice %304 {offsets = [0, 8], sizes = [31, 8], strides = [1, 1]} : vector<31x32xf32> to vector<31x8xf32>
    %cst_98 = arith.constant dense<0.000000e+00> : vector<8x31xf32>
    %355 = tpu.matmul %353, %354, %cst_98 {dimension_numbers = #tpu.dot_dimension_numbers<[1], [1], [0], [0], [0, 0, 1, 0], [], []>} : vector<8x8xf32>, vector<31x8xf32>, vector<8x31xf32> -> vector<8x31xf32>
    %356 = vector.extract_strided_slice %355 {offsets = [0, 7], sizes = [1, 24], strides = [1, 1]} : vector<8x31xf32> to vector<1x24xf32>
    %357 = vector.extract_strided_slice %355 {offsets = [1, 6], sizes = [1, 24], strides = [1, 1]} : vector<8x31xf32> to vector<1x24xf32>
    %358 = vector.extract_strided_slice %355 {offsets = [2, 5], sizes = [1, 24], strides = [1, 1]} : vector<8x31xf32> to vector<1x24xf32>
    %359 = vector.extract_strided_slice %355 {offsets = [3, 4], sizes = [1, 24], strides = [1, 1]} : vector<8x31xf32> to vector<1x24xf32>
    %360 = vector.extract_strided_slice %355 {offsets = [4, 3], sizes = [1, 24], strides = [1, 1]} : vector<8x31xf32> to vector<1x24xf32>
    %361 = vector.extract_strided_slice %355 {offsets = [5, 2], sizes = [1, 24], strides = [1, 1]} : vector<8x31xf32> to vector<1x24xf32>
    %362 = vector.extract_strided_slice %355 {offsets = [6, 1], sizes = [1, 24], strides = [1, 1]} : vector<8x31xf32> to vector<1x24xf32>
    %363 = vector.extract_strided_slice %355 {offsets = [7, 0], sizes = [1, 24], strides = [1, 1]} : vector<8x31xf32> to vector<1x24xf32>
    %364 = tpu.concatenate %356, %357, %358, %359, %360, %361, %362, %363 in 0 : vector<1x24xf32>, vector<1x24xf32>, vector<1x24xf32>, vector<1x24xf32>, vector<1x24xf32>, vector<1x24xf32>, vector<1x24xf32>, vector<1x24xf32> -> vector<8x24xf32>
    %365 = vector.extract_strided_slice %364 {offsets = [0, 0], sizes = [8, 16], strides = [1, 1]} : vector<8x24xf32> to vector<8x16xf32>
    %cst_99 = arith.constant 0.353553385 : f32
    %366 = vector.broadcast %cst_99 : f32 to vector<8x16xf32>
    %367 = arith.mulf %365, %366 : vector<8x16xf32>
    %368 = vector.extract_strided_slice %364 {offsets = [0, 16], sizes = [8, 8], strides = [1, 1]} : vector<8x24xf32> to vector<8x8xf32>
    %369 = arith.addf %368, %352 : vector<8x8xf32>
    %cst_100 = arith.constant 0.353553385 : f32
    %370 = vector.broadcast %cst_100 : f32 to vector<8x8xf32>
    %371 = arith.mulf %369, %370 : vector<8x8xf32>
    %cst_101 = arith.constant -1.000000e+30 : f32
    %372 = vector.broadcast %cst_101 : f32 to vector<8x8xf32>
    %373 = arith.select %29, %371, %372 : vector<8x8xi1>, vector<8x8xf32>
    %cst_102 = arith.constant dense<0xFF800000> : vector<8xf32>
    %374 = vector.multi_reduction <maximumf>, %367, %cst_102 [1] : vector<8x16xf32> to vector<8xf32>
    %375 = vector.shape_cast %374 : vector<8xf32> to vector<8x1xf32>
    %cst_103 = arith.constant dense<0xFF800000> : vector<8xf32>
    %376 = vector.multi_reduction <maximumf>, %373, %cst_103 [1] : vector<8x8xf32> to vector<8xf32>
    %377 = vector.shape_cast %376 : vector<8xf32> to vector<8x1xf32>
    %378 = arith.maximumf %375, %377 : vector<8x1xf32>
    %379 = vector.broadcast %378 : vector<8x1xf32> to vector<8x16xf32>
    %380 = arith.subf %367, %379 : vector<8x16xf32>
    %381 = math.exp %380 : vector<8x16xf32>
    %382 = vector.broadcast %378 : vector<8x1xf32> to vector<8x8xf32>
    %383 = arith.subf %373, %382 : vector<8x8xf32>
    %384 = math.exp %383 : vector<8x8xf32>
    %cst_104 = arith.constant dense<0.000000e+00> : vector<8xf32>
    %385 = vector.multi_reduction <add>, %381, %cst_104 [1] : vector<8x16xf32> to vector<8xf32>
    %386 = vector.shape_cast %385 : vector<8xf32> to vector<8x1xf32>
    %cst_105 = arith.constant dense<0.000000e+00> : vector<8xf32>
    %387 = vector.multi_reduction <add>, %384, %cst_105 [1] : vector<8x8xf32> to vector<8xf32>
    %388 = vector.shape_cast %387 : vector<8xf32> to vector<8x1xf32>
    %389 = arith.addf %386, %388 : vector<8x1xf32>
    %390 = tpu.reciprocal %389 {approx = true} : vector<8x1xf32> -> vector<8x1xf32>
    %391 = vector.extract_strided_slice %297 {offsets = [0, 8], sizes = [8, 8], strides = [1, 1]} : vector<8x32xf32> to vector<8x8xf32>
    %cst_106 = arith.constant dense<0.000000e+00> : vector<8x8xf32>
    %392 = tpu.matmul %384, %391, %cst_106 {dimension_numbers = #tpu.dot_dimension_numbers<[1], [0], [0], [1], [0, 0, 1, 1], [], []>} : vector<8x8xf32>, vector<8x8xf32>, vector<8x8xf32> -> vector<8x8xf32>
    %393 = vector.broadcast %390 : vector<8x1xf32> to vector<8x8xf32>
    %394 = arith.mulf %392, %393 : vector<8x8xf32>
    %395 = vector.extract_strided_slice %300 {offsets = [0, 16], sizes = [8, 8], strides = [1, 1]} : vector<8x32xf32> to vector<8x8xf32>
    %396 = vector.extract_strided_slice %296 {offsets = [0, 16], sizes = [8, 8], strides = [1, 1]} : vector<8x32xf32> to vector<8x8xf32>
    %cst_107 = arith.constant dense<0.000000e+00> : vector<8x8xf32>
    %397 = tpu.matmul %395, %396, %cst_107 {dimension_numbers = #tpu.dot_dimension_numbers<[1], [1], [0], [0], [0, 0, 1, 0], [], []>} : vector<8x8xf32>, vector<8x8xf32>, vector<8x8xf32> -> vector<8x8xf32>
    %398 = vector.extract_strided_slice %303 {offsets = [0, 16], sizes = [8, 8], strides = [1, 1]} : vector<8x32xf32> to vector<8x8xf32>
    %399 = vector.extract_strided_slice %304 {offsets = [0, 16], sizes = [31, 8], strides = [1, 1]} : vector<31x32xf32> to vector<31x8xf32>
    %cst_108 = arith.constant dense<0.000000e+00> : vector<8x31xf32>
    %400 = tpu.matmul %398, %399, %cst_108 {dimension_numbers = #tpu.dot_dimension_numbers<[1], [1], [0], [0], [0, 0, 1, 0], [], []>} : vector<8x8xf32>, vector<31x8xf32>, vector<8x31xf32> -> vector<8x31xf32>
    %401 = vector.extract_strided_slice %400 {offsets = [0, 7], sizes = [1, 24], strides = [1, 1]} : vector<8x31xf32> to vector<1x24xf32>
    %402 = vector.extract_strided_slice %400 {offsets = [1, 6], sizes = [1, 24], strides = [1, 1]} : vector<8x31xf32> to vector<1x24xf32>
    %403 = vector.extract_strided_slice %400 {offsets = [2, 5], sizes = [1, 24], strides = [1, 1]} : vector<8x31xf32> to vector<1x24xf32>
    %404 = vector.extract_strided_slice %400 {offsets = [3, 4], sizes = [1, 24], strides = [1, 1]} : vector<8x31xf32> to vector<1x24xf32>
    %405 = vector.extract_strided_slice %400 {offsets = [4, 3], sizes = [1, 24], strides = [1, 1]} : vector<8x31xf32> to vector<1x24xf32>
    %406 = vector.extract_strided_slice %400 {offsets = [5, 2], sizes = [1, 24], strides = [1, 1]} : vector<8x31xf32> to vector<1x24xf32>
    %407 = vector.extract_strided_slice %400 {offsets = [6, 1], sizes = [1, 24], strides = [1, 1]} : vector<8x31xf32> to vector<1x24xf32>
    %408 = vector.extract_strided_slice %400 {offsets = [7, 0], sizes = [1, 24], strides = [1, 1]} : vector<8x31xf32> to vector<1x24xf32>
    %409 = tpu.concatenate %401, %402, %403, %404, %405, %406, %407, %408 in 0 : vector<1x24xf32>, vector<1x24xf32>, vector<1x24xf32>, vector<1x24xf32>, vector<1x24xf32>, vector<1x24xf32>, vector<1x24xf32>, vector<1x24xf32> -> vector<8x24xf32>
    %410 = vector.extract_strided_slice %409 {offsets = [0, 0], sizes = [8, 16], strides = [1, 1]} : vector<8x24xf32> to vector<8x16xf32>
    %cst_109 = arith.constant 0.353553385 : f32
    %411 = vector.broadcast %cst_109 : f32 to vector<8x16xf32>
    %412 = arith.mulf %410, %411 : vector<8x16xf32>
    %413 = vector.extract_strided_slice %409 {offsets = [0, 16], sizes = [8, 8], strides = [1, 1]} : vector<8x24xf32> to vector<8x8xf32>
    %414 = arith.addf %413, %397 : vector<8x8xf32>
    %cst_110 = arith.constant 0.353553385 : f32
    %415 = vector.broadcast %cst_110 : f32 to vector<8x8xf32>
    %416 = arith.mulf %414, %415 : vector<8x8xf32>
    %cst_111 = arith.constant -1.000000e+30 : f32
    %417 = vector.broadcast %cst_111 : f32 to vector<8x8xf32>
    %418 = arith.select %29, %416, %417 : vector<8x8xi1>, vector<8x8xf32>
    %cst_112 = arith.constant dense<0xFF800000> : vector<8xf32>
    %419 = vector.multi_reduction <maximumf>, %412, %cst_112 [1] : vector<8x16xf32> to vector<8xf32>
    %420 = vector.shape_cast %419 : vector<8xf32> to vector<8x1xf32>
    %cst_113 = arith.constant dense<0xFF800000> : vector<8xf32>
    %421 = vector.multi_reduction <maximumf>, %418, %cst_113 [1] : vector<8x8xf32> to vector<8xf32>
    %422 = vector.shape_cast %421 : vector<8xf32> to vector<8x1xf32>
    %423 = arith.maximumf %420, %422 : vector<8x1xf32>
    %424 = vector.broadcast %423 : vector<8x1xf32> to vector<8x16xf32>
    %425 = arith.subf %412, %424 : vector<8x16xf32>
    %426 = math.exp %425 : vector<8x16xf32>
    %427 = vector.broadcast %423 : vector<8x1xf32> to vector<8x8xf32>
    %428 = arith.subf %418, %427 : vector<8x8xf32>
    %429 = math.exp %428 : vector<8x8xf32>
    %cst_114 = arith.constant dense<0.000000e+00> : vector<8xf32>
    %430 = vector.multi_reduction <add>, %426, %cst_114 [1] : vector<8x16xf32> to vector<8xf32>
    %431 = vector.shape_cast %430 : vector<8xf32> to vector<8x1xf32>
    %cst_115 = arith.constant dense<0.000000e+00> : vector<8xf32>
    %432 = vector.multi_reduction <add>, %429, %cst_115 [1] : vector<8x8xf32> to vector<8xf32>
    %433 = vector.shape_cast %432 : vector<8xf32> to vector<8x1xf32>
    %434 = arith.addf %431, %433 : vector<8x1xf32>
    %435 = tpu.reciprocal %434 {approx = true} : vector<8x1xf32> -> vector<8x1xf32>
    %436 = vector.extract_strided_slice %297 {offsets = [0, 16], sizes = [8, 8], strides = [1, 1]} : vector<8x32xf32> to vector<8x8xf32>
    %cst_116 = arith.constant dense<0.000000e+00> : vector<8x8xf32>
    %437 = tpu.matmul %429, %436, %cst_116 {dimension_numbers = #tpu.dot_dimension_numbers<[1], [0], [0], [1], [0, 0, 1, 1], [], []>} : vector<8x8xf32>, vector<8x8xf32>, vector<8x8xf32> -> vector<8x8xf32>
    %438 = vector.broadcast %435 : vector<8x1xf32> to vector<8x8xf32>
    %439 = arith.mulf %437, %438 : vector<8x8xf32>
    %440 = vector.extract_strided_slice %300 {offsets = [0, 24], sizes = [8, 8], strides = [1, 1]} : vector<8x32xf32> to vector<8x8xf32>
    %441 = vector.extract_strided_slice %296 {offsets = [0, 24], sizes = [8, 8], strides = [1, 1]} : vector<8x32xf32> to vector<8x8xf32>
    %cst_117 = arith.constant dense<0.000000e+00> : vector<8x8xf32>
    %442 = tpu.matmul %440, %441, %cst_117 {dimension_numbers = #tpu.dot_dimension_numbers<[1], [1], [0], [0], [0, 0, 1, 0], [], []>} : vector<8x8xf32>, vector<8x8xf32>, vector<8x8xf32> -> vector<8x8xf32>
    %443 = vector.extract_strided_slice %303 {offsets = [0, 24], sizes = [8, 8], strides = [1, 1]} : vector<8x32xf32> to vector<8x8xf32>
    %444 = vector.extract_strided_slice %304 {offsets = [0, 24], sizes = [31, 8], strides = [1, 1]} : vector<31x32xf32> to vector<31x8xf32>
    %cst_118 = arith.constant dense<0.000000e+00> : vector<8x31xf32>
    %445 = tpu.matmul %443, %444, %cst_118 {dimension_numbers = #tpu.dot_dimension_numbers<[1], [1], [0], [0], [0, 0, 1, 0], [], []>} : vector<8x8xf32>, vector<31x8xf32>, vector<8x31xf32> -> vector<8x31xf32>
    %446 = vector.extract_strided_slice %445 {offsets = [0, 7], sizes = [1, 24], strides = [1, 1]} : vector<8x31xf32> to vector<1x24xf32>
    %447 = vector.extract_strided_slice %445 {offsets = [1, 6], sizes = [1, 24], strides = [1, 1]} : vector<8x31xf32> to vector<1x24xf32>
    %448 = vector.extract_strided_slice %445 {offsets = [2, 5], sizes = [1, 24], strides = [1, 1]} : vector<8x31xf32> to vector<1x24xf32>
    %449 = vector.extract_strided_slice %445 {offsets = [3, 4], sizes = [1, 24], strides = [1, 1]} : vector<8x31xf32> to vector<1x24xf32>
    %450 = vector.extract_strided_slice %445 {offsets = [4, 3], sizes = [1, 24], strides = [1, 1]} : vector<8x31xf32> to vector<1x24xf32>
    %451 = vector.extract_strided_slice %445 {offsets = [5, 2], sizes = [1, 24], strides = [1, 1]} : vector<8x31xf32> to vector<1x24xf32>
    %452 = vector.extract_strided_slice %445 {offsets = [6, 1], sizes = [1, 24], strides = [1, 1]} : vector<8x31xf32> to vector<1x24xf32>
    %453 = vector.extract_strided_slice %445 {offsets = [7, 0], sizes = [1, 24], strides = [1, 1]} : vector<8x31xf32> to vector<1x24xf32>
    %454 = tpu.concatenate %446, %447, %448, %449, %450, %451, %452, %453 in 0 : vector<1x24xf32>, vector<1x24xf32>, vector<1x24xf32>, vector<1x24xf32>, vector<1x24xf32>, vector<1x24xf32>, vector<1x24xf32>, vector<1x24xf32> -> vector<8x24xf32>
    %455 = vector.extract_strided_slice %454 {offsets = [0, 0], sizes = [8, 16], strides = [1, 1]} : vector<8x24xf32> to vector<8x16xf32>
    %cst_119 = arith.constant 0.353553385 : f32
    %456 = vector.broadcast %cst_119 : f32 to vector<8x16xf32>
    %457 = arith.mulf %455, %456 : vector<8x16xf32>
    %458 = vector.extract_strided_slice %454 {offsets = [0, 16], sizes = [8, 8], strides = [1, 1]} : vector<8x24xf32> to vector<8x8xf32>
    %459 = arith.addf %458, %442 : vector<8x8xf32>
    %cst_120 = arith.constant 0.353553385 : f32
    %460 = vector.broadcast %cst_120 : f32 to vector<8x8xf32>
    %461 = arith.mulf %459, %460 : vector<8x8xf32>
    %cst_121 = arith.constant -1.000000e+30 : f32
    %462 = vector.broadcast %cst_121 : f32 to vector<8x8xf32>
    %463 = arith.select %29, %461, %462 : vector<8x8xi1>, vector<8x8xf32>
    %cst_122 = arith.constant dense<0xFF800000> : vector<8xf32>
    %464 = vector.multi_reduction <maximumf>, %457, %cst_122 [1] : vector<8x16xf32> to vector<8xf32>
    %465 = vector.shape_cast %464 : vector<8xf32> to vector<8x1xf32>
    %cst_123 = arith.constant dense<0xFF800000> : vector<8xf32>
    %466 = vector.multi_reduction <maximumf>, %463, %cst_123 [1] : vector<8x8xf32> to vector<8xf32>
    %467 = vector.shape_cast %466 : vector<8xf32> to vector<8x1xf32>
    %468 = arith.maximumf %465, %467 : vector<8x1xf32>
    %469 = vector.broadcast %468 : vector<8x1xf32> to vector<8x16xf32>
    %470 = arith.subf %457, %469 : vector<8x16xf32>
    %471 = math.exp %470 : vector<8x16xf32>
    %472 = vector.broadcast %468 : vector<8x1xf32> to vector<8x8xf32>
    %473 = arith.subf %463, %472 : vector<8x8xf32>
    %474 = math.exp %473 : vector<8x8xf32>
    %cst_124 = arith.constant dense<0.000000e+00> : vector<8xf32>
    %475 = vector.multi_reduction <add>, %471, %cst_124 [1] : vector<8x16xf32> to vector<8xf32>
    %476 = vector.shape_cast %475 : vector<8xf32> to vector<8x1xf32>
    %cst_125 = arith.constant dense<0.000000e+00> : vector<8xf32>
    %477 = vector.multi_reduction <add>, %474, %cst_125 [1] : vector<8x8xf32> to vector<8xf32>
    %478 = vector.shape_cast %477 : vector<8xf32> to vector<8x1xf32>
    %479 = arith.addf %476, %478 : vector<8x1xf32>
    %480 = tpu.reciprocal %479 {approx = true} : vector<8x1xf32> -> vector<8x1xf32>
    %481 = vector.extract_strided_slice %297 {offsets = [0, 24], sizes = [8, 8], strides = [1, 1]} : vector<8x32xf32> to vector<8x8xf32>
    %cst_126 = arith.constant dense<0.000000e+00> : vector<8x8xf32>
    %482 = tpu.matmul %474, %481, %cst_126 {dimension_numbers = #tpu.dot_dimension_numbers<[1], [0], [0], [1], [0, 0, 1, 1], [], []>} : vector<8x8xf32>, vector<8x8xf32>, vector<8x8xf32> -> vector<8x8xf32>
    %483 = vector.broadcast %480 : vector<8x1xf32> to vector<8x8xf32>
    %484 = arith.mulf %482, %483 : vector<8x8xf32>
    %485 = tpu.concatenate %349, %394, %439, %484 in 1 : vector<8x8xf32>, vector<8x8xf32>, vector<8x8xf32>, vector<8x8xf32> -> vector<8x32xf32>
    %c1_127 = arith.constant 1 : index
    %c0_128 = arith.constant 0 : index
    %c0_129 = arith.constant 0 : index
    %486 = vector.load %arg5[%c1_127, %c0_128, %c0_129] : memref<3x64x32xf32, #tpu.memory_space<vmem>>, vector<1x32x32xf32>
    %487 = vector.shape_cast %486 : vector<1x32x32xf32> to vector<32x32xf32>
    %cst_130 = arith.constant dense<0.000000e+00> : vector<8x32xf32>
    %488 = tpu.matmul %485, %487, %cst_130 {dimension_numbers = #tpu.dot_dimension_numbers<[1], [0], [0], [1], [0, 0, 1, 1], [], []>} : vector<8x32xf32>, vector<32x32xf32>, vector<8x32xf32> -> vector<8x32xf32>
    %489 = arith.addf %288, %488 : vector<8x32xf32>
    %490 = vector.extract_strided_slice %292 {offsets = [0, 0], sizes = [1, 32], strides = [1, 1]} : vector<8x32xf32> to vector<1x32xf32>
    %491 = vector.extract_strided_slice %292 {offsets = [1, 0], sizes = [1, 32], strides = [1, 1]} : vector<8x32xf32> to vector<1x32xf32>
    %cst_131 = arith.constant dense<0.000000e+00> : vector<8xf32>
    %492 = vector.multi_reduction <add>, %489, %cst_131 [1] : vector<8x32xf32> to vector<8xf32>
    %493 = vector.shape_cast %492 : vector<8xf32> to vector<8x1xf32>
    %cst_132 = arith.constant 3.200000e+01 : f32
    %494 = vector.broadcast %cst_132 : f32 to vector<8x1xf32>
    %495 = arith.divf %493, %494 : vector<8x1xf32>
    %496 = vector.broadcast %495 : vector<8x1xf32> to vector<8x32xf32>
    %497 = arith.subf %489, %496 : vector<8x32xf32>
    %498 = arith.mulf %497, %497 : vector<8x32xf32>
    %cst_133 = arith.constant dense<0.000000e+00> : vector<8xf32>
    %499 = vector.multi_reduction <add>, %498, %cst_133 [1] : vector<8x32xf32> to vector<8xf32>
    %500 = vector.shape_cast %499 : vector<8xf32> to vector<8x1xf32>
    %cst_134 = arith.constant 3.200000e+01 : f32
    %501 = vector.broadcast %cst_134 : f32 to vector<8x1xf32>
    %502 = arith.divf %500, %501 : vector<8x1xf32>
    %cst_135 = arith.constant 9.99999974E-6 : f32
    %503 = vector.broadcast %cst_135 : f32 to vector<8x1xf32>
    %504 = arith.addf %502, %503 : vector<8x1xf32>
    %505 = math.rsqrt %504 : vector<8x1xf32>
    %506 = vector.broadcast %505 : vector<8x1xf32> to vector<8x32xf32>
    %507 = arith.mulf %497, %506 : vector<8x32xf32>
    %508 = vector.broadcast %490 : vector<1x32xf32> to vector<8x32xf32>
    %509 = arith.mulf %507, %508 : vector<8x32xf32>
    %510 = vector.broadcast %491 : vector<1x32xf32> to vector<8x32xf32>
    %511 = arith.addf %509, %510 : vector<8x32xf32>
    %512 = vector.extract_strided_slice %290 {offsets = [0, 96], sizes = [32, 32], strides = [1, 1]} : vector<32x128xf32> to vector<32x32xf32>
    %cst_136 = arith.constant dense<0.000000e+00> : vector<8x32xf32>
    %513 = tpu.matmul %511, %512, %cst_136 {dimension_numbers = #tpu.dot_dimension_numbers<[1], [0], [0], [1], [0, 0, 1, 1], [], []>} : vector<8x32xf32>, vector<32x32xf32>, vector<8x32xf32> -> vector<8x32xf32>
    %514 = vector.extract_strided_slice %292 {offsets = [2, 0], sizes = [1, 32], strides = [1, 1]} : vector<8x32xf32> to vector<1x32xf32>
    %515 = vector.broadcast %514 : vector<1x32xf32> to vector<8x32xf32>
    %516 = arith.addf %513, %515 : vector<8x32xf32>
    %cst_137 = arith.constant 0.000000e+00 : f32
    %517 = vector.broadcast %cst_137 : f32 to vector<8x32xf32>
    %518 = arith.maximumf %516, %517 : vector<8x32xf32>
    %c1_138 = arith.constant 1 : index
    %c32_139 = arith.constant 32 : index
    %c0_140 = arith.constant 0 : index
    %519 = vector.load %arg5[%c1_138, %c32_139, %c0_140] : memref<3x64x32xf32, #tpu.memory_space<vmem>>, vector<1x32x32xf32>
    %520 = vector.shape_cast %519 : vector<1x32x32xf32> to vector<32x32xf32>
    %cst_141 = arith.constant dense<0.000000e+00> : vector<8x32xf32>
    %521 = tpu.matmul %518, %520, %cst_141 {dimension_numbers = #tpu.dot_dimension_numbers<[1], [0], [0], [1], [0, 0, 1, 1], [], []>} : vector<8x32xf32>, vector<32x32xf32>, vector<8x32xf32> -> vector<8x32xf32>
    %522 = vector.extract_strided_slice %292 {offsets = [3, 0], sizes = [1, 32], strides = [1, 1]} : vector<8x32xf32> to vector<1x32xf32>
    %523 = vector.broadcast %522 : vector<1x32xf32> to vector<8x32xf32>
    %524 = arith.addf %521, %523 : vector<8x32xf32>
    %525 = arith.addf %511, %524 : vector<8x32xf32>
    %526 = vector.extract_strided_slice %292 {offsets = [4, 0], sizes = [1, 32], strides = [1, 1]} : vector<8x32xf32> to vector<1x32xf32>
    %527 = vector.extract_strided_slice %292 {offsets = [5, 0], sizes = [1, 32], strides = [1, 1]} : vector<8x32xf32> to vector<1x32xf32>
    %cst_142 = arith.constant dense<0.000000e+00> : vector<8xf32>
    %528 = vector.multi_reduction <add>, %525, %cst_142 [1] : vector<8x32xf32> to vector<8xf32>
    %529 = vector.shape_cast %528 : vector<8xf32> to vector<8x1xf32>
    %cst_143 = arith.constant 3.200000e+01 : f32
    %530 = vector.broadcast %cst_143 : f32 to vector<8x1xf32>
    %531 = arith.divf %529, %530 : vector<8x1xf32>
    %532 = vector.broadcast %531 : vector<8x1xf32> to vector<8x32xf32>
    %533 = arith.subf %525, %532 : vector<8x32xf32>
    %534 = arith.mulf %533, %533 : vector<8x32xf32>
    %cst_144 = arith.constant dense<0.000000e+00> : vector<8xf32>
    %535 = vector.multi_reduction <add>, %534, %cst_144 [1] : vector<8x32xf32> to vector<8xf32>
    %536 = vector.shape_cast %535 : vector<8xf32> to vector<8x1xf32>
    %cst_145 = arith.constant 3.200000e+01 : f32
    %537 = vector.broadcast %cst_145 : f32 to vector<8x1xf32>
    %538 = arith.divf %536, %537 : vector<8x1xf32>
    %cst_146 = arith.constant 9.99999974E-6 : f32
    %539 = vector.broadcast %cst_146 : f32 to vector<8x1xf32>
    %540 = arith.addf %538, %539 : vector<8x1xf32>
    %541 = math.rsqrt %540 : vector<8x1xf32>
    %542 = vector.broadcast %541 : vector<8x1xf32> to vector<8x32xf32>
    %543 = arith.mulf %533, %542 : vector<8x32xf32>
    %544 = vector.broadcast %526 : vector<1x32xf32> to vector<8x32xf32>
    %545 = arith.mulf %543, %544 : vector<8x32xf32>
    %546 = vector.broadcast %527 : vector<1x32xf32> to vector<8x32xf32>
    %547 = arith.addf %545, %546 : vector<8x32xf32>
    %c2 = arith.constant 2 : index
    %c0_147 = arith.constant 0 : index
    %c0_148 = arith.constant 0 : index
    %548 = vector.load %arg3[%c2, %c0_147, %c0_148] : memref<3x32x128xf32, #tpu.memory_space<vmem>>, vector<1x32x128xf32>
    %549 = vector.shape_cast %548 : vector<1x32x128xf32> to vector<32x128xf32>
    %c2_149 = arith.constant 2 : index
    %c0_150 = arith.constant 0 : index
    %c0_151 = arith.constant 0 : index
    %550 = vector.load %arg6[%c2_149, %c0_150, %c0_151] : memref<3x8x32xf32, #tpu.memory_space<vmem>>, vector<1x8x32xf32>
    %551 = vector.shape_cast %550 : vector<1x8x32xf32> to vector<8x32xf32>
    %552 = vector.extract_strided_slice %549 {offsets = [0, 0], sizes = [32, 96], strides = [1, 1]} : vector<32x128xf32> to vector<32x96xf32>
    %cst_152 = arith.constant dense<0.000000e+00> : vector<8x96xf32>
    %553 = tpu.matmul %547, %552, %cst_152 {dimension_numbers = #tpu.dot_dimension_numbers<[1], [0], [0], [1], [0, 0, 1, 1], [], []>} : vector<8x32xf32>, vector<32x96xf32>, vector<8x96xf32> -> vector<8x96xf32>
    %554 = vector.extract_strided_slice %553 {offsets = [0, 0], sizes = [8, 32], strides = [1, 1]} : vector<8x96xf32> to vector<8x32xf32>
    %555 = vector.extract_strided_slice %553 {offsets = [0, 32], sizes = [8, 32], strides = [1, 1]} : vector<8x96xf32> to vector<8x32xf32>
    %556 = vector.extract_strided_slice %553 {offsets = [0, 64], sizes = [8, 32], strides = [1, 1]} : vector<8x96xf32> to vector<8x32xf32>
    %557 = vector.extract_strided_slice %551 {offsets = [6, 0], sizes = [1, 32], strides = [1, 1]} : vector<8x32xf32> to vector<1x32xf32>
    %558 = vector.broadcast %557 : vector<1x32xf32> to vector<8x32xf32>
    %559 = arith.addf %554, %558 : vector<8x32xf32>
    %560 = vector.extract_strided_slice %551 {offsets = [7, 0], sizes = [1, 32], strides = [1, 1]} : vector<8x32xf32> to vector<1x32xf32>
    %561 = vector.broadcast %560 : vector<1x32xf32> to vector<8x32xf32>
    %562 = arith.addf %554, %561 : vector<8x32xf32>
    %563 = vector.extract_strided_slice %26 {offsets = [0, 64], sizes = [31, 32], strides = [1, 1]} : vector<31x96xf32> to vector<31x32xf32>
    %564 = vector.extract_strided_slice %559 {offsets = [0, 0], sizes = [8, 8], strides = [1, 1]} : vector<8x32xf32> to vector<8x8xf32>
    %565 = vector.extract_strided_slice %555 {offsets = [0, 0], sizes = [8, 8], strides = [1, 1]} : vector<8x32xf32> to vector<8x8xf32>
    %cst_153 = arith.constant dense<0.000000e+00> : vector<8x8xf32>
    %566 = tpu.matmul %564, %565, %cst_153 {dimension_numbers = #tpu.dot_dimension_numbers<[1], [1], [0], [0], [0, 0, 1, 0], [], []>} : vector<8x8xf32>, vector<8x8xf32>, vector<8x8xf32> -> vector<8x8xf32>
    %567 = vector.extract_strided_slice %562 {offsets = [0, 0], sizes = [8, 8], strides = [1, 1]} : vector<8x32xf32> to vector<8x8xf32>
    %568 = vector.extract_strided_slice %563 {offsets = [0, 0], sizes = [31, 8], strides = [1, 1]} : vector<31x32xf32> to vector<31x8xf32>
    %cst_154 = arith.constant dense<0.000000e+00> : vector<8x31xf32>
    %569 = tpu.matmul %567, %568, %cst_154 {dimension_numbers = #tpu.dot_dimension_numbers<[1], [1], [0], [0], [0, 0, 1, 0], [], []>} : vector<8x8xf32>, vector<31x8xf32>, vector<8x31xf32> -> vector<8x31xf32>
    %570 = vector.extract_strided_slice %569 {offsets = [0, 7], sizes = [1, 24], strides = [1, 1]} : vector<8x31xf32> to vector<1x24xf32>
    %571 = vector.extract_strided_slice %569 {offsets = [1, 6], sizes = [1, 24], strides = [1, 1]} : vector<8x31xf32> to vector<1x24xf32>
    %572 = vector.extract_strided_slice %569 {offsets = [2, 5], sizes = [1, 24], strides = [1, 1]} : vector<8x31xf32> to vector<1x24xf32>
    %573 = vector.extract_strided_slice %569 {offsets = [3, 4], sizes = [1, 24], strides = [1, 1]} : vector<8x31xf32> to vector<1x24xf32>
    %574 = vector.extract_strided_slice %569 {offsets = [4, 3], sizes = [1, 24], strides = [1, 1]} : vector<8x31xf32> to vector<1x24xf32>
    %575 = vector.extract_strided_slice %569 {offsets = [5, 2], sizes = [1, 24], strides = [1, 1]} : vector<8x31xf32> to vector<1x24xf32>
    %576 = vector.extract_strided_slice %569 {offsets = [6, 1], sizes = [1, 24], strides = [1, 1]} : vector<8x31xf32> to vector<1x24xf32>
    %577 = vector.extract_strided_slice %569 {offsets = [7, 0], sizes = [1, 24], strides = [1, 1]} : vector<8x31xf32> to vector<1x24xf32>
    %578 = tpu.concatenate %570, %571, %572, %573, %574, %575, %576, %577 in 0 : vector<1x24xf32>, vector<1x24xf32>, vector<1x24xf32>, vector<1x24xf32>, vector<1x24xf32>, vector<1x24xf32>, vector<1x24xf32>, vector<1x24xf32> -> vector<8x24xf32>
    %579 = vector.extract_strided_slice %578 {offsets = [0, 0], sizes = [8, 16], strides = [1, 1]} : vector<8x24xf32> to vector<8x16xf32>
    %cst_155 = arith.constant 0.353553385 : f32
    %580 = vector.broadcast %cst_155 : f32 to vector<8x16xf32>
    %581 = arith.mulf %579, %580 : vector<8x16xf32>
    %582 = vector.extract_strided_slice %578 {offsets = [0, 16], sizes = [8, 8], strides = [1, 1]} : vector<8x24xf32> to vector<8x8xf32>
    %583 = arith.addf %582, %566 : vector<8x8xf32>
    %cst_156 = arith.constant 0.353553385 : f32
    %584 = vector.broadcast %cst_156 : f32 to vector<8x8xf32>
    %585 = arith.mulf %583, %584 : vector<8x8xf32>
    %cst_157 = arith.constant -1.000000e+30 : f32
    %586 = vector.broadcast %cst_157 : f32 to vector<8x8xf32>
    %587 = arith.select %29, %585, %586 : vector<8x8xi1>, vector<8x8xf32>
    %cst_158 = arith.constant dense<0xFF800000> : vector<8xf32>
    %588 = vector.multi_reduction <maximumf>, %581, %cst_158 [1] : vector<8x16xf32> to vector<8xf32>
    %589 = vector.shape_cast %588 : vector<8xf32> to vector<8x1xf32>
    %cst_159 = arith.constant dense<0xFF800000> : vector<8xf32>
    %590 = vector.multi_reduction <maximumf>, %587, %cst_159 [1] : vector<8x8xf32> to vector<8xf32>
    %591 = vector.shape_cast %590 : vector<8xf32> to vector<8x1xf32>
    %592 = arith.maximumf %589, %591 : vector<8x1xf32>
    %593 = vector.broadcast %592 : vector<8x1xf32> to vector<8x16xf32>
    %594 = arith.subf %581, %593 : vector<8x16xf32>
    %595 = math.exp %594 : vector<8x16xf32>
    %596 = vector.broadcast %592 : vector<8x1xf32> to vector<8x8xf32>
    %597 = arith.subf %587, %596 : vector<8x8xf32>
    %598 = math.exp %597 : vector<8x8xf32>
    %cst_160 = arith.constant dense<0.000000e+00> : vector<8xf32>
    %599 = vector.multi_reduction <add>, %595, %cst_160 [1] : vector<8x16xf32> to vector<8xf32>
    %600 = vector.shape_cast %599 : vector<8xf32> to vector<8x1xf32>
    %cst_161 = arith.constant dense<0.000000e+00> : vector<8xf32>
    %601 = vector.multi_reduction <add>, %598, %cst_161 [1] : vector<8x8xf32> to vector<8xf32>
    %602 = vector.shape_cast %601 : vector<8xf32> to vector<8x1xf32>
    %603 = arith.addf %600, %602 : vector<8x1xf32>
    %604 = tpu.reciprocal %603 {approx = true} : vector<8x1xf32> -> vector<8x1xf32>
    %605 = vector.extract_strided_slice %556 {offsets = [0, 0], sizes = [8, 8], strides = [1, 1]} : vector<8x32xf32> to vector<8x8xf32>
    %cst_162 = arith.constant dense<0.000000e+00> : vector<8x8xf32>
    %606 = tpu.matmul %598, %605, %cst_162 {dimension_numbers = #tpu.dot_dimension_numbers<[1], [0], [0], [1], [0, 0, 1, 1], [], []>} : vector<8x8xf32>, vector<8x8xf32>, vector<8x8xf32> -> vector<8x8xf32>
    %607 = vector.broadcast %604 : vector<8x1xf32> to vector<8x8xf32>
    %608 = arith.mulf %606, %607 : vector<8x8xf32>
    %609 = vector.extract_strided_slice %559 {offsets = [0, 8], sizes = [8, 8], strides = [1, 1]} : vector<8x32xf32> to vector<8x8xf32>
    %610 = vector.extract_strided_slice %555 {offsets = [0, 8], sizes = [8, 8], strides = [1, 1]} : vector<8x32xf32> to vector<8x8xf32>
    %cst_163 = arith.constant dense<0.000000e+00> : vector<8x8xf32>
    %611 = tpu.matmul %609, %610, %cst_163 {dimension_numbers = #tpu.dot_dimension_numbers<[1], [1], [0], [0], [0, 0, 1, 0], [], []>} : vector<8x8xf32>, vector<8x8xf32>, vector<8x8xf32> -> vector<8x8xf32>
    %612 = vector.extract_strided_slice %562 {offsets = [0, 8], sizes = [8, 8], strides = [1, 1]} : vector<8x32xf32> to vector<8x8xf32>
    %613 = vector.extract_strided_slice %563 {offsets = [0, 8], sizes = [31, 8], strides = [1, 1]} : vector<31x32xf32> to vector<31x8xf32>
    %cst_164 = arith.constant dense<0.000000e+00> : vector<8x31xf32>
    %614 = tpu.matmul %612, %613, %cst_164 {dimension_numbers = #tpu.dot_dimension_numbers<[1], [1], [0], [0], [0, 0, 1, 0], [], []>} : vector<8x8xf32>, vector<31x8xf32>, vector<8x31xf32> -> vector<8x31xf32>
    %615 = vector.extract_strided_slice %614 {offsets = [0, 7], sizes = [1, 24], strides = [1, 1]} : vector<8x31xf32> to vector<1x24xf32>
    %616 = vector.extract_strided_slice %614 {offsets = [1, 6], sizes = [1, 24], strides = [1, 1]} : vector<8x31xf32> to vector<1x24xf32>
    %617 = vector.extract_strided_slice %614 {offsets = [2, 5], sizes = [1, 24], strides = [1, 1]} : vector<8x31xf32> to vector<1x24xf32>
    %618 = vector.extract_strided_slice %614 {offsets = [3, 4], sizes = [1, 24], strides = [1, 1]} : vector<8x31xf32> to vector<1x24xf32>
    %619 = vector.extract_strided_slice %614 {offsets = [4, 3], sizes = [1, 24], strides = [1, 1]} : vector<8x31xf32> to vector<1x24xf32>
    %620 = vector.extract_strided_slice %614 {offsets = [5, 2], sizes = [1, 24], strides = [1, 1]} : vector<8x31xf32> to vector<1x24xf32>
    %621 = vector.extract_strided_slice %614 {offsets = [6, 1], sizes = [1, 24], strides = [1, 1]} : vector<8x31xf32> to vector<1x24xf32>
    %622 = vector.extract_strided_slice %614 {offsets = [7, 0], sizes = [1, 24], strides = [1, 1]} : vector<8x31xf32> to vector<1x24xf32>
    %623 = tpu.concatenate %615, %616, %617, %618, %619, %620, %621, %622 in 0 : vector<1x24xf32>, vector<1x24xf32>, vector<1x24xf32>, vector<1x24xf32>, vector<1x24xf32>, vector<1x24xf32>, vector<1x24xf32>, vector<1x24xf32> -> vector<8x24xf32>
    %624 = vector.extract_strided_slice %623 {offsets = [0, 0], sizes = [8, 16], strides = [1, 1]} : vector<8x24xf32> to vector<8x16xf32>
    %cst_165 = arith.constant 0.353553385 : f32
    %625 = vector.broadcast %cst_165 : f32 to vector<8x16xf32>
    %626 = arith.mulf %624, %625 : vector<8x16xf32>
    %627 = vector.extract_strided_slice %623 {offsets = [0, 16], sizes = [8, 8], strides = [1, 1]} : vector<8x24xf32> to vector<8x8xf32>
    %628 = arith.addf %627, %611 : vector<8x8xf32>
    %cst_166 = arith.constant 0.353553385 : f32
    %629 = vector.broadcast %cst_166 : f32 to vector<8x8xf32>
    %630 = arith.mulf %628, %629 : vector<8x8xf32>
    %cst_167 = arith.constant -1.000000e+30 : f32
    %631 = vector.broadcast %cst_167 : f32 to vector<8x8xf32>
    %632 = arith.select %29, %630, %631 : vector<8x8xi1>, vector<8x8xf32>
    %cst_168 = arith.constant dense<0xFF800000> : vector<8xf32>
    %633 = vector.multi_reduction <maximumf>, %626, %cst_168 [1] : vector<8x16xf32> to vector<8xf32>
    %634 = vector.shape_cast %633 : vector<8xf32> to vector<8x1xf32>
    %cst_169 = arith.constant dense<0xFF800000> : vector<8xf32>
    %635 = vector.multi_reduction <maximumf>, %632, %cst_169 [1] : vector<8x8xf32> to vector<8xf32>
    %636 = vector.shape_cast %635 : vector<8xf32> to vector<8x1xf32>
    %637 = arith.maximumf %634, %636 : vector<8x1xf32>
    %638 = vector.broadcast %637 : vector<8x1xf32> to vector<8x16xf32>
    %639 = arith.subf %626, %638 : vector<8x16xf32>
    %640 = math.exp %639 : vector<8x16xf32>
    %641 = vector.broadcast %637 : vector<8x1xf32> to vector<8x8xf32>
    %642 = arith.subf %632, %641 : vector<8x8xf32>
    %643 = math.exp %642 : vector<8x8xf32>
    %cst_170 = arith.constant dense<0.000000e+00> : vector<8xf32>
    %644 = vector.multi_reduction <add>, %640, %cst_170 [1] : vector<8x16xf32> to vector<8xf32>
    %645 = vector.shape_cast %644 : vector<8xf32> to vector<8x1xf32>
    %cst_171 = arith.constant dense<0.000000e+00> : vector<8xf32>
    %646 = vector.multi_reduction <add>, %643, %cst_171 [1] : vector<8x8xf32> to vector<8xf32>
    %647 = vector.shape_cast %646 : vector<8xf32> to vector<8x1xf32>
    %648 = arith.addf %645, %647 : vector<8x1xf32>
    %649 = tpu.reciprocal %648 {approx = true} : vector<8x1xf32> -> vector<8x1xf32>
    %650 = vector.extract_strided_slice %556 {offsets = [0, 8], sizes = [8, 8], strides = [1, 1]} : vector<8x32xf32> to vector<8x8xf32>
    %cst_172 = arith.constant dense<0.000000e+00> : vector<8x8xf32>
    %651 = tpu.matmul %643, %650, %cst_172 {dimension_numbers = #tpu.dot_dimension_numbers<[1], [0], [0], [1], [0, 0, 1, 1], [], []>} : vector<8x8xf32>, vector<8x8xf32>, vector<8x8xf32> -> vector<8x8xf32>
    %652 = vector.broadcast %649 : vector<8x1xf32> to vector<8x8xf32>
    %653 = arith.mulf %651, %652 : vector<8x8xf32>
    %654 = vector.extract_strided_slice %559 {offsets = [0, 16], sizes = [8, 8], strides = [1, 1]} : vector<8x32xf32> to vector<8x8xf32>
    %655 = vector.extract_strided_slice %555 {offsets = [0, 16], sizes = [8, 8], strides = [1, 1]} : vector<8x32xf32> to vector<8x8xf32>
    %cst_173 = arith.constant dense<0.000000e+00> : vector<8x8xf32>
    %656 = tpu.matmul %654, %655, %cst_173 {dimension_numbers = #tpu.dot_dimension_numbers<[1], [1], [0], [0], [0, 0, 1, 0], [], []>} : vector<8x8xf32>, vector<8x8xf32>, vector<8x8xf32> -> vector<8x8xf32>
    %657 = vector.extract_strided_slice %562 {offsets = [0, 16], sizes = [8, 8], strides = [1, 1]} : vector<8x32xf32> to vector<8x8xf32>
    %658 = vector.extract_strided_slice %563 {offsets = [0, 16], sizes = [31, 8], strides = [1, 1]} : vector<31x32xf32> to vector<31x8xf32>
    %cst_174 = arith.constant dense<0.000000e+00> : vector<8x31xf32>
    %659 = tpu.matmul %657, %658, %cst_174 {dimension_numbers = #tpu.dot_dimension_numbers<[1], [1], [0], [0], [0, 0, 1, 0], [], []>} : vector<8x8xf32>, vector<31x8xf32>, vector<8x31xf32> -> vector<8x31xf32>
    %660 = vector.extract_strided_slice %659 {offsets = [0, 7], sizes = [1, 24], strides = [1, 1]} : vector<8x31xf32> to vector<1x24xf32>
    %661 = vector.extract_strided_slice %659 {offsets = [1, 6], sizes = [1, 24], strides = [1, 1]} : vector<8x31xf32> to vector<1x24xf32>
    %662 = vector.extract_strided_slice %659 {offsets = [2, 5], sizes = [1, 24], strides = [1, 1]} : vector<8x31xf32> to vector<1x24xf32>
    %663 = vector.extract_strided_slice %659 {offsets = [3, 4], sizes = [1, 24], strides = [1, 1]} : vector<8x31xf32> to vector<1x24xf32>
    %664 = vector.extract_strided_slice %659 {offsets = [4, 3], sizes = [1, 24], strides = [1, 1]} : vector<8x31xf32> to vector<1x24xf32>
    %665 = vector.extract_strided_slice %659 {offsets = [5, 2], sizes = [1, 24], strides = [1, 1]} : vector<8x31xf32> to vector<1x24xf32>
    %666 = vector.extract_strided_slice %659 {offsets = [6, 1], sizes = [1, 24], strides = [1, 1]} : vector<8x31xf32> to vector<1x24xf32>
    %667 = vector.extract_strided_slice %659 {offsets = [7, 0], sizes = [1, 24], strides = [1, 1]} : vector<8x31xf32> to vector<1x24xf32>
    %668 = tpu.concatenate %660, %661, %662, %663, %664, %665, %666, %667 in 0 : vector<1x24xf32>, vector<1x24xf32>, vector<1x24xf32>, vector<1x24xf32>, vector<1x24xf32>, vector<1x24xf32>, vector<1x24xf32>, vector<1x24xf32> -> vector<8x24xf32>
    %669 = vector.extract_strided_slice %668 {offsets = [0, 0], sizes = [8, 16], strides = [1, 1]} : vector<8x24xf32> to vector<8x16xf32>
    %cst_175 = arith.constant 0.353553385 : f32
    %670 = vector.broadcast %cst_175 : f32 to vector<8x16xf32>
    %671 = arith.mulf %669, %670 : vector<8x16xf32>
    %672 = vector.extract_strided_slice %668 {offsets = [0, 16], sizes = [8, 8], strides = [1, 1]} : vector<8x24xf32> to vector<8x8xf32>
    %673 = arith.addf %672, %656 : vector<8x8xf32>
    %cst_176 = arith.constant 0.353553385 : f32
    %674 = vector.broadcast %cst_176 : f32 to vector<8x8xf32>
    %675 = arith.mulf %673, %674 : vector<8x8xf32>
    %cst_177 = arith.constant -1.000000e+30 : f32
    %676 = vector.broadcast %cst_177 : f32 to vector<8x8xf32>
    %677 = arith.select %29, %675, %676 : vector<8x8xi1>, vector<8x8xf32>
    %cst_178 = arith.constant dense<0xFF800000> : vector<8xf32>
    %678 = vector.multi_reduction <maximumf>, %671, %cst_178 [1] : vector<8x16xf32> to vector<8xf32>
    %679 = vector.shape_cast %678 : vector<8xf32> to vector<8x1xf32>
    %cst_179 = arith.constant dense<0xFF800000> : vector<8xf32>
    %680 = vector.multi_reduction <maximumf>, %677, %cst_179 [1] : vector<8x8xf32> to vector<8xf32>
    %681 = vector.shape_cast %680 : vector<8xf32> to vector<8x1xf32>
    %682 = arith.maximumf %679, %681 : vector<8x1xf32>
    %683 = vector.broadcast %682 : vector<8x1xf32> to vector<8x16xf32>
    %684 = arith.subf %671, %683 : vector<8x16xf32>
    %685 = math.exp %684 : vector<8x16xf32>
    %686 = vector.broadcast %682 : vector<8x1xf32> to vector<8x8xf32>
    %687 = arith.subf %677, %686 : vector<8x8xf32>
    %688 = math.exp %687 : vector<8x8xf32>
    %cst_180 = arith.constant dense<0.000000e+00> : vector<8xf32>
    %689 = vector.multi_reduction <add>, %685, %cst_180 [1] : vector<8x16xf32> to vector<8xf32>
    %690 = vector.shape_cast %689 : vector<8xf32> to vector<8x1xf32>
    %cst_181 = arith.constant dense<0.000000e+00> : vector<8xf32>
    %691 = vector.multi_reduction <add>, %688, %cst_181 [1] : vector<8x8xf32> to vector<8xf32>
    %692 = vector.shape_cast %691 : vector<8xf32> to vector<8x1xf32>
    %693 = arith.addf %690, %692 : vector<8x1xf32>
    %694 = tpu.reciprocal %693 {approx = true} : vector<8x1xf32> -> vector<8x1xf32>
    %695 = vector.extract_strided_slice %556 {offsets = [0, 16], sizes = [8, 8], strides = [1, 1]} : vector<8x32xf32> to vector<8x8xf32>
    %cst_182 = arith.constant dense<0.000000e+00> : vector<8x8xf32>
    %696 = tpu.matmul %688, %695, %cst_182 {dimension_numbers = #tpu.dot_dimension_numbers<[1], [0], [0], [1], [0, 0, 1, 1], [], []>} : vector<8x8xf32>, vector<8x8xf32>, vector<8x8xf32> -> vector<8x8xf32>
    %697 = vector.broadcast %694 : vector<8x1xf32> to vector<8x8xf32>
    %698 = arith.mulf %696, %697 : vector<8x8xf32>
    %699 = vector.extract_strided_slice %559 {offsets = [0, 24], sizes = [8, 8], strides = [1, 1]} : vector<8x32xf32> to vector<8x8xf32>
    %700 = vector.extract_strided_slice %555 {offsets = [0, 24], sizes = [8, 8], strides = [1, 1]} : vector<8x32xf32> to vector<8x8xf32>
    %cst_183 = arith.constant dense<0.000000e+00> : vector<8x8xf32>
    %701 = tpu.matmul %699, %700, %cst_183 {dimension_numbers = #tpu.dot_dimension_numbers<[1], [1], [0], [0], [0, 0, 1, 0], [], []>} : vector<8x8xf32>, vector<8x8xf32>, vector<8x8xf32> -> vector<8x8xf32>
    %702 = vector.extract_strided_slice %562 {offsets = [0, 24], sizes = [8, 8], strides = [1, 1]} : vector<8x32xf32> to vector<8x8xf32>
    %703 = vector.extract_strided_slice %563 {offsets = [0, 24], sizes = [31, 8], strides = [1, 1]} : vector<31x32xf32> to vector<31x8xf32>
    %cst_184 = arith.constant dense<0.000000e+00> : vector<8x31xf32>
    %704 = tpu.matmul %702, %703, %cst_184 {dimension_numbers = #tpu.dot_dimension_numbers<[1], [1], [0], [0], [0, 0, 1, 0], [], []>} : vector<8x8xf32>, vector<31x8xf32>, vector<8x31xf32> -> vector<8x31xf32>
    %705 = vector.extract_strided_slice %704 {offsets = [0, 7], sizes = [1, 24], strides = [1, 1]} : vector<8x31xf32> to vector<1x24xf32>
    %706 = vector.extract_strided_slice %704 {offsets = [1, 6], sizes = [1, 24], strides = [1, 1]} : vector<8x31xf32> to vector<1x24xf32>
    %707 = vector.extract_strided_slice %704 {offsets = [2, 5], sizes = [1, 24], strides = [1, 1]} : vector<8x31xf32> to vector<1x24xf32>
    %708 = vector.extract_strided_slice %704 {offsets = [3, 4], sizes = [1, 24], strides = [1, 1]} : vector<8x31xf32> to vector<1x24xf32>
    %709 = vector.extract_strided_slice %704 {offsets = [4, 3], sizes = [1, 24], strides = [1, 1]} : vector<8x31xf32> to vector<1x24xf32>
    %710 = vector.extract_strided_slice %704 {offsets = [5, 2], sizes = [1, 24], strides = [1, 1]} : vector<8x31xf32> to vector<1x24xf32>
    %711 = vector.extract_strided_slice %704 {offsets = [6, 1], sizes = [1, 24], strides = [1, 1]} : vector<8x31xf32> to vector<1x24xf32>
    %712 = vector.extract_strided_slice %704 {offsets = [7, 0], sizes = [1, 24], strides = [1, 1]} : vector<8x31xf32> to vector<1x24xf32>
    %713 = tpu.concatenate %705, %706, %707, %708, %709, %710, %711, %712 in 0 : vector<1x24xf32>, vector<1x24xf32>, vector<1x24xf32>, vector<1x24xf32>, vector<1x24xf32>, vector<1x24xf32>, vector<1x24xf32>, vector<1x24xf32> -> vector<8x24xf32>
    %714 = vector.extract_strided_slice %713 {offsets = [0, 0], sizes = [8, 16], strides = [1, 1]} : vector<8x24xf32> to vector<8x16xf32>
    %cst_185 = arith.constant 0.353553385 : f32
    %715 = vector.broadcast %cst_185 : f32 to vector<8x16xf32>
    %716 = arith.mulf %714, %715 : vector<8x16xf32>
    %717 = vector.extract_strided_slice %713 {offsets = [0, 16], sizes = [8, 8], strides = [1, 1]} : vector<8x24xf32> to vector<8x8xf32>
    %718 = arith.addf %717, %701 : vector<8x8xf32>
    %cst_186 = arith.constant 0.353553385 : f32
    %719 = vector.broadcast %cst_186 : f32 to vector<8x8xf32>
    %720 = arith.mulf %718, %719 : vector<8x8xf32>
    %cst_187 = arith.constant -1.000000e+30 : f32
    %721 = vector.broadcast %cst_187 : f32 to vector<8x8xf32>
    %722 = arith.select %29, %720, %721 : vector<8x8xi1>, vector<8x8xf32>
    %cst_188 = arith.constant dense<0xFF800000> : vector<8xf32>
    %723 = vector.multi_reduction <maximumf>, %716, %cst_188 [1] : vector<8x16xf32> to vector<8xf32>
    %724 = vector.shape_cast %723 : vector<8xf32> to vector<8x1xf32>
    %cst_189 = arith.constant dense<0xFF800000> : vector<8xf32>
    %725 = vector.multi_reduction <maximumf>, %722, %cst_189 [1] : vector<8x8xf32> to vector<8xf32>
    %726 = vector.shape_cast %725 : vector<8xf32> to vector<8x1xf32>
    %727 = arith.maximumf %724, %726 : vector<8x1xf32>
    %728 = vector.broadcast %727 : vector<8x1xf32> to vector<8x16xf32>
    %729 = arith.subf %716, %728 : vector<8x16xf32>
    %730 = math.exp %729 : vector<8x16xf32>
    %731 = vector.broadcast %727 : vector<8x1xf32> to vector<8x8xf32>
    %732 = arith.subf %722, %731 : vector<8x8xf32>
    %733 = math.exp %732 : vector<8x8xf32>
    %cst_190 = arith.constant dense<0.000000e+00> : vector<8xf32>
    %734 = vector.multi_reduction <add>, %730, %cst_190 [1] : vector<8x16xf32> to vector<8xf32>
    %735 = vector.shape_cast %734 : vector<8xf32> to vector<8x1xf32>
    %cst_191 = arith.constant dense<0.000000e+00> : vector<8xf32>
    %736 = vector.multi_reduction <add>, %733, %cst_191 [1] : vector<8x8xf32> to vector<8xf32>
    %737 = vector.shape_cast %736 : vector<8xf32> to vector<8x1xf32>
    %738 = arith.addf %735, %737 : vector<8x1xf32>
    %739 = tpu.reciprocal %738 {approx = true} : vector<8x1xf32> -> vector<8x1xf32>
    %740 = vector.extract_strided_slice %556 {offsets = [0, 24], sizes = [8, 8], strides = [1, 1]} : vector<8x32xf32> to vector<8x8xf32>
    %cst_192 = arith.constant dense<0.000000e+00> : vector<8x8xf32>
    %741 = tpu.matmul %733, %740, %cst_192 {dimension_numbers = #tpu.dot_dimension_numbers<[1], [0], [0], [1], [0, 0, 1, 1], [], []>} : vector<8x8xf32>, vector<8x8xf32>, vector<8x8xf32> -> vector<8x8xf32>
    %742 = vector.broadcast %739 : vector<8x1xf32> to vector<8x8xf32>
    %743 = arith.mulf %741, %742 : vector<8x8xf32>
    %744 = tpu.concatenate %608, %653, %698, %743 in 1 : vector<8x8xf32>, vector<8x8xf32>, vector<8x8xf32>, vector<8x8xf32> -> vector<8x32xf32>
    %c2_193 = arith.constant 2 : index
    %c0_194 = arith.constant 0 : index
    %c0_195 = arith.constant 0 : index
    %745 = vector.load %arg5[%c2_193, %c0_194, %c0_195] : memref<3x64x32xf32, #tpu.memory_space<vmem>>, vector<1x32x32xf32>
    %746 = vector.shape_cast %745 : vector<1x32x32xf32> to vector<32x32xf32>
    %cst_196 = arith.constant dense<0.000000e+00> : vector<8x32xf32>
    %747 = tpu.matmul %744, %746, %cst_196 {dimension_numbers = #tpu.dot_dimension_numbers<[1], [0], [0], [1], [0, 0, 1, 1], [], []>} : vector<8x32xf32>, vector<32x32xf32>, vector<8x32xf32> -> vector<8x32xf32>
    %748 = arith.addf %547, %747 : vector<8x32xf32>
    %749 = vector.extract_strided_slice %551 {offsets = [0, 0], sizes = [1, 32], strides = [1, 1]} : vector<8x32xf32> to vector<1x32xf32>
    %750 = vector.extract_strided_slice %551 {offsets = [1, 0], sizes = [1, 32], strides = [1, 1]} : vector<8x32xf32> to vector<1x32xf32>
    %cst_197 = arith.constant dense<0.000000e+00> : vector<8xf32>
    %751 = vector.multi_reduction <add>, %748, %cst_197 [1] : vector<8x32xf32> to vector<8xf32>
    %752 = vector.shape_cast %751 : vector<8xf32> to vector<8x1xf32>
    %cst_198 = arith.constant 3.200000e+01 : f32
    %753 = vector.broadcast %cst_198 : f32 to vector<8x1xf32>
    %754 = arith.divf %752, %753 : vector<8x1xf32>
    %755 = vector.broadcast %754 : vector<8x1xf32> to vector<8x32xf32>
    %756 = arith.subf %748, %755 : vector<8x32xf32>
    %757 = arith.mulf %756, %756 : vector<8x32xf32>
    %cst_199 = arith.constant dense<0.000000e+00> : vector<8xf32>
    %758 = vector.multi_reduction <add>, %757, %cst_199 [1] : vector<8x32xf32> to vector<8xf32>
    %759 = vector.shape_cast %758 : vector<8xf32> to vector<8x1xf32>
    %cst_200 = arith.constant 3.200000e+01 : f32
    %760 = vector.broadcast %cst_200 : f32 to vector<8x1xf32>
    %761 = arith.divf %759, %760 : vector<8x1xf32>
    %cst_201 = arith.constant 9.99999974E-6 : f32
    %762 = vector.broadcast %cst_201 : f32 to vector<8x1xf32>
    %763 = arith.addf %761, %762 : vector<8x1xf32>
    %764 = math.rsqrt %763 : vector<8x1xf32>
    %765 = vector.broadcast %764 : vector<8x1xf32> to vector<8x32xf32>
    %766 = arith.mulf %756, %765 : vector<8x32xf32>
    %767 = vector.broadcast %749 : vector<1x32xf32> to vector<8x32xf32>
    %768 = arith.mulf %766, %767 : vector<8x32xf32>
    %769 = vector.broadcast %750 : vector<1x32xf32> to vector<8x32xf32>
    %770 = arith.addf %768, %769 : vector<8x32xf32>
    %771 = vector.extract_strided_slice %549 {offsets = [0, 96], sizes = [32, 32], strides = [1, 1]} : vector<32x128xf32> to vector<32x32xf32>
    %cst_202 = arith.constant dense<0.000000e+00> : vector<8x32xf32>
    %772 = tpu.matmul %770, %771, %cst_202 {dimension_numbers = #tpu.dot_dimension_numbers<[1], [0], [0], [1], [0, 0, 1, 1], [], []>} : vector<8x32xf32>, vector<32x32xf32>, vector<8x32xf32> -> vector<8x32xf32>
    %773 = vector.extract_strided_slice %551 {offsets = [2, 0], sizes = [1, 32], strides = [1, 1]} : vector<8x32xf32> to vector<1x32xf32>
    %774 = vector.broadcast %773 : vector<1x32xf32> to vector<8x32xf32>
    %775 = arith.addf %772, %774 : vector<8x32xf32>
    %cst_203 = arith.constant 0.000000e+00 : f32
    %776 = vector.broadcast %cst_203 : f32 to vector<8x32xf32>
    %777 = arith.maximumf %775, %776 : vector<8x32xf32>
    %c2_204 = arith.constant 2 : index
    %c32_205 = arith.constant 32 : index
    %c0_206 = arith.constant 0 : index
    %778 = vector.load %arg5[%c2_204, %c32_205, %c0_206] : memref<3x64x32xf32, #tpu.memory_space<vmem>>, vector<1x32x32xf32>
    %779 = vector.shape_cast %778 : vector<1x32x32xf32> to vector<32x32xf32>
    %cst_207 = arith.constant dense<0.000000e+00> : vector<8x32xf32>
    %780 = tpu.matmul %777, %779, %cst_207 {dimension_numbers = #tpu.dot_dimension_numbers<[1], [0], [0], [1], [0, 0, 1, 1], [], []>} : vector<8x32xf32>, vector<32x32xf32>, vector<8x32xf32> -> vector<8x32xf32>
    %781 = vector.extract_strided_slice %551 {offsets = [3, 0], sizes = [1, 32], strides = [1, 1]} : vector<8x32xf32> to vector<1x32xf32>
    %782 = vector.broadcast %781 : vector<1x32xf32> to vector<8x32xf32>
    %783 = arith.addf %780, %782 : vector<8x32xf32>
    %784 = arith.addf %770, %783 : vector<8x32xf32>
    %785 = vector.extract_strided_slice %551 {offsets = [4, 0], sizes = [1, 32], strides = [1, 1]} : vector<8x32xf32> to vector<1x32xf32>
    %786 = vector.extract_strided_slice %551 {offsets = [5, 0], sizes = [1, 32], strides = [1, 1]} : vector<8x32xf32> to vector<1x32xf32>
    %cst_208 = arith.constant dense<0.000000e+00> : vector<8xf32>
    %787 = vector.multi_reduction <add>, %784, %cst_208 [1] : vector<8x32xf32> to vector<8xf32>
    %788 = vector.shape_cast %787 : vector<8xf32> to vector<8x1xf32>
    %cst_209 = arith.constant 3.200000e+01 : f32
    %789 = vector.broadcast %cst_209 : f32 to vector<8x1xf32>
    %790 = arith.divf %788, %789 : vector<8x1xf32>
    %791 = vector.broadcast %790 : vector<8x1xf32> to vector<8x32xf32>
    %792 = arith.subf %784, %791 : vector<8x32xf32>
    %793 = arith.mulf %792, %792 : vector<8x32xf32>
    %cst_210 = arith.constant dense<0.000000e+00> : vector<8xf32>
    %794 = vector.multi_reduction <add>, %793, %cst_210 [1] : vector<8x32xf32> to vector<8xf32>
    %795 = vector.shape_cast %794 : vector<8xf32> to vector<8x1xf32>
    %cst_211 = arith.constant 3.200000e+01 : f32
    %796 = vector.broadcast %cst_211 : f32 to vector<8x1xf32>
    %797 = arith.divf %795, %796 : vector<8x1xf32>
    %cst_212 = arith.constant 9.99999974E-6 : f32
    %798 = vector.broadcast %cst_212 : f32 to vector<8x1xf32>
    %799 = arith.addf %797, %798 : vector<8x1xf32>
    %800 = math.rsqrt %799 : vector<8x1xf32>
    %801 = vector.broadcast %800 : vector<8x1xf32> to vector<8x32xf32>
    %802 = arith.mulf %792, %801 : vector<8x32xf32>
    %803 = vector.broadcast %785 : vector<1x32xf32> to vector<8x32xf32>
    %804 = arith.mulf %802, %803 : vector<8x32xf32>
    %805 = vector.broadcast %786 : vector<1x32xf32> to vector<8x32xf32>
    %806 = arith.addf %804, %805 : vector<8x32xf32>
    %807 = vector.extract_strided_slice %806 {offsets = [7, 0], sizes = [1, 32], strides = [1, 1]} : vector<8x32xf32> to vector<1x32xf32>
    %c0_213 = arith.constant 0 : index
    %c0_214 = arith.constant 0 : index
    %808 = vector.load %arg8[%c0_213, %c0_214] : memref<33x64xf32, #tpu.memory_space<vmem>>, vector<32x64xf32>
    %cst_215 = arith.constant dense<0.000000e+00> : vector<1x64xf32>
    %809 = tpu.matmul %807, %808, %cst_215 {dimension_numbers = #tpu.dot_dimension_numbers<[1], [0], [0], [1], [0, 0, 1, 1], [], []>} : vector<1x32xf32>, vector<32x64xf32>, vector<1x64xf32> -> vector<1x64xf32>
    %c32_216 = arith.constant 32 : index
    %c0_217 = arith.constant 0 : index
    %810 = vector.load %arg8[%c32_216, %c0_217] : memref<33x64xf32, #tpu.memory_space<vmem>>, vector<1x64xf32>
    %811 = arith.addf %809, %810 : vector<1x64xf32>
    %812 = math.tanh %811 : vector<1x64xf32>
    %c0_218 = arith.constant 0 : index
    %c0_219 = arith.constant 0 : index
    %813 = vector.load %arg9[%c0_218, %c0_219] : memref<65x2xf32, #tpu.memory_space<vmem>>, vector<64x2xf32>
    %cst_220 = arith.constant dense<0.000000e+00> : vector<1x2xf32>
    %814 = tpu.matmul %812, %813, %cst_220 {dimension_numbers = #tpu.dot_dimension_numbers<[1], [0], [0], [1], [0, 0, 1, 1], [], []>} : vector<1x64xf32>, vector<64x2xf32>, vector<1x2xf32> -> vector<1x2xf32>
    %c64 = arith.constant 64 : index
    %c0_221 = arith.constant 0 : index
    %815 = vector.load %arg9[%c64, %c0_221] : memref<65x2xf32, #tpu.memory_space<vmem>>, vector<1x2xf32>
    %816 = arith.addf %814, %815 : vector<1x2xf32>
    %cst_222 = arith.constant dense<0xFF800000> : vector<1xf32>
    %817 = vector.multi_reduction <maximumf>, %816, %cst_222 [1] : vector<1x2xf32> to vector<1xf32>
    %818 = vector.shape_cast %817 : vector<1xf32> to vector<1x1xf32>
    %819 = vector.broadcast %818 : vector<1x1xf32> to vector<1x2xf32>
    %820 = arith.subf %816, %819 : vector<1x2xf32>
    %821 = math.exp %820 : vector<1x2xf32>
    %cst_223 = arith.constant dense<0.000000e+00> : vector<1xf32>
    %822 = vector.multi_reduction <add>, %821, %cst_223 [1] : vector<1x2xf32> to vector<1xf32>
    %823 = vector.shape_cast %822 : vector<1xf32> to vector<1x1xf32>
    %824 = math.log %823 : vector<1x1xf32>
    %825 = vector.broadcast %824 : vector<1x1xf32> to vector<1x2xf32>
    %826 = arith.subf %820, %825 : vector<1x2xf32>
    %827 = vector.shape_cast %826 : vector<1x2xf32> to vector<1x1x2xf32>
    %c0_224 = arith.constant 0 : index
    %c0_225 = arith.constant 0 : index
    %c0_226 = arith.constant 0 : index
    %828 = vector.load %arg10[%c0_224, %c0_225, %c0_226] : memref<1x1x2xf32, #tpu.memory_space<vmem>>, vector<1x1x2xf32>
    tpu.vector_store %arg10[%c0_224, %c0_225, %c0_226], %827 {strides = array<i32>} : memref<1x1x2xf32, #tpu.memory_space<vmem>>, vector<1x1x2xf32>,
    return
  }
  func.func @transform_0(%arg0: i32) -> (i32, i32, i32) {
    %c0_i32 = arith.constant 0 : i32
    %c0_i32_0 = arith.constant 0 : i32
    %c0_i32_1 = arith.constant 0 : i32
    return %arg0, %c0_i32, %c0_i32_0 : i32, i32, i32
  }
  func.func @transform_1(%arg0: i32) -> (i32, i32) {
    %c0_i32 = arith.constant 0 : i32
    %c0_i32_0 = arith.constant 0 : i32
    %c0_i32_1 = arith.constant 0 : i32
    return %c0_i32, %c0_i32_0 : i32, i32
  }
  func.func @transform_2(%arg0: i32) -> (i32, i32, i32) {
    %c0_i32 = arith.constant 0 : i32
    %c0_i32_0 = arith.constant 0 : i32
    %c0_i32_1 = arith.constant 0 : i32
    %c0_i32_2 = arith.constant 0 : i32
    return %c0_i32, %c0_i32_0, %c0_i32_1 : i32, i32, i32
  }
  func.func @transform_3(%arg0: i32) -> (i32, i32) {
    %c0_i32 = arith.constant 0 : i32
    %c0_i32_0 = arith.constant 0 : i32
    %c0_i32_1 = arith.constant 0 : i32
    return %c0_i32, %c0_i32_0 : i32, i32
  }
  func.func @transform_4(%arg0: i32) -> (i32, i32, i32) {
    %c0_i32 = arith.constant 0 : i32
    %c0_i32_0 = arith.constant 0 : i32
    %c0_i32_1 = arith.constant 0 : i32
    %c0_i32_2 = arith.constant 0 : i32
    return %c0_i32, %c0_i32_0, %c0_i32_1 : i32, i32, i32
  }
  func.func @transform_5(%arg0: i32) -> (i32, i32, i32) {
    %c0_i32 = arith.constant 0 : i32
    %c0_i32_0 = arith.constant 0 : i32
    %c0_i32_1 = arith.constant 0 : i32
    %c0_i32_2 = arith.constant 0 : i32
    return %c0_i32, %c0_i32_0, %c0_i32_1 : i32, i32, i32
  }
  func.func @transform_6(%arg0: i32) -> (i32, i32) {
    %c0_i32 = arith.constant 0 : i32
    %c0_i32_0 = arith.constant 0 : i32
    %c0_i32_1 = arith.constant 0 : i32
    return %c0_i32, %c0_i32_0 : i32, i32
  }
  func.func @transform_7(%arg0: i32) -> (i32, i32) {
    %c0_i32 = arith.constant 0 : i32
    %c0_i32_0 = arith.constant 0 : i32
    %c0_i32_1 = arith.constant 0 : i32
    return %c0_i32, %c0_i32_0 : i32, i32
  }
  func.func @transform_8(%arg0: i32) -> (i32, i32) {
    %c0_i32 = arith.constant 0 : i32
    %c0_i32_0 = arith.constant 0 : i32
    %c0_i32_1 = arith.constant 0 : i32
    return %c0_i32, %c0_i32_0 : i32, i32
  }
  func.func @transform_9(%arg0: i32) -> (i32, i32, i32) {
    %c0_i32 = arith.constant 0 : i32
    %c0_i32_0 = arith.constant 0 : i32
    %c0_i32_1 = arith.constant 0 : i32
    return %arg0, %c0_i32, %c0_i32_0 : i32, i32, i32
  }
}

</mosaic_0001>

<bundles_post_ra>
// kernel: transfo_classifier_forward.1
= control target key start
LH: loop header
LB: loop body
LE: loop exit
PB: predicated region body
PF: predicated region fallthrough
CT: control target
= control target key end

     0   :  { %s8418_s0 = inlined_call_operand.vmem [shape: f32[2,8,32], index: 0, kind: input, shape index: {}]   ;;  %s8419_s1 = inlined_call_operand.vmem [shape: f32[31,32], index: 1, kind: input, shape index: {}]   ;;  %s8420_s2 = inlined_call_operand.vmem [shape: f32[3,32,128], index: 2, kind: input, shape index: {}]   ;;  %s8421_s3 = inlined_call_operand.vmem [shape: f32[32,96], index: 3, kind: input, shape index: {}]   ;;  %s8422_s4 = inlined_call_operand.vmem [shape: f32[3,64,32], index: 4, kind: input, shape index: {}]   ;;  %s8423_s5 = inlined_call_operand.vmem [shape: f32[3,8,32], index: 5, kind: input, shape index: {}]   ;;  %s8424_s6 = inlined_call_operand.vmem [shape: f32[2,32], index: 6, kind: input, shape index: {}]   ;;  %s8425_s7 = inlined_call_operand.vmem [shape: f32[33,64], index: 7, kind: input, shape index: {}]   ;;  %s8426_s8 = inlined_call_operand.vmem [shape: f32[65,2], index: 8, kind: input, shape index: {}]   ;;  %s8427_s9 = inlined_call_operand.hbm [shape: f32[2,1,2], index: 9, kind: output, shape index: {}]  }
   0x1   :  { %8493 = sst [smem:[#allocation14_spill]] %s8418_s0 }
   0x2   :  { %8494 = sst [smem:[#allocation15_spill]] %s8419_s1 }
   0x3   :  { %8495 = sst [smem:[#allocation16_spill]] %s8421_s3 }
   0x4   :  { %8496 = sst [smem:[#allocation17_spill]] %s8424_s6 }
   0x5   :  { %8497 = sst [smem:[#allocation18_spill]] %s8425_s7 }
   0x6   :  { %8498 = sst [smem:[#allocation19_spill]] %s8426_s8 }
   0x7   :  { %8499 = sst [smem:[#allocation20_spill]] %s8427_s9 }
   0x8   :  { %14 = vsyncpa [#allocation3], 0 }
   0x9   :  { %16 = vsyncpa [#allocation3 + $0x1], 0  ;;  %s7066_s30 = smov 0   ;;  %s7068_s10 = smov 0  }
   0xa   :  { %s7070_s11 = smov 0   ;;  %s7072_s12 = smov 0  }
   0xb LB: > { %8500 = sst [smem:[#allocation5_spill]] %s6973_s30  ;;  %s7087_s13 = sadd.s32 4294967295, %s6985_s12   ;;  %s6985_s12 = sphi %s7072_s12, %s8559_s12   ;;  %s6981_s11 = sphi %s7070_s11, %s8562_s11   ;;  %s6977_s10 = sphi %s7068_s10, %s8561_s10   ;;  %s6973_s30 = sphi %s7066_s30, %s8560_s30  }
   0xc   : > { %8501 = sst [smem:[#allocation6_spill]] %s6977_s10  ;;  %s5661_s14 = sadd.s32 4294967294, %s6985_s12  }
   0xd   : > { %8502 = sst [smem:[#allocation7_spill]] %s6981_s11  ;;  %s7091_s15 = sadd.s32 1, %s6985_s12  }
   0xe   : > { %8503 = sst [smem:[#allocation8_spill]] %s6985_s12  ;;  %s223_s16 = sadd.s32 1, %s6981_s11 }
   0xf   : > { %8504 = sst [smem:[#allocation9_spill]] %s7087_s13  ;;  %s220_s17 = ssub.s32 %s6985_s12, %s7091_s15 }
  0x10   : > { %8505 = sst [smem:[#allocation10_spill]] %s7091_s15  ;;  %p233_p0 = scmp.ne.s32.totalorder %s6981_s11, %s6977_s10 }
  0x11   : > { %p221_p1 = scmp.eq.s32.totalorder %s220_s17, 0  ;;  %p234_p2 = scmp.eq.s32.totalorder %s7087_s13, 1 }
  0x12   : > { %p239_p3 = scmp.ne.s32.totalorder %s6977_s10, %s6973_s30  ;;  %p240_p4 = scmp.eq.s32.totalorder %s5661_s14, 1 }
  0x13   : > { %s7102_s18 = scalar_select %p221_p1, %s6981_s11, %s223_s16  }
  0x14   : > { %p7104_p5 = por %p234_p2, %p233_p0  ;;  %p7108_p6 = por %p240_p4, %p239_p3 }
  0x15   : > { %8506 = sst [smem:[#allocation11_spill]] %s7102_s18  ;;  %p5664_p7 = scmp.ge.s32.totalorder %s6985_s12, 1 }
  0x16   : > { %s8507_s19 = scalar_select %p7104_p5, 1, 0 }
  0x17   : > { %s8509_s20 = scalar_select %p7108_p6, 1, 0 }
  0x18   : > { %8508 = sst [smem:[#allocation12_spill]] %s8507_s19  ;;  %p289_p8 = scmp.lt.s32.totalorder %s6985_s12, 3 }
  0x19   : > { %8510 = sst [smem:[#allocation13_spill]] %s8509_s20 }
  0x1a   : > { %p290_p9 = pnand %p5664_p7, %p289_p8 }
  0x1b   : > { %p323_p10 = scmp.lt.s32.totalorder (!%p290_p9), %s7087_s13, 1  ;;  %vm330_vm0 = vcmask (!%p290_p9), 261120   ;;  %s8511_s0 = sld [smem:[#allocation14_spill]] (!%p290_p9)  ;;  %v6987_v16 = vmov (!%p290_p9), 0.0|0.0   ;;  %v7148_v17 = vld [vmem:[%s8420_s2] sm:$0xff] (!%p290_p9)  ;;  %v7153_v18 = vld [vmem:[%s8420_s2 + $0x8] sm:$0xff] (!%p290_p9)  ;;  %v460_v44 = vlaneseq (!%p290_p9) }
  0x1c   : > { %293 = sbr.rel (%p290_p9) target bundleno = 14130 (0x3732), region = 56  ;;  %s8512_s3 = sld [smem:[#allocation16_spill]] (!%p290_p9)  ;;  %6437 = vmatprep.subr.bf16.mxu1 (!%p290_p9), %v6987_v16  ;;  %v7158_v19 = vld [vmem:[%s8420_s2 + $0x10] sm:$0xff] (!%p290_p9)  ;;  %v6720_v21 = vpack.i.bf16 (!%p290_p9), %v7153_v18, %v7148_v17  ;;  %v6438_v22 = vpack.c.bf16 (!%p290_p9), %v7153_v18, %v7148_v17  ;;  %v7171_v23 = vld [vmem:[%s8420_s2 + $0x18] sm:$0xff] (!%p290_p9)  ;;  %vm6988_vm1 = vmmov (!%p290_p9), 0   ;;  %v6989_v24 = vmov (!%p290_p9), 0.0  }
  0x1d   : > { %s8513_s1 = sld [smem:[#allocation15_spill]] (!%p290_p9)  ;;  %6023 = vmatprep.mubr.msk.f32.mxu1 (!%p290_p9), %vm6988_vm1, %v6989_v24  ;;  %v6441_v25 = vpack.c.bf16 (!%p290_p9), %v7171_v23, %v7158_v19  ;;  %s8514_s6 = sld [smem:[#allocation17_spill]] (!%p290_p9)  ;;  %vm556_vm2 = vcmask (!%p290_p9), 64512   ;;  %v7214_v45 = vshrl.u32 (!%p290_p9), %v460_v44, 7  ;;  %v7222_v47 = vld [vmem:[%s8423_s5] sm:$0xff] (!%p290_p9)  ;;  %vm739_vm4 = vcmask (!%p290_p9), 1040384  }
  0x1e   : > { %6439 = vmatpush3.bf16.msra.mxu1 (!%p290_p9), %v6438_v22  ;;  %vm7197_vm3 = vmpackc.low (!%p290_p9), %vm556_vm2, %vm556_vm2  ;;  %s8428_s14 = smov (!%p290_p9), 120   ;;  %s8472_s23 = smov (!%p290_p9), 4   ;;  %vm741_vm5 = vcmask (!%p290_p9), 1041408   ;;  %vm743_vm6 = vcmask (!%p290_p9), 1042432   ;;  %vm745_vm7 = vcmask (!%p290_p9), 1043456   ;;  %vm747_vm8 = vcmask (!%p290_p9), 1044480  }
  0x1f   : > { %6440 = vmatprep.subr.bf16.mxu1 (!%p290_p9), %v6987_v16  ;;  %v7217_v46 = vsub.s32 (!%p290_p9), 7, %v7214_v45  ;;  %v7227_v49 = vsub.s32 (!%p290_p9), 6, %v7214_v45  ;;  %s8474_s24 = smov (!%p290_p9), 1   ;;  %s8476_s26 = smov (!%p290_p9), 2   ;;  %vm749_vm9 = vcmask (!%p290_p9), 1045504   ;;  %vm751_vm10 = vcmask (!%p290_p9), 1046528  }
  0x20   : > { %s8470_s27 = smov (!%p290_p9), 3   ;;  %s8458_s28 = smov (!%p290_p9), 5   ;;  %vm765_vm11 = vcmask (!%p290_p9), 187448   ;;  %vm783_vm13 = vcmask (!%p290_p9), 130048   ;;  %vm1816_vm14 = vcmask (!%p290_p9), 195584   ;;  %v2013_v17 = vld [vmem:[%s8422_s4 + $0x20] sm:$0xff] (!%p290_p9) }
  0x21   : > { %v551_v48 = vrot.slane (!%p290_p9), %v7222_v47, %v7217_v46  ;;  %v546_v53 = vrot.slane (!%p290_p9), %v7222_v47, %v7227_v49  ;;  %s8454_s29 = smov (!%p290_p9), 7   ;;  %s8456_s16 = smov (!%p290_p9), 23   ;;  %v2014_v18 = vld [vmem:[%s8422_s4 + $0x28] sm:$0xff] (!%p290_p9)  ;;  %vm5505_vm15 = vcmask (!%p290_p9), 523264  }
  0x22   : > { %v359_v2 = vld [vmem:[%s8512_s3] sm:$0xff] (!%p290_p9)  ;;  %v360_v3 = vld [vmem:[%s8512_s3 + $0x8] sm:$0xff] (!%p290_p9)  ;;  %v361_v10 = vld [vmem:[%s8512_s3 + $0x10] sm:$0xff] (!%p290_p9)  ;;  %6442 = vmatpush3.bf16.msra.mxu1 (!%p290_p9), %v6441_v25  ;;  %s8452_s17 = smov (!%p290_p9), 105   ;;  %s8535_s18 = smov (!%p290_p9), 72  }
  0x23   : > { %s324_s21 = scalar_select %p323_p10, %s7087_s13, 1  ;;  %v6429_v4 = vpack.c.bf16 %v360_v3, %v359_v2  ;;  %v362_v11 = vld [vmem:[%s8512_s3 + $0x18] sm:$0xff]  ;;  %v355_v13 = vld [vmem:[%s8513_s1] sm:$0xff]  ;;  %v356_v14 = vld [vmem:[%s8513_s1 + $0x8] sm:$0xff]  ;;  %6026 = vmatprep.subr.mxu1 %v6989_v24 }
  0x24   : > { %v6433_v12 = vpack.c.bf16 %v362_v11, %v361_v10  ;;  %6009 = vmatprep.mubr.msk.f32.mxu0 %vm330_vm0, %v355_v13  ;;  %v357_v15 = vld [vmem:[%s8513_s1 + $0x10] sm:$0xff]  ;;  %v358_v20 = vld [vmem:[%s8513_s1 + $0x18] sm:$0x7f]  ;;  %v5666_v30 = vld [vmem:[%s8514_s6] ss:$0 sm:$0xff]  ;;  %s8532_s1 = smov 112  }
  0x25   : > { %s5665_s22 = sshll.u32 %s324_s21, 3  ;;  %6430 = vmatprep.subr.bf16.mxu0 %v6429_v4  ;;  %v5667_v32 = vld [vmem:[%s8514_s6 + $0x1] ss:$0 sm:$0xff]  ;;  %s8440_s21 = smov 96  }
  0x26   : > { %s326_s25 = scalar_lea.vmem %s8511_s0, %s5665_s22  ;;  %6432 = vmatpush3.bf16.msra.mxu0 %v6429_v4  ;;  %s8430_s22 = smov 88  }
  0x27   : > { %v327_v0 = vld [vmem:[%s326_s25] sm:$0xff]  ;;  %6434 = vmatprep.subr.bf16.mxu0 %v6433_v12  ;;  %s8460_s25 = smov 6   ;;  %s8529_s0 = smov 4  }
  0x28   : > { %v331_v1 = vsel %vm330_vm0, %v327_v0, 0.0  ;;  %s8533_s3 = smov 2   ;;  %s8534_s6 = smov 1  }
  0x29   : > { %332 = vadd.xlane.f32.xlu0 %v331_v1  ;;  %s8536_s11 = smov 48   ;;  %s8537_s15 = smov 104  }
  0x2a   : > { %6436 = vmatpush3.bf16.msra.mxu0 %v6433_v12  ;;  %s8538_s20 = smov 121   ;;  %s8539_s30 = smov 40  }
  0x2b   : > { %6443 = vmatprep.subr.bf16.mxu0 %v6987_v16  ;;  %s8540_s9 = smov 8   ;;  %s8541_s8 = smov 16  }
  0x2c   : > { %s8542_s7 = smov 24   ;;  %s8543_s10 = smov 32  }
  0x2d   : > { %6010 = vmatmul.mubr.msk.f32.vlgmr.msra.gmra.mrb[0].mxu0 %vm330_vm0, %v356_v14  ;;  %s8549_s13 = sld [smem:[#allocation18_spill]] }
  0x2e   : > { %6012 = vmatprep.mubr.msk.f32.mxu0 %vm330_vm0, %v357_v15 }
  0x31   : > { %6013 = vmatmul.mubr.msk.f32.gmra.mrb[2].mxu0 %vm330_vm0, %v358_v20 }
  0x32   : > { %6039 = vmatprep.mubr.msk.f32.mxu0 %vm6988_vm1, %v6989_v24 }
  0xb6   : > { %v333_v5 = vpop.xlane.xlu0 %332 }
  0xb7   : > { %v335_v6 = vmul.f32 0.03125, %v333_v5 }
  0xb9   : > { %v336_v7 = vsub.f32 %v327_v0, %v335_v6 }
  0xbb   : > { %v337_v8 = vmul.f32 %v336_v7, %v336_v7 }
  0xbd   : > { %v338_v9 = vsel %vm330_vm0, %v337_v8, 0.0 }
  0xbe   : > { %339 = vadd.xlane.f32.xlu0 %v338_v9 }
 0x100   : > { %v6011_v35 = vpop.f32.mrb[0].mxu0 }
 0x101   : > { %v441_v36 = vpop.f32.mrb[1].mxu0 }
 0x102   : > { %v6444_v38 = vpack.c.bf16 %v6011_v35, %v441_v36  ;;  %v7207_v42 = vpack.i.bf16 %v6011_v35, %v441_v36 }
 0x104   : > { %6446 = vmatpush3.bf16.xpose.msk.msra.mxu0 %vm7197_vm3, %v6444_v38  ;;  %v6014_v39 = vpop.f32.mrb[2].mxu0  ;;  %6691 = vrot.lane.b32.xlu0 %v7207_v42, %s8428_s14 }
 0x105   : > { %v451_v40 = vpop.f32.mrb[3].mxu0  ;;  %6447 = vmatprep.subr.bf16.mxu0 %v6987_v16 }
 0x106   : > { %v6448_v41 = vpack.c.bf16 %v6014_v39, %v451_v40  ;;  %v7211_v43 = vpack.i.bf16 %v6014_v39, %v451_v40 }
 0x10c   : > { %6450 = vmatpush3.bf16.xpose.msk.msra.mxu0 %vm7197_vm3, %v6448_v41 }
 0x10d   : > { %6042 = vmatprep.subr.mxu0 %v6989_v24 }
 0x14b   : > { %v340_v26 = vpop.xlane.xlu0 %339 }
 0x14c   : > { %v341_v27 = vmul.f32 0.03125, %v340_v26 }
 0x14e   : > { %v342_v28 = vadd.f32 1e-05, %v341_v27 }
 0x150   : > { %6830 = vrsqrt.f32 %v342_v28 }
 0x15a   : > { %v6831_v29 = vpop.eup %6830 }
 0x15b   : > { %v344_v31 = vmul.f32 %v6831_v29, %v336_v7 }
 0x15d   : > { %v349_v33 = vmul.f32 %v5666_v30, %v344_v31 }
 0x15f   : > { %v7189_v34 = vadd.f32 %v5667_v32, %v349_v33 }
 0x161   : > { %6024 = vmatmul.mubr.msk.f32.vlgmr.msra.gmra.mrb[0].mxu1 %vm330_vm0, %v7189_v34 }
 0x162   : > { %6028 = vmatprep.mubr.msk.f32.mxu1 %vm6988_vm1, %v6989_v24 }
 0x176   : > { %v6692_v55 = vpop.permute.xlu0 %6691 }
 0x177   : > { %v6694_v57 = vunpack.i.h.bf16 %v6692_v55  ;;  %v6693_v58 = vunpack.i.l.bf16 %v6692_v55 }
 0x179   : > { %v6452_v60 = vpack.c.bf16 %v6694_v57, %v6693_v58 }
 0x234   : > { %v7229_v50 = vpop.f32.mrb[0].mxu1 }
 0x235   : > { %554 = vrot.lane.b32.xlu1 %v7229_v50, %s8440_s21  ;;  %v6025_v51 = vpop.f32.mrb[1].mxu1  ;;  %v7234_v52 = vadd.f32 %v551_v48, %v7229_v50  ;;  %v7245_v54 = vadd.f32 %v546_v53, %v7229_v50  ;;  %s8444_s21 = smov 48  }
 0x237   : > { %6040 = vmatmul.mubr.msk.f32.vlgmr.msra.gmra.mrb[4].mxu0 %vm556_vm2, %v7234_v52 }
 0x238   : > { %6044 = vmatprep.mubr.msk.f32.mxu0 %vm6988_vm1, %v6989_v24 }
 0x239   : > { %871 = vrot.lane.b32.xlu1 %v7229_v50, %s8430_s22  ;;  %s8434_s22 = smov 80  }
 0x23d   : > { %869 = vrot.lane.b32.xlu1 %v7245_v54, %s8428_s14 }
 0x241   : > { %6696 = vrot.lane.b32.xlu1 %v7211_v43, %s8428_s14 }
 0x245   : > { %947 = vrot.lane.b32.xlu1 %v7234_v52, %s8428_s14  ;;  %s8432_s14 = smov 56  }
 0x2a7   : > { %v555_v56 = vpop.permute.xlu1 %554 }
 0x2a8   : > { %6027 = vmatpush3.xpose.msk.msra.mxu1 %vm556_vm2, %v555_v56 }
 0x2a9   : > { %6047 = vmatprep.subr.mxu1 %v6989_v24 }
 0x2ab   : > { %v872_v59 = vpop.permute.xlu1 %871  ;;  %6029 = vmatmul.mubr.msk.f32.vlgmr.msra.gmra.mrb[2].mxu1 %vm556_vm2, %v7245_v54 }
 0x2ac   : > { %6048 = vmatpush3.xpose.msk.msra.mxu1 %vm556_vm2, %v872_v59  ;;  %6049 = vmatprep.mubr.msk.f32.mxu1 %vm6988_vm1, %v6989_v24 }
 0x2ad   : > { %6451 = vmatprep.subr.bf16.mxu1 %v6987_v16 }
 0x2af   : > { %v870_v61 = vpop.permute.xlu1 %869 }
 0x2b0   : > { %6050 = vmatmul.mubr.msk.f32.vlgmr.msra.gmra.mrb[4].mxu1 %vm556_vm2, %v870_v61 }
 0x2b1   : > { %6454 = vmatpush3.bf16.xpose.msk.msra.mxu1 %vm7197_vm3, %v6452_v60  ;;  %6060 = vmatprep.mubr.msk.f32.mxu1 %vm6988_vm1, %v6989_v24 }
 0x2b2   : > { %6455 = vmatprep.subr.bf16.mxu1 %v6987_v16 }
 0x2b3   : > { %v6697_v62 = vpop.permute.xlu1 %6696 }
 0x2b4   : > { %v6699_v63 = vunpack.i.h.bf16 %v6697_v62  ;;  %v6698_v0 = vunpack.i.l.bf16 %v6697_v62 }
 0x2b6   : > { %v6456_v1 = vpack.c.bf16 %v6699_v63, %v6698_v0 }
 0x2b7   : > { %v948_v2 = vpop.permute.xlu1 %947 }
 0x2b9   : > { %6458 = vmatpush3.bf16.xpose.msk.msra.mxu1 %vm7197_vm3, %v6456_v1 }
 0x2ba   : > { %6084 = vmatprep.subr.mxu1 %v6989_v24 }
 0x2c0   : > { %6061 = vmatmul.mubr.msk.f32.vlgmr.msra.gmra.mrb[6].mxu1 %vm556_vm2, %v948_v2 }
 0x2c1   : > { %6086 = vmatprep.mubr.msk.f32.mxu1 %vm6988_vm1, %v6989_v24 }
 0x30a   : > { %v713_v3 = vpop.f32.mrb[4].mxu0 }
 0x30b   : > { %727 = vrot.lane.b32.xlu0 %v713_v3, %s8472_s23  ;;  %v6041_v4 = vpop.f32.mrb[5].mxu0  ;;  %718 = vrot.lane.b32.xlu1 %v713_v3, %s8474_s24 }
 0x30c   : > { %v463_v4 = vand.u32 127, %v460_v44 }
 0x30e   : > { %vm7319_vm12 = vcmp.le.s32.totalorder %v463_v4, %v7214_v45 }
 0x30f   : > { %733 = vrot.lane.b32.xlu0 %v713_v3, %s8460_s25  ;;  %721 = vrot.lane.b32.xlu1 %v713_v3, %s8476_s26 }
 0x313   : > { %724 = vrot.lane.b32.xlu1 %v713_v3, %s8470_s27 }
 0x317   : > { %730 = vrot.lane.b32.xlu1 %v713_v3, %s8458_s28 }
 0x31b   : > { %736 = vrot.lane.b32.xlu1 %v713_v3, %s8454_s29 }
 0x37d   : > { %v719_v11 = vpop.permute.xlu1 %718  ;;  %v728_v15 = vpop.permute.xlu0 %727 }
 0x37e   : > { %v628_v5 = vpop.f32.mrb[2].mxu1  ;;  %v740_v14 = vsel %vm739_vm4, %v713_v3, %v719_v11 }
 0x37f   : > { %755 = vrot.lane.b32.xlu0 %v628_v5, %s8456_s16  ;;  %v6030_v6 = vpop.f32.mrb[3].mxu1 }
 0x381   : > { %v722_v12 = vpop.permute.xlu1 %721  ;;  %v734_v27 = vpop.permute.xlu0 %733 }
 0x382   : > { %v742_v20 = vsel %vm741_vm5, %v740_v14, %v722_v12 }
 0x383   : > { %v943_v7 = vpop.f32.mrb[4].mxu1 }
 0x384   : > { %v6051_v8 = vpop.f32.mrb[5].mxu1 }
 0x385   : > { %v725_v13 = vpop.permute.xlu1 %724 }
 0x386   : > { %v744_v25 = vsel %vm743_vm6, %v742_v20, %v725_v13 }
 0x387   : > { %v746_v26 = vsel %vm745_vm7, %v744_v25, %v728_v15 }
 0x389   : > { %v731_v22 = vpop.permute.xlu1 %730 }
 0x38a   : > { %v748_v28 = vsel %vm747_vm8, %v746_v26, %v731_v22 }
 0x38b   : > { %v750_v30 = vsel %vm749_vm9, %v748_v28, %v734_v27 }
 0x38d   : > { %v737_v29 = vpop.permute.xlu1 %736 }
 0x38e   : > { %v752_v31 = vsel %vm751_vm10, %v750_v30, %v737_v29 }
 0x38f   : > { %v7304_v63 = vmul.f32 0.35355338, %v752_v31 }
 0x391   : > { %v766_v1 = vsel %vm765_vm11, %v7304_v63, -inf }
 0x393   : > { %v1033_v9 = vpop.f32.mrb[6].mxu1 }
 0x394   : > { %1041 = vrot.lane.b32.xlu0 %v1033_v9, %s8476_s26  ;;  %1038 = vrot.lane.b32.xlu1 %v1033_v9, %s8474_s24  ;;  %v6062_v10 = vpop.f32.mrb[7].mxu1 }
 0x398   : > { %1047 = vrot.lane.b32.xlu0 %v1033_v9, %s8472_s23  ;;  %1044 = vrot.lane.b32.xlu1 %v1033_v9, %s8470_s27 }
 0x39c   : > { %1053 = vrot.lane.b32.xlu0 %v1033_v9, %s8460_s25  ;;  %1050 = vrot.lane.b32.xlu1 %v1033_v9, %s8458_s28 }
 0x3a0   : > { %1068 = vrot.lane.b32.xlu0 %v943_v7, %s8456_s16  ;;  %1056 = vrot.lane.b32.xlu1 %v1033_v9, %s8454_s29 }
 0x3f1   : > { %v756_v32 = vpop.permute.xlu0 %755 }
 0x3f2   : > { %v758_v33 = vadd.f32 %v756_v32, %v752_v31 }
 0x3f4   : > { %v759_v35 = vmul.f32 0.35355338, %v758_v33 }
 0x3f6   : > { %761 = vrot.lane.b32.xlu1 %v759_v35, %s8452_s17 }
 0x406   : > { %v1042_v36 = vpop.permute.xlu0 %1041  ;;  %v1039_v38 = vpop.permute.xlu1 %1038 }
 0x407   : > { %v1059_v39 = vsel %vm739_vm4, %v1033_v9, %v1039_v38 }
 0x408   : > { %v1060_v41 = vsel %vm741_vm5, %v1059_v39, %v1042_v36 }
 0x40a   : > { %v1048_v40 = vpop.permute.xlu0 %1047  ;;  %v1045_v48 = vpop.permute.xlu1 %1044 }
 0x40b   : > { %v1061_v51 = vsel %vm743_vm6, %v1060_v41, %v1045_v48 }
 0x40c   : > { %v1062_v55 = vsel %vm745_vm7, %v1061_v51, %v1048_v40 }
 0x40e   : > { %v1054_v53 = vpop.permute.xlu0 %1053  ;;  %v1051_v56 = vpop.permute.xlu1 %1050 }
 0x40f   : > { %v1063_v57 = vsel %vm747_vm8, %v1062_v55, %v1051_v56 }
 0x410   : > { %v1064_v59 = vsel %vm749_vm9, %v1063_v57, %v1054_v53 }
 0x412   : > { %v1069_v58 = vpop.permute.xlu0 %1068  ;;  %v1057_v60 = vpop.permute.xlu1 %1056 }
 0x413   : > { %v1065_v61 = vsel %vm751_vm10, %v1064_v59, %v1057_v60 }
 0x414   : > { %v1071_v62 = vadd.f32 %v1069_v58, %v1065_v61  ;;  %v7313_v2 = vmul.f32 0.35355338, %v1065_v61 }
 0x416   : > { %v1072_v0 = vmul.f32 0.35355338, %v1071_v62  ;;  %v1078_v3 = vsel %vm765_vm11, %v7313_v2, -inf }
 0x418   : > { %1074 = vrot.lane.b32.xlu0 %v1072_v0, %s8452_s17 }
 0x41a   : > { %767 = vmax.xlane.f32.xlu1 %v766_v1 }
 0x42b   : > { %1103 = vrot.lane.b32.xlu1 %v7229_v50, %s8432_s14  ;;  %s8438_s14 = smov 64  }
 0x42f   : > { %1182 = vrot.lane.b32.xlu1 %v7229_v50, %s8434_s22  ;;  %s8436_s22 = smov 112  }
 0x437   : > { %1079 = vmax.xlane.f32.xlu0 %v1078_v3 }
 0x468   : > { %v762_v6 = vpop.permute.xlu1 %761 }
 0x469   : > { %v764_v7 = vsel %vm7319_vm12, %v762_v6, -1e+30 }
 0x46a   : > { %v769_v8 = vsel %vm556_vm2, %v764_v7, -inf }
 0x46b   : > { %770 = vmax.xlane.f32.xlu0 %v769_v8 }
 0x481   : > { %792 = vrot.lane.b32.xlu0 %v7229_v50, %s8438_s14  ;;  %s8442_s14 = smov 104  }
 0x485   : > { %6701 = vrot.lane.b32.xlu0 %v7207_v42, %s8436_s22 }
 0x489   : > { %6706 = vrot.lane.b32.xlu0 %v7211_v43, %s8436_s22 }
 0x48a   : > { %v1075_v44 = vpop.permute.xlu0 %1074 }
 0x48b   : > { %v1077_v9 = vsel %vm7319_vm12, %v1075_v44, -1e+30 }
 0x48c   : > { %v1081_v10 = vsel %vm556_vm2, %v1077_v9, -inf }
 0x48d   : > { %1082 = vmax.xlane.f32.xlu1 %v1081_v10 }
 0x49e   : > { %1180 = vrot.lane.b32.xlu1 %v7245_v54, %s8436_s22 }
 0x4a2   : > { %1258 = vrot.lane.b32.xlu1 %v7234_v52, %s8436_s22  ;;  %s8450_s22 = smov 72  }
 0x4a7   : > { %v768_v12 = vpop.xlane.xlu1 %767 }
 0x4ab   : > { %v1104_v26 = vpop.permute.xlu1 %1103 }
 0x4af   : > { %v1183_v27 = vpop.permute.xlu1 %1182 }
 0x4c4   : > { %v1080_v11 = vpop.xlane.xlu0 %1079 }
 0x4f8   : > { %v771_v13 = vpop.xlane.xlu0 %770 }
 0x4f9   : > { %v7339_v14 = vmax.f32 %v768_v12, %v771_v13 }
 0x4fb   : > { %v776_v15 = vsub.f32 %v764_v7, %v7339_v14 }
 0x4fc   : > { %v793_v20 = vpop.permute.xlu0 %792 }
 0x4fd   : > { %v777_v22 = vmul.f32 1.442695, %v776_v15  ;;  %6043 = vmatpush3.msra.mxu0 %v793_v20 }
 0x4fe   : > { %6063 = vmatprep.subr.mxu0 %v6989_v24 }
 0x4ff   : > { %6832 = vpow2.f32 %v777_v22 }
 0x500   : > { %v6702_v32 = vpop.permute.xlu0 %6701 }
 0x501   : > { %v6704_v35 = vunpack.i.h.bf16 %v6702_v32  ;;  %v6703_v36 = vunpack.i.l.bf16 %v6702_v32 }
 0x503   : > { %v6460_v38 = vpack.c.bf16 %v6704_v35, %v6703_v36 }
 0x504   : > { %v6707_v40 = vpop.permute.xlu0 %6706 }
 0x505   : > { %v6709_v41 = vunpack.i.h.bf16 %v6707_v40  ;;  %v6708_v48 = vunpack.i.l.bf16 %v6707_v40 }
 0x507   : > { %v6464_v51 = vpack.c.bf16 %v6709_v41, %v6708_v48 }
 0x509   : > { %v7343_v25 = vpop.eup %6832 }
 0x50a   : > { %6045 = vmatmul.mubr.msk.f32.vlgmr.msra.gmra.mrb[6].mxu0 %vm556_vm2, %v7343_v25 }
 0x50b   : > { %6064 = vmatpush3.msra.mxu0 %v1104_v26  ;;  %6065 = vmatprep.mubr.msk.f32.mxu0 %vm6988_vm1, %v6989_v24 }
 0x50c   : > { %6068 = vmatprep.subr.mxu0 %v6989_v24 }
 0x51a   : > { %v1083_v28 = vpop.xlane.xlu1 %1082 }
 0x51b   : > { %v7350_v29 = vmax.f32 %v1080_v11, %v1083_v28 }
 0x51d   : > { %v1088_v30 = vsub.f32 %v1077_v9, %v7350_v29 }
 0x51e   : > { %v1181_v39 = vpop.permute.xlu1 %1180 }
 0x51f   : > { %v1089_v31 = vmul.f32 1.442695, %v1088_v30 }
 0x521   : > { %6834 = vpow2.f32 %v1089_v31 }
 0x522   : > { %v1259_v53 = vpop.permute.xlu1 %1258 }
 0x52b   : > { %v7353_v33 = vpop.eup %6834 }
 0x52c   : > { %6066 = vmatmul.mubr.msk.f32.vlgmr.msra.gmra.mrb[8].mxu0 %vm556_vm2, %v7353_v33 }
 0x52d   : > { %6069 = vmatpush3.xpose.msk.msra.mxu0 %vm556_vm2, %v1183_v27  ;;  %6070 = vmatprep.mubr.msk.f32.mxu0 %vm6988_vm1, %v6989_v24 }
 0x52e   : > { %6459 = vmatprep.subr.bf16.mxu0 %v6987_v16 }
 0x530   : > { %6071 = vmatmul.mubr.msk.f32.vlgmr.msra.gmra.mrb[10].mxu0 %vm556_vm2, %v1181_v39 }
 0x531   : > { %6462 = vmatpush3.bf16.xpose.msk.msra.mxu0 %vm7197_vm3, %v6460_v38  ;;  %6081 = vmatprep.mubr.msk.f32.mxu0 %vm6988_vm1, %v6989_v24 }
 0x532   : > { %6463 = vmatprep.subr.bf16.mxu0 %v6987_v16 }
 0x539   : > { %6466 = vmatpush3.bf16.xpose.msk.msra.mxu0 %vm7197_vm3, %v6464_v51 }
 0x53a   : > { %6105 = vmatprep.subr.mxu0 %v6989_v24 }
 0x540   : > { %6082 = vmatmul.mubr.msk.f32.vlgmr.msra.gmra.mrb[12].mxu0 %vm556_vm2, %v1259_v53 }
 0x541   : > { %6107 = vmatprep.mubr.msk.f32.mxu0 %vm6988_vm1, %v6989_v24 }
 0x5dd   : > { %v7373_v55 = vpop.f32.mrb[6].mxu0 }
 0x5de   : > { %v6046_v56 = vpop.f32.mrb[7].mxu0 }
 0x5ff   : > { %v7375_v57 = vpop.f32.mrb[8].mxu0 }
 0x600   : > { %v6067_v58 = vpop.f32.mrb[9].mxu0 }
 0x603   : > { %v1254_v59 = vpop.f32.mrb[10].mxu0 }
 0x604   : > { %v6072_v60 = vpop.f32.mrb[11].mxu0 }
 0x613   : > { %v1344_v61 = vpop.f32.mrb[12].mxu0 }
 0x614   : > { %1352 = vrot.lane.b32.xlu1 %v1344_v61, %s8476_s26  ;;  %1349 = vrot.lane.b32.xlu0 %v1344_v61, %s8474_s24  ;;  %v6083_v62 = vpop.f32.mrb[13].mxu0 }
 0x618   : > { %1358 = vrot.lane.b32.xlu1 %v1344_v61, %s8472_s23  ;;  %1355 = vrot.lane.b32.xlu0 %v1344_v61, %s8470_s27 }
 0x61c   : > { %1364 = vrot.lane.b32.xlu1 %v1344_v61, %s8460_s25  ;;  %1361 = vrot.lane.b32.xlu0 %v1344_v61, %s8458_s28 }
 0x620   : > { %1379 = vrot.lane.b32.xlu1 %v1254_v59, %s8456_s16  ;;  %1367 = vrot.lane.b32.xlu0 %v1344_v61, %s8454_s29 }
 0x686   : > { %v1353_v0 = vpop.permute.xlu1 %1352  ;;  %v1350_v1 = vpop.permute.xlu0 %1349 }
 0x687   : > { %v1370_v3 = vsel %vm739_vm4, %v1344_v61, %v1350_v1 }
 0x688   : > { %v1371_v6 = vsel %vm741_vm5, %v1370_v3, %v1353_v0 }
 0x68a   : > { %v1359_v4 = vpop.permute.xlu1 %1358  ;;  %v1356_v7 = vpop.permute.xlu0 %1355 }
 0x68b   : > { %v1372_v8 = vsel %vm743_vm6, %v1371_v6, %v1356_v7 }
 0x68c   : > { %v1373_v9 = vsel %vm745_vm7, %v1372_v8, %v1359_v4 }
 0x68e   : > { %v1365_v44 = vpop.permute.xlu1 %1364  ;;  %v1362_v10 = vpop.permute.xlu0 %1361 }
 0x68f   : > { %v1374_v11 = vsel %vm747_vm8, %v1373_v9, %v1362_v10 }
 0x690   : > { %v1375_v13 = vsel %vm749_vm9, %v1374_v11, %v1365_v44 }
 0x692   : > { %v1380_v12 = vpop.permute.xlu1 %1379  ;;  %v1368_v15 = vpop.permute.xlu0 %1367 }
 0x693   : > { %v1376_v20 = vsel %vm751_vm10, %v1375_v13, %v1368_v15 }
 0x694   : > { %v1382_v22 = vadd.f32 %v1380_v12, %v1376_v20  ;;  %v7392_v26 = vmul.f32 0.35355338, %v1376_v20 }
 0x696   : > { %v1383_v27 = vmul.f32 0.35355338, %v1382_v22  ;;  %v1389_v28 = vsel %vm765_vm11, %v7392_v26, -inf }
 0x697   : > { %1390 = vmax.xlane.f32.xlu1 %v1389_v28 }
 0x698   : > { %1385 = vrot.lane.b32.xlu0 %v1383_v27, %s8452_s17 }
 0x6a8   : > { %1493 = vrot.lane.b32.xlu1 %v7229_v50, %s8450_s22  ;;  %s8464_s22 = smov 24  }
 0x6ac   : > { %6711 = vrot.lane.b32.xlu1 %v7207_v42, %s8442_s14 }
 0x6b0   : > { %6716 = vrot.lane.b32.xlu1 %v7211_v43, %s8442_s14 }
 0x70a   : > { %v1386_v30 = vpop.permute.xlu0 %1385 }
 0x70b   : > { %v1388_v31 = vsel %vm7319_vm12, %v1386_v30, -1e+30 }
 0x70c   : > { %v1392_v32 = vsel %vm556_vm2, %v1388_v31, -inf }
 0x70d   : > { %1393 = vmax.xlane.f32.xlu0 %v1392_v32 }
 0x723   : > { %1414 = vrot.lane.b32.xlu0 %v7229_v50, %s8444_s21  ;;  %s8448_s21 = smov 121  }
 0x724   : > { %v1391_v35 = vpop.xlane.xlu1 %1390 }
 0x727   : > { %1491 = vrot.lane.b32.xlu0 %v7245_v54, %s8442_s14 }
 0x728   : > { %v1494_v48 = vpop.permute.xlu1 %1493 }
 0x72b   : > { %1569 = vrot.lane.b32.xlu0 %v7234_v52, %s8442_s14  ;;  %s8446_s14 = smov 40  }
 0x72c   : > { %v6712_v51 = vpop.permute.xlu1 %6711 }
 0x72d   : > { %v6714_v54 = vunpack.i.h.bf16 %v6712_v51  ;;  %v6713_v56 = vunpack.i.l.bf16 %v6712_v51  ;;  %v773_v51 = vsub.f32 %v7304_v63, %v7339_v14  ;;  %v1085_v14 = vsub.f32 %v7313_v2, %v7350_v29 }
 0x72f   : > { %v6468_v52 = vpack.c.bf16 %v6714_v54, %v6713_v56  ;;  %v774_v56 = vmul.f32 1.442695, %v773_v51 }
 0x730   : > { %v6717_v59 = vpop.permute.xlu1 %6716 }
 0x731   : > { %v6719_v60 = vunpack.i.h.bf16 %v6717_v59  ;;  %v6718_v61 = vunpack.i.l.bf16 %v6717_v59  ;;  %v1086_v59 = vmul.f32 1.442695, %v1085_v14 }
 0x733   : > { %v6472_v62 = vpack.c.bf16 %v6719_v60, %v6718_v61 }
 0x79a   : > { %v1394_v36 = vpop.xlane.xlu0 %1393 }
 0x79b   : > { %v7412_v38 = vmax.f32 %v1391_v35, %v1394_v36 }
 0x79d   : > { %v1399_v39 = vsub.f32 %v1388_v31, %v7412_v38 }
 0x79e   : > { %v1415_v40 = vpop.permute.xlu0 %1414 }
 0x79f   : > { %v1400_v41 = vmul.f32 1.442695, %v1399_v39  ;;  %6085 = vmatpush3.msra.mxu1 %v1415_v40 }
 0x7a0   : > { %6089 = vmatprep.subr.mxu1 %v6989_v24 }
 0x7a1   : > { %6836 = vpow2.f32 %v1400_v41 }
 0x7a2   : > { %v1492_v58 = vpop.permute.xlu0 %1491 }
 0x7a6   : > { %v1570_v0 = vpop.permute.xlu0 %1569 }
 0x7ab   : > { %v7416_v53 = vpop.eup %6836 }
 0x7ac   : > { %6087 = vmatmul.mubr.msk.f32.vlgmr.msra.gmra.mrb[8].mxu1 %vm556_vm2, %v7416_v53 }
 0x7ad   : > { %6090 = vmatpush3.xpose.msk.msra.mxu1 %vm556_vm2, %v1494_v48  ;;  %6091 = vmatprep.mubr.msk.f32.mxu1 %vm6988_vm1, %v6989_v24  ;;  %v1396_v48 = vsub.f32 %v7392_v26, %v7412_v38  ;;  %v1098_v26 = vsel %vm556_vm2, %v7353_v33, 0.0 }
 0x7ae   : > { %6467 = vmatprep.subr.bf16.mxu1 %v6987_v16 }
 0x7af   : > { %v1397_v54 = vmul.f32 1.442695, %v1396_v48 }
 0x7b0   : > { %6092 = vmatmul.mubr.msk.f32.vlgmr.msra.gmra.mrb[10].mxu1 %vm556_vm2, %v1492_v58 }
 0x7b1   : > { %6470 = vmatpush3.bf16.xpose.msk.msra.mxu1 %vm7197_vm3, %v6468_v52  ;;  %6102 = vmatprep.mubr.msk.f32.mxu1 %vm6988_vm1, %v6989_v24  ;;  %6838 = vpow2.f32 %v1397_v54 }
 0x7b2   : > { %6471 = vmatprep.subr.bf16.mxu1 %v6987_v16  ;;  %6840 = vpow2.f32 %v774_v56 }
 0x7b3   : > { %6842 = vpow2.f32 %v1086_v59 }
 0x7b9   : > { %6474 = vmatpush3.bf16.xpose.msk.msra.mxu1 %vm7197_vm3, %v6472_v62 }
 0x7ba   : > { %6487 = vmatprep.subr.bf16.mxu1 %v6987_v16 }
 0x7bb   : > { %v6839_v52 = vpop.eup %6838 }
 0x7bc   : > { %v6841_v58 = vpop.eup %6840 }
 0x7bd   : > { %v6843_v60 = vpop.eup %6842 }
 0x7c0   : > { %6103 = vmatmul.mubr.msk.f32.vlgmr.msra.gmra.mrb[12].mxu1 %vm556_vm2, %v1570_v0 }
 0x7c1   : > { %6140 = vmatprep.mubr.msk.f32.mxu1 %vm6988_vm1, %v6989_v24 }
 0x87f   : > { %v7436_v1 = vpop.f32.mrb[8].mxu1 }
 0x880   : > { %v6088_v3 = vpop.f32.mrb[9].mxu1 }
 0x883   : > { %v1565_v4 = vpop.f32.mrb[10].mxu1 }
 0x884   : > { %v6093_v6 = vpop.f32.mrb[11].mxu1 }
 0x893   : > { %v1655_v7 = vpop.f32.mrb[12].mxu1 }
 0x894   : > { %1663 = vrot.lane.b32.xlu0 %v1655_v7, %s8476_s26  ;;  %1660 = vrot.lane.b32.xlu1 %v1655_v7, %s8474_s24  ;;  %v6104_v8 = vpop.f32.mrb[13].mxu1 }
 0x898   : > { %1669 = vrot.lane.b32.xlu0 %v1655_v7, %s8472_s23  ;;  %1666 = vrot.lane.b32.xlu1 %v1655_v7, %s8470_s27  ;;  %s8524_s27 = smov 7  }
 0x89c   : > { %1675 = vrot.lane.b32.xlu0 %v1655_v7, %s8460_s25  ;;  %1672 = vrot.lane.b32.xlu1 %v1655_v7, %s8458_s28  ;;  %s8462_s25 = smov 32   ;;  %s8519_s28 = smov 96  }
 0x8a0   : > { %1690 = vrot.lane.b32.xlu0 %v1565_v4, %s8456_s16  ;;  %1678 = vrot.lane.b32.xlu1 %v1655_v7, %s8454_s29  ;;  %s8521_s29 = smov 6   ;;  %s8522_s16 = smov 5  }
 0x906   : > { %v1664_v44 = vpop.permute.xlu0 %1663  ;;  %v1661_v9 = vpop.permute.xlu1 %1660 }
 0x907   : > { %v1681_v10 = vsel %vm739_vm4, %v1655_v7, %v1661_v9 }
 0x908   : > { %v1682_v12 = vsel %vm741_vm5, %v1681_v10, %v1664_v44 }
 0x90a   : > { %v1670_v11 = vpop.permute.xlu0 %1669  ;;  %v1667_v13 = vpop.permute.xlu1 %1666 }
 0x90b   : > { %v1683_v15 = vsel %vm743_vm6, %v1682_v12, %v1667_v13  ;;  %v787_v13 = vsel %vm556_vm2, %v7343_v25, 0.0  ;;  %v1818_v25 = vld [vmem:[%s8422_s4] sm:$0xff] }
 0x90c   : > { %v1684_v22 = vsel %vm745_vm7, %v1683_v15, %v1670_v11  ;;  %v1409_v11 = vsel %vm556_vm2, %v7416_v53, 0.0 }
 0x90e   : > { %v1676_v20 = vpop.permute.xlu0 %1675  ;;  %v1673_v27 = vpop.permute.xlu1 %1672 }
 0x90f   : > { %v1685_v28 = vsel %vm747_vm8, %v1684_v22, %v1673_v27 }
 0x910   : > { %v1686_v31 = vsel %vm749_vm9, %v1685_v28, %v1676_v20 }
 0x912   : > { %v1691_v30 = vpop.permute.xlu0 %1690  ;;  %v1679_v32 = vpop.permute.xlu1 %1678 }
 0x913   : > { %v1687_v35 = vsel %vm751_vm10, %v1686_v31, %v1679_v32 }
 0x914   : > { %v1693_v36 = vadd.f32 %v1691_v30, %v1687_v35  ;;  %v1688_v39 = vmul.f32 0.35355338, %v1687_v35 }
 0x916   : > { %v1694_v40 = vmul.f32 0.35355338, %v1693_v36  ;;  %v1700_v41 = vsel %vm765_vm11, %v1688_v39, -inf  ;;  %v1819_v36 = vld [vmem:[%s8422_s4 + $0x8] sm:$0xff] }
 0x917   : > { %1701 = vmax.xlane.f32.xlu0 %v1700_v41  ;;  %v1821_v41 = vld [vmem:[%s8422_s4 + $0x18] sm:$0xff] }
 0x918   : > { %1696 = vrot.lane.b32.xlu1 %v1694_v40, %s8452_s17  ;;  %v6476_v40 = vpack.c.bf16 %v1819_v36, %v1818_v25  ;;  %s8523_s17 = smov 23  }
 0x92d   : > { %1725 = vrot.lane.b32.xlu0 %v7229_v50, %s8446_s14  ;;  %s8468_s14 = smov 8  }
 0x931   : > { %1403 = vrot.lane.b32.xlu0 %v6839_v52, %s8448_s21 }
 0x935   : > { %780 = vrot.lane.b32.xlu0 %v6841_v58, %s8448_s21 }
 0x954   : > { %1099 = vadd.xlane.f32.xlu0 %v1098_v26 }
 0x98a   : > { %v1697_v63 = vpop.permute.xlu1 %1696 }
 0x98b   : > { %v1699_v38 = vsel %vm7319_vm12, %v1697_v63, -1e+30 }
 0x98c   : > { %v1703_v50 = vsel %vm556_vm2, %v1699_v38, -inf }
 0x98d   : > { %1704 = vmax.xlane.f32.xlu1 %v1703_v50 }
 0x99e   : > { %1092 = vrot.lane.b32.xlu1 %v6843_v60, %s8448_s21 }
 0x9a4   : > { %v1702_v61 = vpop.xlane.xlu0 %1701 }
 0x9a8   : > { %v1726_v62 = vpop.permute.xlu0 %1725 }
 0x9a9   : > { %6106 = vmatpush3.msra.mxu0 %v1726_v62 }
 0x9aa   : > { %6475 = vmatprep.subr.bf16.mxu0 %v6987_v16 }
 0x9ac   : > { %v1404_v33 = vpop.permute.xlu0 %1403 }
 0x9ad   : > { %v1406_v2 = vsel %vm783_vm13, %v1404_v33, 0.0 }
 0x9ae   : > { %1407 = vadd.xlane.f32.xlu0 %v1406_v2 }
 0x9b0   : > { %v781_v22 = vpop.permute.xlu0 %780 }
 0x9b1   : > { %v784_v27 = vsel %vm783_vm13, %v781_v22, 0.0 }
 0x9e1   : > { %v1100_v28 = vpop.xlane.xlu0 %1099 }
 0xa1a   : > { %v1705_v29 = vpop.xlane.xlu1 %1704 }
 0xa1b   : > { %v1706_v0 = vmax.f32 %v1702_v61, %v1705_v29 }
 0xa1d   : > { %v1707_v3 = vsub.f32 %v1688_v39, %v1706_v0  ;;  %v1710_v4 = vsub.f32 %v1699_v38, %v1706_v0  ;;  %v1820_v39 = vld [vmem:[%s8422_s4 + $0x10] sm:$0xff] }
 0xa1e   : > { %v1093_v9 = vpop.permute.xlu1 %1092  ;;  %v6479_v48 = vpack.c.bf16 %v1821_v41, %v1820_v39 }
 0xa1f   : > { %v1708_v6 = vmul.f32 1.442695, %v1707_v3  ;;  %v1711_v7 = vmul.f32 1.442695, %v1710_v4  ;;  %v1095_v10 = vsel %vm783_vm13, %v1093_v9, 0.0 }
 0xa21   : > { %6844 = vpow2.f32 %v1708_v6 }
 0xa22   : > { %6846 = vpow2.f32 %v1711_v7 }
 0xa2b   : > { %v6845_v8 = vpop.eup %6844 }
 0xa2c   : > { %v6847_v44 = vpop.eup %6846  ;;  %1714 = vrot.lane.b32.xlu1 %v6845_v8, %s8448_s21  ;;  %s8466_s21 = smov 16  }
 0xa2d   : > { %6108 = vmatmul.mubr.msk.f32.vlgmr.msra.gmra.mrb[14].mxu0 %vm556_vm2, %v6847_v44  ;;  %v1720_v12 = vsel %vm556_vm2, %v6847_v44, 0.0 }
 0xa2e   : > { %6118 = vmatprep.mubr.msk.f32.mxu0 %vm6988_vm1, %v6989_v24  ;;  %6477 = vmatpush3.bf16.msra.mxu0 %v6476_v40 }
 0xa2f   : > { %6478 = vmatprep.subr.bf16.mxu0 %v6987_v16 }
 0xa32   : > { %6480 = vmatpush3.bf16.msra.mxu0 %v6479_v48 }
 0xa33   : > { %6481 = vmatprep.subr.bf16.mxu0 %v6987_v16 }
 0xa3b   : > { %v1408_v53 = vpop.xlane.xlu0 %1407 }
 0xa50   : > { %1096 = vadd.xlane.f32.xlu1 %v1095_v10 }
 0xa54   : > { %1410 = vadd.xlane.f32.xlu1 %v1409_v11 }
 0xa58   : > { %1721 = vadd.xlane.f32.xlu1 %v1720_v12 }
 0xa5c   : > { %788 = vadd.xlane.f32.xlu1 %v787_v13 }
 0xa9e   : > { %v1715_v15 = vpop.permute.xlu1 %1714 }
 0xa9f   : > { %v1717_v20 = vsel %vm783_vm13, %v1715_v15, 0.0 }
 0xaa0   : > { %1718 = vadd.xlane.f32.xlu0 %v1717_v20 }
 0xaa4   : > { %785 = vadd.xlane.f32.xlu0 %v784_v27 }
 0xadd   : > { %v1097_v30 = vpop.xlane.xlu1 %1096 }
 0xade   : > { %v1101_v31 = vadd.f32 %v1100_v28, %v1097_v30 }
 0xae0   : > { %6848 = vrcp.f32 %v1101_v31 }
 0xae1   : > { %v1411_v32 = vpop.xlane.xlu1 %1410 }
 0xae2   : > { %v1412_v35 = vadd.f32 %v1411_v32, %v1408_v53  ;;  %v7530_v32 = vsub.s32 0, %v7214_v45 }
 0xae4   : > { %6850 = vrcp.f32 %v1412_v35  ;;  %v7534_v35 = vsub.s32 1, %v7214_v45  ;;  %v1912_v25 = vrot.slane %v7222_v47, %v7530_v32 }
 0xae5   : > { %v1722_v63 = vpop.xlane.xlu1 %1721 }
 0xae6   : > { %v1917_v40 = vrot.slane %v7222_v47, %v7534_v35 }
 0xae9   : > { %v789_v60 = vpop.xlane.xlu1 %788 }
 0xaea   : > { %v6849_v51 = vpop.eup %6848 }
 0xaeb   : > { %v1179_v54 = vmul.f32 %v6849_v51, %v7375_v57  ;;  %v2015_v51 = vld [vmem:[%s8422_s4 + $0x30] sm:$0xff] }
 0xaed   : > { %1803 = vrot.lane.b32.xlu0 %v1179_v54, %s8468_s14  ;;  %v2016_v54 = vld [vmem:[%s8422_s4 + $0x38] sm:$0xff]  ;;  %s8525_s14 = smov 105  }
 0xaee   : > { %v6851_v56 = vpop.eup %6850 }
 0xaef   : > { %v1490_v52 = vmul.f32 %v6851_v56, %v7436_v1  ;;  %v6491_v56 = vpack.c.bf16 %v2016_v54, %v2015_v51 }
 0xaf1   : > { %1807 = vrot.lane.b32.xlu1 %v1490_v52, %s8466_s21  ;;  %v7551_v52 = vsub.s32 2, %v7214_v45  ;;  %s8526_s21 = smov 88  }
 0xb00   : > { %v1797_v58 = vpop.f32.mrb[14].mxu0 }
 0xb01   : > { %v6109_v26 = vpop.f32.mrb[15].mxu0 }
 0xb2d   : > { %v1719_v14 = vpop.xlane.xlu0 %1718 }
 0xb2e   : > { %v1723_v38 = vadd.f32 %v1722_v63, %v1719_v14 }
 0xb30   : > { %6852 = vrcp.f32 %v1723_v38 }
 0xb31   : > { %v786_v59 = vpop.xlane.xlu0 %785 }
 0xb32   : > { %v790_v61 = vadd.f32 %v789_v60, %v786_v59 }
 0xb34   : > { %6854 = vrcp.f32 %v790_v61 }
 0xb3a   : > { %v6853_v50 = vpop.eup %6852 }
 0xb3b   : > { %v1801_v57 = vmul.f32 %v6853_v50, %v1797_v58  ;;  %v1922_v58 = vrot.slane %v7222_v47, %v7551_v52  ;;  %v7559_v50 = vsub.s32 3, %v7214_v45 }
 0xb3d   : > { %1811 = vrot.lane.b32.xlu1 %v1801_v57, %s8464_s22  ;;  %v2020_v57 = vrot.slane %v7222_v47, %v7559_v50  ;;  %s8527_s22 = smov 64  }
 0xb3e   : > { %v6855_v62 = vpop.eup %6854 }
 0xb3f   : > { %v868_v2 = vmul.f32 %v6855_v62, %v7373_v55 }
 0xb5f   : > { %v1804_v1 = vpop.permute.xlu0 %1803 }
 0xb60   : > { %v1814_v29 = vsel %vm556_vm2, %v868_v2, %v1804_v1 }
 0xb63   : > { %v1808_v33 = vpop.permute.xlu1 %1807 }
 0xb64   : > { %v1815_v0 = vsel %vm783_vm13, %v1814_v29, %v1808_v33 }
 0xbaf   : > { %v1812_v3 = vpop.permute.xlu1 %1811 }
 0xbb0   : > { %v1817_v4 = vsel %vm1816_vm14, %v1815_v0, %v1812_v3 }
 0xbb1   : > { %6119 = vmatmul.mubr.msk.f32.vlgmr.msra.gmra.mrb[16].mxu0 %vm330_vm0, %v1817_v4  ;;  %v7570_v4 = vld [vmem:[%s8420_s2 + $0x20] sm:$0xff] }
 0xbb2   : > { %6129 = vmatprep.mubr.msk.f32.mxu0 %vm6988_vm1, %v6989_v24 }
 0xc84   : > { %v1891_v6 = vpop.f32.mrb[16].mxu0 }
 0xc85   : > { %v1895_v7 = vadd.f32 %v1891_v6, %v7189_v34  ;;  %v6120_v8 = vpop.f32.mrb[17].mxu0  ;;  %v6725_v34 = vpack.i.bf16 %v7171_v23, %v7158_v19  ;;  %v7575_v6 = vld [vmem:[%s8420_s2 + $0x28] sm:$0xff] }
 0xc86   : > { %v7582_v8 = vld [vmem:[%s8420_s2 + $0x30] sm:$0xff] }
 0xc87   : > { %v1896_v44 = vsel %vm330_vm0, %v1895_v7, 0.0 }
 0xc88   : > { %1897 = vadd.xlane.f32.xlu0 %v1896_v44  ;;  %v7587_v44 = vld [vmem:[%s8420_s2 + $0x38] sm:$0xff] }
 0xc9e   : > { %6721 = vrot.lane.b32.xlu0 %v6720_v21, %s8462_s25  ;;  %v6488_v21 = vpack.c.bf16 %v2014_v18, %v2013_v17 }
 0xca0   : > { %6489 = vmatpush3.bf16.msra.mxu1 %v6488_v21 }
 0xca1   : > { %6490 = vmatprep.subr.bf16.mxu1 %v6987_v16 }
 0xca4   : > { %6492 = vmatpush3.bf16.msra.mxu1 %v6491_v56 }
 0xca5   : > { %6154 = vmatprep.subr.mxu1 %v6989_v24 }
 0xd15   : > { %v1898_v55 = vpop.xlane.xlu0 %1897 }
 0xd16   : > { %v1899_v9 = vmul.f32 0.03125, %v1898_v55  ;;  %v6497_v55 = vpack.c.bf16 %v7587_v44, %v7582_v8 }
 0xd18   : > { %v1900_v10 = vsub.f32 %v1895_v7, %v1899_v9  ;;  %v6494_v7 = vpack.c.bf16 %v7575_v6, %v7570_v4 }
 0xd19   : > { %v6722_v13 = vpop.permute.xlu0 %6721 }
 0xd1a   : > { %v1901_v11 = vmul.f32 %v1900_v10, %v1900_v10  ;;  %v6724_v15 = vunpack.i.h.bf16 %v6722_v13  ;;  %v6723_v20 = vunpack.i.l.bf16 %v6722_v13 }
 0xd1c   : > { %v1902_v12 = vsel %vm330_vm0, %v1901_v11, 0.0  ;;  %v6482_v22 = vpack.c.bf16 %v6724_v15, %v6723_v20 }
 0xd1d   : > { %1903 = vadd.xlane.f32.xlu1 %v1902_v12  ;;  %v7594_v12 = vsub.s32 4, %v7214_v45 }
 0xd1e   : > { %6483 = vmatpush3.bf16.msra.mxu0 %v6482_v22  ;;  %v6922_v22 = vld [vmem:[%s8423_s5] sm:$0xff] }
 0xd1f   : > { %6484 = vmatprep.subr.bf16.mxu0 %v6987_v16  ;;  %v2111_v13 = vrot.slane %v7222_v47, %v7594_v12 }
 0xd2e   : > { %6726 = vrot.lane.b32.xlu1 %v6725_v34, %s8462_s25  ;;  %v7597_v34 = vsub.s32 5, %v7214_v45  ;;  %s8520_s25 = smov 3  }
 0xd30   : > { %v2116_v17 = vrot.slane %v6922_v22, %v7597_v34 }
 0xdaa   : > { %v1904_v19 = vpop.xlane.xlu1 %1903 }
 0xdab   : > { %v1905_v23 = vmul.f32 0.03125, %v1904_v19  ;;  %v7620_v19 = vld [vmem:[%s8423_s5 + $0x8] sm:$0xff] }
 0xdad   : > { %v1906_v27 = vadd.f32 1e-05, %v1905_v23 }
 0xdae   : > { %v6727_v28 = vpop.permute.xlu1 %6726 }
 0xdaf   : > { %6856 = vrsqrt.f32 %v1906_v27  ;;  %v6729_v30 = vunpack.i.h.bf16 %v6727_v28  ;;  %v6728_v31 = vunpack.i.l.bf16 %v6727_v28  ;;  %v2201_v27 = vrot.slane %v7620_v19, %v7227_v49 }
 0xdb1   : > { %v6485_v53 = vpack.c.bf16 %v6729_v30, %v6728_v31 }
 0xdb3   : > { %6486 = vmatpush3.bf16.msra.mxu0 %v6485_v53 }
 0xdb4   : > { %6493 = vmatprep.subr.bf16.mxu0 %v6987_v16 }
 0xdb9   : > { %v6857_v36 = vpop.eup %6856 }
 0xdba   : > { %v1908_v39 = vmul.f32 %v6857_v36, %v1900_v10 }
 0xdbc   : > { %v1913_v41 = vmul.f32 %v1912_v25, %v1908_v39 }
 0xdbe   : > { %v1918_v48 = vadd.f32 %v1917_v40, %v1913_v41 }
 0xdc0   : > { %6130 = vmatmul.mubr.msk.f32.vlgmr.msra.gmra.mrb[18].mxu0 %vm330_vm0, %v1918_v48 }
 0xdc1   : > { %6151 = vmatprep.mubr.msk.f32.mxu0 %vm6988_vm1, %v6989_v24  ;;  %6495 = vmatpush3.bf16.msra.mxu0 %v6494_v7 }
 0xdc2   : > { %6496 = vmatprep.subr.bf16.mxu0 %v6987_v16 }
 0xdc5   : > { %6498 = vmatpush3.bf16.msra.mxu0 %v6497_v55 }
 0xdc6   : > { %6170 = vmatprep.subr.mxu0 %v6989_v24 }
 0xe93   : > { %v2008_v26 = vpop.f32.mrb[18].mxu0 }
 0xe94   : > { %v2009_v63 = vadd.f32 %v2008_v26, %v1922_v58  ;;  %v6131_v14 = vpop.f32.mrb[19].mxu0 }
 0xe96   : > { %v2012_v38 = vmax.f32 %v2009_v63, 0.0 }
 0xe98   : > { %6141 = vmatmul.mubr.msk.f32.vlgmr.msra.gmra.mrb[14].mxu1 %vm330_vm0, %v2012_v38 }
 0xe99   : > { %6156 = vmatprep.mubr.msk.f32.mxu1 %vm6988_vm1, %v6989_v24 }
 0xf6b   : > { %v2090_v59 = vpop.f32.mrb[14].mxu1 }
 0xf6c   : > { %v2091_v60 = vadd.f32 %v2090_v59, %v2020_v57  ;;  %v6142_v61 = vpop.f32.mrb[15].mxu1 }
 0xf6e   : > { %v2094_v62 = vadd.f32 %v2091_v60, %v1918_v48  ;;  %v2206_v48 = vrot.slane %v7620_v19, %v7217_v46 }
 0xf70   : > { %v2095_v1 = vsel %vm330_vm0, %v2094_v62, 0.0 }
 0xf71   : > { %2096 = vadd.xlane.f32.xlu0 %v2095_v1 }
 0xffe   : > { %v2097_v33 = vpop.xlane.xlu0 %2096 }
 0xfff   : > { %v2098_v2 = vmul.f32 0.03125, %v2097_v33 }
0x1001   : > { %v2099_v29 = vsub.f32 %v2094_v62, %v2098_v2 }
0x1003   : > { %v2100_v0 = vmul.f32 %v2099_v29, %v2099_v29 }
0x1005   : > { %v2101_v3 = vsel %vm330_vm0, %v2100_v0, 0.0 }
0x1006   : > { %2102 = vadd.xlane.f32.xlu1 %v2101_v3 }
0x1017   : > { %6731 = vrot.lane.b32.xlu1 %v7207_v42, %s8519_s28 }
0x1093   : > { %v2103_v9 = vpop.xlane.xlu1 %2102 }
0x1094   : > { %v2104_v10 = vmul.f32 0.03125, %v2103_v9 }
0x1096   : > { %v2105_v11 = vadd.f32 1e-05, %v2104_v10 }
0x1097   : > { %v6732_v23 = vpop.permute.xlu1 %6731 }
0x1098   : > { %6858 = vrsqrt.f32 %v2105_v11  ;;  %v6734_v28 = vunpack.i.h.bf16 %v6732_v23  ;;  %v6733_v30 = vunpack.i.l.bf16 %v6732_v23 }
0x109a   : > { %v6500_v25 = vpack.c.bf16 %v6734_v28, %v6733_v30 }
0x10a2   : > { %v6859_v15 = vpop.eup %6858 }
0x10a3   : > { %v2107_v20 = vmul.f32 %v6859_v15, %v2099_v29 }
0x10a5   : > { %v2112_v18 = vmul.f32 %v2111_v13, %v2107_v20 }
0x10a7   : > { %v7605_v21 = vadd.f32 %v2116_v17, %v2112_v18 }
0x10a9   : > { %6152 = vmatmul.mubr.msk.f32.vlgmr.msra.gmra.mrb[20].mxu0 %vm330_vm0, %v7605_v21 }
0x10aa   : > { %6172 = vmatprep.mubr.msk.f32.mxu0 %vm6988_vm1, %v6989_v24 }
0x117c   : > { %v7611_v45 = vpop.f32.mrb[20].mxu0 }
0x117d   : > { %2209 = vrot.lane.b32.xlu0 %v7611_v45, %s8519_s28  ;;  %v6153_v47 = vpop.f32.mrb[21].mxu0  ;;  %v7627_v53 = vadd.f32 %v2201_v27, %v7611_v45  ;;  %v7642_v51 = vadd.f32 %v2206_v48, %v7611_v45 }
0x1181   : > { %6736 = vrot.lane.b32.xlu0 %v7211_v43, %s8519_s28 }
0x11ef   : > { %v2210_v31 = vpop.permute.xlu0 %2209 }
0x11f0   : > { %6155 = vmatpush3.xpose.msk.msra.mxu1 %vm556_vm2, %v2210_v31 }
0x11f1   : > { %6499 = vmatprep.subr.bf16.mxu1 %v6987_v16 }
0x11f3   : > { %v6737_v36 = vpop.permute.xlu0 %6736  ;;  %6157 = vmatmul.mubr.msk.f32.vlgmr.msra.gmra.mrb[16].mxu1 %vm556_vm2, %v7627_v53 }
0x11f4   : > { %6502 = vmatpush3.bf16.xpose.msk.msra.mxu1 %vm7197_vm3, %v6500_v25  ;;  %6167 = vmatprep.mubr.msk.f32.mxu1 %vm6988_vm1, %v6989_v24  ;;  %v6739_v39 = vunpack.i.h.bf16 %v6737_v36  ;;  %v6738_v40 = vunpack.i.l.bf16 %v6737_v36 }
0x11f5   : > { %6503 = vmatprep.subr.bf16.mxu1 %v6987_v16 }
0x11f6   : > { %v6504_v41 = vpack.c.bf16 %v6739_v39, %v6738_v40 }
0x11fc   : > { %6506 = vmatpush3.bf16.xpose.msk.msra.mxu1 %vm7197_vm3, %v6504_v41 }
0x11fd   : > { %6191 = vmatprep.subr.mxu1 %v6989_v24 }
0x1203   : > { %6168 = vmatmul.mubr.msk.f32.vlgmr.msra.gmra.mrb[18].mxu1 %vm556_vm2, %v7642_v51 }
0x1204   : > { %6193 = vmatprep.mubr.msk.f32.mxu1 %vm6988_vm1, %v6989_v24 }
0x12c6   : > { %v2282_v54 = vpop.f32.mrb[16].mxu1 }
0x12c7   : > { %v6158_v56 = vpop.f32.mrb[17].mxu1 }
0x12d6   : > { %v2371_v58 = vpop.f32.mrb[18].mxu1 }
0x12d7   : > { %2379 = vrot.lane.b32.xlu0 %v2371_v58, %s8476_s26  ;;  %2376 = vrot.lane.b32.xlu1 %v2371_v58, %s8474_s24  ;;  %v6169_v26 = vpop.f32.mrb[19].mxu1 }
0x12db   : > { %2385 = vrot.lane.b32.xlu0 %v2371_v58, %s8472_s23  ;;  %2382 = vrot.lane.b32.xlu1 %v2371_v58, %s8520_s25  ;;  %s8528_s23 = smov 120  }
0x12df   : > { %2391 = vrot.lane.b32.xlu0 %v2371_v58, %s8521_s29  ;;  %2388 = vrot.lane.b32.xlu1 %v2371_v58, %s8522_s16 }
0x12e3   : > { %2406 = vrot.lane.b32.xlu0 %v2282_v54, %s8523_s17  ;;  %2394 = vrot.lane.b32.xlu1 %v2371_v58, %s8524_s27 }
0x1349   : > { %v2380_v63 = vpop.permute.xlu0 %2379  ;;  %v2377_v14 = vpop.permute.xlu1 %2376 }
0x134a   : > { %v2397_v38 = vsel %vm739_vm4, %v2371_v58, %v2377_v14 }
0x134b   : > { %v2398_v59 = vsel %vm741_vm5, %v2397_v38, %v2380_v63 }
0x134d   : > { %v2386_v57 = vpop.permute.xlu0 %2385  ;;  %v2383_v60 = vpop.permute.xlu1 %2382 }
0x134e   : > { %v2399_v61 = vsel %vm743_vm6, %v2398_v59, %v2383_v60 }
0x134f   : > { %v2400_v1 = vsel %vm745_vm7, %v2399_v61, %v2386_v57 }
0x1351   : > { %v2392_v62 = vpop.permute.xlu0 %2391  ;;  %v2389_v33 = vpop.permute.xlu1 %2388 }
0x1352   : > { %v2401_v2 = vsel %vm747_vm8, %v2400_v1, %v2389_v33 }
0x1353   : > { %v2402_v0 = vsel %vm749_vm9, %v2401_v2, %v2392_v62 }
0x1355   : > { %v2407_v29 = vpop.permute.xlu0 %2406  ;;  %v2395_v3 = vpop.permute.xlu1 %2394 }
0x1356   : > { %v2403_v7 = vsel %vm751_vm10, %v2402_v0, %v2395_v3 }
0x1357   : > { %v2409_v55 = vadd.f32 %v2407_v29, %v2403_v7  ;;  %v7663_v9 = vmul.f32 0.35355338, %v2403_v7 }
0x1359   : > { %v2410_v10 = vmul.f32 0.35355338, %v2409_v55  ;;  %v2416_v11 = vsel %vm765_vm11, %v7663_v9, -inf }
0x135a   : > { %2417 = vmax.xlane.f32.xlu0 %v2416_v11 }
0x135b   : > { %2412 = vrot.lane.b32.xlu1 %v2410_v10, %s8525_s14 }
0x135f   : > { %2520 = vrot.lane.b32.xlu1 %v7611_v45, %s8526_s21 }
0x1370   : > { %2441 = vrot.lane.b32.xlu0 %v7611_v45, %s8527_s22 }
0x1374   : > { %6741 = vrot.lane.b32.xlu0 %v7207_v42, %s8526_s21 }
0x1378   : > { %6746 = vrot.lane.b32.xlu0 %v7211_v43, %s8526_s21 }
0x13cd   : > { %v2413_v13 = vpop.permute.xlu1 %2412 }
0x13ce   : > { %v2415_v15 = vsel %vm7319_vm12, %v2413_v13, -1e+30 }
0x13cf   : > { %v2419_v20 = vsel %vm556_vm2, %v2415_v15, -inf }
0x13d0   : > { %2420 = vmax.xlane.f32.xlu1 %v2419_v20 }
0x13d1   : > { %v2521_v18 = vpop.permute.xlu1 %2520 }
0x13e1   : > { %2518 = vrot.lane.b32.xlu1 %v7627_v53, %s8528_s23 }
0x13e5   : > { %2596 = vrot.lane.b32.xlu1 %v7642_v51, %s8528_s23 }
0x13e7   : > { %v2418_v22 = vpop.xlane.xlu0 %2417 }
0x13eb   : > { %v2442_v17 = vpop.permute.xlu0 %2441 }
0x13ec   : > { %6171 = vmatpush3.msra.mxu0 %v2442_v17 }
0x13ed   : > { %6175 = vmatprep.subr.mxu0 %v6989_v24 }
0x13ef   : > { %v6742_v30 = vpop.permute.xlu0 %6741 }
0x13f0   : > { %v6744_v25 = vunpack.i.h.bf16 %v6742_v30  ;;  %v6743_v36 = vunpack.i.l.bf16 %v6742_v30 }
0x13f2   : > { %v6508_v39 = vpack.c.bf16 %v6744_v25, %v6743_v36 }
0x13f3   : > { %v6747_v41 = vpop.permute.xlu0 %6746 }
0x13f4   : > { %v6749_v48 = vunpack.i.h.bf16 %v6747_v41  ;;  %v6748_v54 = vunpack.i.l.bf16 %v6747_v41 }
0x13f6   : > { %v6512_v56 = vpack.c.bf16 %v6749_v48, %v6748_v54 }
0x145d   : > { %v2421_v47 = vpop.xlane.xlu1 %2420 }
0x145e   : > { %v7684_v23 = vmax.f32 %v2418_v22, %v2421_v47 }
0x1460   : > { %v2426_v27 = vsub.f32 %v2415_v15, %v7684_v23 }
0x1461   : > { %v2519_v40 = vpop.permute.xlu1 %2518 }
0x1462   : > { %v2427_v28 = vmul.f32 1.442695, %v2426_v27 }
0x1464   : > { %6860 = vpow2.f32 %v2427_v28 }
0x1465   : > { %v2597_v58 = vpop.permute.xlu1 %2596 }
0x146e   : > { %v7687_v31 = vpop.eup %6860 }
0x146f   : > { %6173 = vmatmul.mubr.msk.f32.vlgmr.msra.gmra.mrb[22].mxu0 %vm556_vm2, %v7687_v31 }
0x1470   : > { %6176 = vmatpush3.xpose.msk.msra.mxu0 %vm556_vm2, %v2521_v18  ;;  %6177 = vmatprep.mubr.msk.f32.mxu0 %vm6988_vm1, %v6989_v24 }
0x1471   : > { %6507 = vmatprep.subr.bf16.mxu0 %v6987_v16 }
0x1473   : > { %6178 = vmatmul.mubr.msk.f32.vlgmr.msra.gmra.mrb[24].mxu0 %vm556_vm2, %v2519_v40 }
0x1474   : > { %6510 = vmatpush3.bf16.xpose.msk.msra.mxu0 %vm7197_vm3, %v6508_v39  ;;  %6188 = vmatprep.mubr.msk.f32.mxu0 %vm6988_vm1, %v6989_v24 }
0x1475   : > { %6511 = vmatprep.subr.bf16.mxu0 %v6987_v16 }
0x147c   : > { %6514 = vmatpush3.bf16.xpose.msk.msra.mxu0 %vm7197_vm3, %v6512_v56 }
0x147d   : > { %6212 = vmatprep.subr.mxu0 %v6989_v24 }
0x1483   : > { %6189 = vmatmul.mubr.msk.f32.vlgmr.msra.gmra.mrb[26].mxu0 %vm556_vm2, %v2597_v58 }
0x1484   : > { %6214 = vmatprep.mubr.msk.f32.mxu0 %vm6988_vm1, %v6989_v24 }
0x1542   : > { %v7707_v26 = vpop.f32.mrb[22].mxu0 }
0x1543   : > { %v6174_v63 = vpop.f32.mrb[23].mxu0 }
0x1546   : > { %v2592_v14 = vpop.f32.mrb[24].mxu0 }
0x1547   : > { %v6179_v38 = vpop.f32.mrb[25].mxu0 }
0x1556   : > { %v2682_v57 = vpop.f32.mrb[26].mxu0 }
0x1557   : > { %2690 = vrot.lane.b32.xlu1 %v2682_v57, %s8476_s26  ;;  %2687 = vrot.lane.b32.xlu0 %v2682_v57, %s8474_s24  ;;  %v6190_v59 = vpop.f32.mrb[27].mxu0  ;;  %s8530_s24 = smov 80   ;;  %s8531_s26 = smov 56  }
0x155b   : > { %2696 = vrot.lane.b32.xlu1 %v2682_v57, %s8529_s0  ;;  %2693 = vrot.lane.b32.xlu0 %v2682_v57, %s8520_s25 }
0x155f   : > { %2702 = vrot.lane.b32.xlu1 %v2682_v57, %s8521_s29  ;;  %2699 = vrot.lane.b32.xlu0 %v2682_v57, %s8522_s16 }
0x1563   : > { %2717 = vrot.lane.b32.xlu1 %v2592_v14, %s8523_s17  ;;  %2705 = vrot.lane.b32.xlu0 %v2682_v57, %s8524_s27 }
0x15c9   : > { %v2691_v60 = vpop.permute.xlu1 %2690  ;;  %v2688_v61 = vpop.permute.xlu0 %2687 }
0x15ca   : > { %v2708_v62 = vsel %vm739_vm4, %v2682_v57, %v2688_v61 }
0x15cb   : > { %v2709_v33 = vsel %vm741_vm5, %v2708_v62, %v2691_v60 }
0x15cd   : > { %v2697_v1 = vpop.permute.xlu1 %2696  ;;  %v2694_v2 = vpop.permute.xlu0 %2693 }
0x15ce   : > { %v2710_v29 = vsel %vm743_vm6, %v2709_v33, %v2694_v2 }
0x15cf   : > { %v2711_v3 = vsel %vm745_vm7, %v2710_v29, %v2697_v1 }
0x15d1   : > { %v2703_v0 = vpop.permute.xlu1 %2702  ;;  %v2700_v7 = vpop.permute.xlu0 %2699 }
0x15d2   : > { %v2712_v55 = vsel %vm747_vm8, %v2711_v3, %v2700_v7 }
0x15d3   : > { %v2713_v11 = vsel %vm749_vm9, %v2712_v55, %v2703_v0 }
0x15d5   : > { %v2718_v10 = vpop.permute.xlu1 %2717  ;;  %v2706_v13 = vpop.permute.xlu0 %2705 }
0x15d6   : > { %v2714_v15 = vsel %vm751_vm10, %v2713_v11, %v2706_v13 }
0x15d7   : > { %v7724_v20 = vmul.f32 0.35355338, %v2714_v15  ;;  %v2720_v22 = vadd.f32 %v2718_v10, %v2714_v15 }
0x15d9   : > { %v2721_v17 = vmul.f32 0.35355338, %v2720_v22  ;;  %v2727_v18 = vsel %vm765_vm11, %v7724_v20, -inf }
0x15da   : > { %2728 = vmax.xlane.f32.xlu1 %v2727_v18 }
0x15db   : > { %2723 = vrot.lane.b32.xlu0 %v2721_v17, %s8525_s14 }
0x15eb   : > { %2831 = vrot.lane.b32.xlu1 %v7611_v45, %s8530_s24 }
0x15ef   : > { %6751 = vrot.lane.b32.xlu1 %v7207_v42, %s8530_s24 }
0x15f3   : > { %6756 = vrot.lane.b32.xlu1 %v7211_v43, %s8530_s24 }
0x164d   : > { %v2724_v47 = vpop.permute.xlu0 %2723 }
0x164e   : > { %v2726_v27 = vsel %vm7319_vm12, %v2724_v47, -1e+30 }
0x164f   : > { %v2730_v28 = vsel %vm556_vm2, %v2726_v27, -inf }
0x1650   : > { %2731 = vmax.xlane.f32.xlu0 %v2730_v28 }
0x1666   : > { %2752 = vrot.lane.b32.xlu0 %v7611_v45, %s8531_s26 }
0x1667   : > { %v2729_v30 = vpop.xlane.xlu1 %2728 }
0x166a   : > { %2829 = vrot.lane.b32.xlu0 %v7627_v53, %s8532_s1 }
0x166b   : > { %v2832_v48 = vpop.permute.xlu1 %2831 }
0x166e   : > { %2907 = vrot.lane.b32.xlu0 %v7642_v51, %s8532_s1 }
0x166f   : > { %v6752_v54 = vpop.permute.xlu1 %6751 }
0x1670   : > { %v6754_v58 = vunpack.i.h.bf16 %v6752_v54  ;;  %v6753_v63 = vunpack.i.l.bf16 %v6752_v54 }
0x1672   : > { %v6516_v14 = vpack.c.bf16 %v6754_v58, %v6753_v63 }
0x1673   : > { %v6757_v57 = vpop.permute.xlu1 %6756 }
0x1674   : > { %v6759_v59 = vunpack.i.h.bf16 %v6757_v57  ;;  %v6758_v60 = vunpack.i.l.bf16 %v6757_v57 }
0x1676   : > { %v6520_v61 = vpack.c.bf16 %v6759_v59, %v6758_v60 }
0x16dd   : > { %v2732_v25 = vpop.xlane.xlu0 %2731 }
0x16de   : > { %v7744_v36 = vmax.f32 %v2729_v30, %v2732_v25 }
0x16e0   : > { %v2737_v39 = vsub.f32 %v2726_v27, %v7744_v36 }
0x16e1   : > { %v2753_v40 = vpop.permute.xlu0 %2752 }
0x16e2   : > { %v2738_v41 = vmul.f32 1.442695, %v2737_v39  ;;  %6192 = vmatpush3.msra.mxu1 %v2753_v40 }
0x16e3   : > { %6196 = vmatprep.subr.mxu1 %v6989_v24 }
0x16e4   : > { %6862 = vpow2.f32 %v2738_v41 }
0x16e5   : > { %v2830_v38 = vpop.permute.xlu0 %2829 }
0x16e9   : > { %v2908_v62 = vpop.permute.xlu0 %2907 }
0x16ee   : > { %v7748_v56 = vpop.eup %6862 }
0x16ef   : > { %6194 = vmatmul.mubr.msk.f32.vlgmr.msra.gmra.mrb[20].mxu1 %vm556_vm2, %v7748_v56 }
0x16f0   : > { %6197 = vmatpush3.xpose.msk.msra.mxu1 %vm556_vm2, %v2832_v48  ;;  %6198 = vmatprep.mubr.msk.f32.mxu1 %vm6988_vm1, %v6989_v24 }
0x16f1   : > { %6515 = vmatprep.subr.bf16.mxu1 %v6987_v16 }
0x16f3   : > { %6199 = vmatmul.mubr.msk.f32.vlgmr.msra.gmra.mrb[22].mxu1 %vm556_vm2, %v2830_v38 }
0x16f4   : > { %6518 = vmatpush3.bf16.xpose.msk.msra.mxu1 %vm7197_vm3, %v6516_v14  ;;  %6209 = vmatprep.mubr.msk.f32.mxu1 %vm6988_vm1, %v6989_v24 }
0x16f5   : > { %6519 = vmatprep.subr.bf16.mxu1 %v6987_v16 }
0x16fc   : > { %6522 = vmatpush3.bf16.xpose.msk.msra.mxu1 %vm7197_vm3, %v6520_v61 }
0x16fd   : > { %6233 = vmatprep.subr.mxu1 %v6989_v24 }
0x1703   : > { %6210 = vmatmul.mubr.msk.f32.vlgmr.msra.gmra.mrb[24].mxu1 %vm556_vm2, %v2908_v62 }
0x1704   : > { %6235 = vmatprep.mubr.msk.f32.mxu1 %vm6988_vm1, %v6989_v24 }
0x17c2   : > { %v7768_v1 = vpop.f32.mrb[20].mxu1 }
0x17c3   : > { %v6195_v33 = vpop.f32.mrb[21].mxu1 }
0x17c6   : > { %v2903_v2 = vpop.f32.mrb[22].mxu1 }
0x17c7   : > { %v6200_v29 = vpop.f32.mrb[23].mxu1 }
0x17d6   : > { %v2993_v0 = vpop.f32.mrb[24].mxu1 }
0x17d7   : > { %3001 = vrot.lane.b32.xlu0 %v2993_v0, %s8533_s3  ;;  %2998 = vrot.lane.b32.xlu1 %v2993_v0, %s8534_s6  ;;  %v6211_v3 = vpop.f32.mrb[25].mxu1 }
0x17db   : > { %3007 = vrot.lane.b32.xlu0 %v2993_v0, %s8529_s0  ;;  %3004 = vrot.lane.b32.xlu1 %v2993_v0, %s8520_s25 }
0x17df   : > { %3013 = vrot.lane.b32.xlu0 %v2993_v0, %s8521_s29  ;;  %3010 = vrot.lane.b32.xlu1 %v2993_v0, %s8522_s16 }
0x17e3   : > { %3028 = vrot.lane.b32.xlu0 %v2903_v2, %s8523_s17  ;;  %3016 = vrot.lane.b32.xlu1 %v2993_v0, %s8524_s27 }
0x1849   : > { %v3002_v7 = vpop.permute.xlu0 %3001  ;;  %v2999_v55 = vpop.permute.xlu1 %2998 }
0x184a   : > { %v3019_v10 = vsel %vm739_vm4, %v2993_v0, %v2999_v55 }
0x184b   : > { %v3020_v13 = vsel %vm741_vm5, %v3019_v10, %v3002_v7 }
0x184d   : > { %v3008_v11 = vpop.permute.xlu0 %3007  ;;  %v3005_v15 = vpop.permute.xlu1 %3004 }
0x184e   : > { %v3021_v22 = vsel %vm743_vm6, %v3020_v13, %v3005_v15 }
0x184f   : > { %v3022_v18 = vsel %vm745_vm7, %v3021_v22, %v3008_v11 }
0x1851   : > { %v3014_v17 = vpop.permute.xlu0 %3013  ;;  %v3011_v47 = vpop.permute.xlu1 %3010 }
0x1852   : > { %v3023_v27 = vsel %vm747_vm8, %v3022_v18, %v3011_v47 }
0x1853   : > { %v3024_v30 = vsel %vm749_vm9, %v3023_v27, %v3014_v17 }
0x1855   : > { %v3029_v28 = vpop.permute.xlu0 %3028  ;;  %v3017_v25 = vpop.permute.xlu1 %3016 }
0x1856   : > { %v3025_v39 = vsel %vm751_vm10, %v3024_v30, %v3017_v25 }
0x1857   : > { %v7785_v40 = vmul.f32 0.35355338, %v3025_v39  ;;  %v3031_v41 = vadd.f32 %v3029_v28, %v3025_v39 }
0x1859   : > { %v3032_v48 = vmul.f32 0.35355338, %v3031_v41  ;;  %v3038_v54 = vsel %vm765_vm11, %v7785_v40, -inf }
0x185a   : > { %3039 = vmax.xlane.f32.xlu0 %v3038_v54 }
0x185b   : > { %3034 = vrot.lane.b32.xlu1 %v3032_v48, %s8525_s14 }
0x185f   : > { %3142 = vrot.lane.b32.xlu1 %v7611_v45, %s8535_s18 }
0x1870   : > { %3063 = vrot.lane.b32.xlu0 %v7611_v45, %s8536_s11 }
0x1874   : > { %6761 = vrot.lane.b32.xlu0 %v7207_v42, %s8535_s18 }
0x1878   : > { %6766 = vrot.lane.b32.xlu0 %v7211_v43, %s8535_s18 }
0x18cd   : > { %v3035_v58 = vpop.permute.xlu1 %3034 }
0x18ce   : > { %v3037_v63 = vsel %vm7319_vm12, %v3035_v58, -1e+30 }
0x18cf   : > { %v3041_v14 = vsel %vm556_vm2, %v3037_v63, -inf }
0x18d0   : > { %3042 = vmax.xlane.f32.xlu1 %v3041_v14 }
0x18d1   : > { %v3143_v59 = vpop.permute.xlu1 %3142 }
0x18e1   : > { %3140 = vrot.lane.b32.xlu1 %v7627_v53, %s8537_s15 }
0x18e5   : > { %3218 = vrot.lane.b32.xlu1 %v7642_v51, %s8537_s15 }
0x18e7   : > { %v3040_v38 = vpop.xlane.xlu0 %3039 }
0x18eb   : > { %v3064_v57 = vpop.permute.xlu0 %3063 }
0x18ec   : > { %6213 = vmatpush3.msra.mxu0 %v3064_v57 }
0x18ed   : > { %6217 = vmatprep.subr.mxu0 %v6989_v24 }
0x18ef   : > { %v6762_v2 = vpop.permute.xlu0 %6761 }
0x18f0   : > { %v6764_v53 = vunpack.i.h.bf16 %v6762_v2  ;;  %v6763_v0 = vunpack.i.l.bf16 %v6762_v2 }
0x18f2   : > { %v6524_v51 = vpack.c.bf16 %v6764_v53, %v6763_v0  ;;  %v2734_v53 = vsub.f32 %v7724_v20, %v7744_v36 }
0x18f3   : > { %v6767_v7 = vpop.permute.xlu0 %6766 }
0x18f4   : > { %v6769_v55 = vunpack.i.h.bf16 %v6767_v7  ;;  %v6768_v10 = vunpack.i.l.bf16 %v6767_v7 }
0x18f6   : > { %v6528_v11 = vpack.c.bf16 %v6769_v55, %v6768_v10  ;;  %v2423_v55 = vsub.f32 %v7663_v9, %v7684_v23 }
0x195d   : > { %v3043_v60 = vpop.xlane.xlu1 %3042 }
0x195e   : > { %v7806_v61 = vmax.f32 %v3040_v38, %v3043_v60 }
0x1960   : > { %v3048_v62 = vsub.f32 %v3037_v63, %v7806_v61  ;;  %v3045_v7 = vsub.f32 %v7785_v40, %v7806_v61  ;;  %v2747_v40 = vsel %vm556_vm2, %v7748_v56, 0.0 }
0x1961   : > { %v3141_v3 = vpop.permute.xlu1 %3140 }
0x1962   : > { %v3049_v33 = vmul.f32 1.442695, %v3048_v62  ;;  %v3046_v10 = vmul.f32 1.442695, %v3045_v7 }
0x1964   : > { %6864 = vpow2.f32 %v3049_v33 }
0x1965   : > { %v3219_v13 = vpop.permute.xlu1 %3218 }
0x196e   : > { %v7809_v29 = vpop.eup %6864 }
0x196f   : > { %6215 = vmatmul.mubr.msk.f32.vlgmr.msra.gmra.mrb[28].mxu0 %vm556_vm2, %v7809_v29 }
0x1970   : > { %6218 = vmatpush3.xpose.msk.msra.mxu0 %vm556_vm2, %v3143_v59  ;;  %6219 = vmatprep.mubr.msk.f32.mxu0 %vm6988_vm1, %v6989_v24 }
0x1971   : > { %6523 = vmatprep.subr.bf16.mxu0 %v6987_v16 }
0x1973   : > { %6220 = vmatmul.mubr.msk.f32.vlgmr.msra.gmra.mrb[30].mxu0 %vm556_vm2, %v3141_v3  ;;  %v2735_v3 = vmul.f32 1.442695, %v2734_v53 }
0x1974   : > { %6526 = vmatpush3.bf16.xpose.msk.msra.mxu0 %vm7197_vm3, %v6524_v51  ;;  %6230 = vmatprep.mubr.msk.f32.mxu0 %vm6988_vm1, %v6989_v24 }
0x1975   : > { %6527 = vmatprep.subr.bf16.mxu0 %v6987_v16  ;;  %6866 = vpow2.f32 %v2735_v3  ;;  %v5748_v3 = vld [vmem:[%s8422_s4 + $0x50] sm:$0xff] }
0x1976   : > { %6868 = vpow2.f32 %v3046_v10 }
0x197c   : > { %6530 = vmatpush3.bf16.xpose.msk.msra.mxu0 %vm7197_vm3, %v6528_v11  ;;  %v2424_v11 = vmul.f32 1.442695, %v2423_v55  ;;  %v5749_v55 = vld [vmem:[%s8422_s4 + $0x58] sm:$0xff] }
0x197d   : > { %6537 = vmatprep.subr.bf16.mxu0 %v6987_v16 }
0x197e   : > { %6870 = vpow2.f32 %v2424_v11 }
0x1983   : > { %6231 = vmatmul.mubr.msk.f32.vlgmr.msra.gmra.mrb[32].mxu0 %vm556_vm2, %v3219_v13  ;;  %v6867_v13 = vpop.eup %6866 }
0x1984   : > { %6257 = vmatprep.mubr.msk.f32.mxu0 %vm6988_vm1, %v6989_v24  ;;  %v6869_v20 = vpop.eup %6868 }
0x1988   : > { %v6871_v36 = vpop.eup %6870 }
0x1a42   : > { %v7829_v15 = vpop.f32.mrb[28].mxu0 }
0x1a43   : > { %v6216_v22 = vpop.f32.mrb[29].mxu0 }
0x1a46   : > { %v3214_v17 = vpop.f32.mrb[30].mxu0 }
0x1a47   : > { %v6221_v18 = vpop.f32.mrb[31].mxu0 }
0x1a56   : > { %v3304_v47 = vpop.f32.mrb[32].mxu0 }
0x1a57   : > { %3312 = vrot.lane.b32.xlu1 %v3304_v47, %s8533_s3  ;;  %3309 = vrot.lane.b32.xlu0 %v3304_v47, %s8534_s6  ;;  %v6232_v27 = vpop.f32.mrb[33].mxu0 }
0x1a5b   : > { %3318 = vrot.lane.b32.xlu1 %v3304_v47, %s8529_s0  ;;  %3315 = vrot.lane.b32.xlu0 %v3304_v47, %s8520_s25 }
0x1a5f   : > { %3324 = vrot.lane.b32.xlu1 %v3304_v47, %s8521_s29  ;;  %3321 = vrot.lane.b32.xlu0 %v3304_v47, %s8522_s16 }
0x1a63   : > { %3339 = vrot.lane.b32.xlu1 %v3214_v17, %s8523_s17  ;;  %3327 = vrot.lane.b32.xlu0 %v3304_v47, %s8524_s27 }
0x1ac9   : > { %v3313_v28 = vpop.permute.xlu1 %3312  ;;  %v3310_v30 = vpop.permute.xlu0 %3309 }
0x1aca   : > { %v3330_v25 = vsel %vm739_vm4, %v3304_v47, %v3310_v30 }
0x1acb   : > { %v3331_v41 = vsel %vm741_vm5, %v3330_v25, %v3313_v28 }
0x1acd   : > { %v3319_v39 = vpop.permute.xlu1 %3318  ;;  %v3316_v48 = vpop.permute.xlu0 %3315 }
0x1ace   : > { %v3332_v54 = vsel %vm743_vm6, %v3331_v41, %v3316_v48 }
0x1acf   : > { %v3333_v63 = vsel %vm745_vm7, %v3332_v54, %v3319_v39 }
0x1ad1   : > { %v3325_v58 = vpop.permute.xlu1 %3324  ;;  %v3322_v14 = vpop.permute.xlu0 %3321 }
0x1ad2   : > { %v3334_v38 = vsel %vm747_vm8, %v3333_v63, %v3322_v14  ;;  %v2436_v14 = vsel %vm556_vm2, %v7687_v31, 0.0  ;;  %v5746_v31 = vld [vmem:[%s8422_s4 + $0x40] sm:$0xff] }
0x1ad3   : > { %v3335_v59 = vsel %vm749_vm9, %v3334_v38, %v3325_v58  ;;  %v3058_v58 = vsel %vm556_vm2, %v7809_v29, 0.0 }
0x1ad5   : > { %v3340_v57 = vpop.permute.xlu1 %3339  ;;  %v3328_v60 = vpop.permute.xlu0 %3327 }
0x1ad6   : > { %v3336_v62 = vsel %vm751_vm10, %v3335_v59, %v3328_v60 }
0x1ad7   : > { %v3337_v33 = vmul.f32 0.35355338, %v3336_v62  ;;  %v3342_v2 = vadd.f32 %v3340_v57, %v3336_v62 }
0x1ad9   : > { %v3343_v0 = vmul.f32 0.35355338, %v3342_v2  ;;  %v3349_v51 = vsel %vm765_vm11, %v3337_v33, -inf }
0x1ada   : > { %3350 = vmax.xlane.f32.xlu1 %v3349_v51  ;;  %v5747_v51 = vld [vmem:[%s8422_s4 + $0x48] sm:$0xff] }
0x1adb   : > { %3345 = vrot.lane.b32.xlu0 %v3343_v0, %s8525_s14  ;;  %v6532_v7 = vpack.c.bf16 %v5747_v51, %v5746_v31 }
0x1aeb   : > { %2741 = vrot.lane.b32.xlu1 %v6867_v13, %s8538_s20  ;;  %v6535_v13 = vpack.c.bf16 %v5749_v55, %v5748_v3  ;;  %v3561_v55 = vrot.slane %v7620_v19, %v7530_v32 }
0x1aef   : > { %3052 = vrot.lane.b32.xlu1 %v6869_v20, %s8538_s20 }
0x1af3   : > { %2430 = vrot.lane.b32.xlu1 %v6871_v36, %s8538_s20 }
0x1b17   : > { %2748 = vadd.xlane.f32.xlu1 %v2747_v40 }
0x1b4d   : > { %v3346_v61 = vpop.permute.xlu0 %3345 }
0x1b4e   : > { %v3348_v9 = vsel %vm7319_vm12, %v3346_v61, -1e+30 }
0x1b4f   : > { %v3352_v23 = vsel %vm556_vm2, %v3348_v9, -inf }
0x1b50   : > { %3353 = vmax.xlane.f32.xlu0 %v3352_v23 }
0x1b66   : > { %3374 = vrot.lane.b32.xlu0 %v7611_v45, %s8539_s30 }
0x1b67   : > { %v3351_v22 = vpop.xlane.xlu1 %3350 }
0x1b6b   : > { %v2742_v45 = vpop.permute.xlu1 %2741 }
0x1b6c   : > { %v2744_v41 = vsel %vm783_vm13, %v2742_v45, 0.0 }
0x1b6f   : > { %v3053_v48 = vpop.permute.xlu1 %3052 }
0x1b70   : > { %v3055_v54 = vsel %vm783_vm13, %v3053_v48, 0.0 }
0x1b73   : > { %v2431_v59 = vpop.permute.xlu1 %2430 }
0x1b74   : > { %v2433_v60 = vsel %vm783_vm13, %v2431_v59, 0.0 }
0x1ba4   : > { %v2749_v62 = vpop.xlane.xlu1 %2748 }
0x1bdd   : > { %v3354_v17 = vpop.xlane.xlu0 %3353 }
0x1bde   : > { %v3355_v18 = vmax.f32 %v3351_v22, %v3354_v17 }
0x1be0   : > { %v3356_v47 = vsub.f32 %v3337_v33, %v3355_v18  ;;  %v3359_v27 = vsub.f32 %v3348_v9, %v3355_v18 }
0x1be1   : > { %v3375_v28 = vpop.permute.xlu0 %3374 }
0x1be2   : > { %v3357_v30 = vmul.f32 1.442695, %v3356_v47  ;;  %v3360_v25 = vmul.f32 1.442695, %v3359_v27  ;;  %6234 = vmatpush3.msra.mxu1 %v3375_v28 }
0x1be3   : > { %6531 = vmatprep.subr.bf16.mxu1 %v6987_v16 }
0x1be4   : > { %6872 = vpow2.f32 %v3357_v30 }
0x1be5   : > { %6874 = vpow2.f32 %v3360_v25 }
0x1bee   : > { %v6873_v56 = vpop.eup %6872 }
0x1bef   : > { %v6875_v39 = vpop.eup %6874  ;;  %3363 = vrot.lane.b32.xlu0 %v6873_v56, %s8538_s20  ;;  %s8552_s20 = sld [smem:[#allocation6_spill]] }
0x1bf0   : > { %6236 = vmatmul.mubr.msk.f32.vlgmr.msra.gmra.mrb[26].mxu1 %vm556_vm2, %v6875_v39  ;;  %v3369_v63 = vsel %vm556_vm2, %v6875_v39, 0.0 }
0x1bf1   : > { %6246 = vmatprep.mubr.msk.f32.mxu1 %vm6988_vm1, %v6989_v24  ;;  %6533 = vmatpush3.bf16.msra.mxu1 %v6532_v7 }
0x1bf2   : > { %6534 = vmatprep.subr.bf16.mxu1 %v6987_v16 }
0x1bf5   : > { %6536 = vmatpush3.bf16.msra.mxu1 %v6535_v13  ;;  %v3566_v13 = vrot.slane %v7620_v19, %v7534_v35 }
0x1bf6   : > { %6543 = vmatprep.subr.bf16.mxu1 %v6987_v16 }
0x1c0e   : > { %2745 = vadd.xlane.f32.xlu0 %v2744_v41 }
0x1c12   : > { %3056 = vadd.xlane.f32.xlu0 %v3055_v54 }
0x1c16   : > { %3059 = vadd.xlane.f32.xlu0 %v3058_v58 }
0x1c1a   : > { %3370 = vadd.xlane.f32.xlu0 %v3369_v63 }
0x1c1e   : > { %2437 = vadd.xlane.f32.xlu0 %v2436_v14 }
0x1c61   : > { %v3364_v38 = vpop.permute.xlu0 %3363 }
0x1c62   : > { %v3366_v57 = vsel %vm783_vm13, %v3364_v38, 0.0 }
0x1c63   : > { %3367 = vadd.xlane.f32.xlu1 %v3366_v57 }
0x1c67   : > { %2434 = vadd.xlane.f32.xlu1 %v2433_v60 }
0x1c9b   : > { %v2746_v33 = vpop.xlane.xlu0 %2745 }
0x1c9c   : > { %v2750_v2 = vadd.f32 %v2749_v62, %v2746_v33  ;;  %v6770_v62 = vpack.i.bf16 %v7575_v6, %v7570_v4 }
0x1c9e   : > { %6876 = vrcp.f32 %v2750_v2 }
0x1c9f   : > { %v3057_v29 = vpop.xlane.xlu0 %3056 }
0x1ca3   : > { %v3060_v53 = vpop.xlane.xlu0 %3059 }
0x1ca4   : > { %v3061_v0 = vadd.f32 %v3060_v53, %v3057_v29 }
0x1ca6   : > { %6878 = vrcp.f32 %v3061_v0 }
0x1ca7   : > { %v3371_v9 = vpop.xlane.xlu0 %3370 }
0x1ca8   : > { %v6877_v10 = vpop.eup %6876 }
0x1ca9   : > { %v2828_v11 = vmul.f32 %v6877_v10, %v7768_v1 }
0x1cab   : > { %3452 = vrot.lane.b32.xlu1 %v2828_v11, %s8540_s9  ;;  %v2438_v47 = vpop.xlane.xlu0 %2437  ;;  %s8553_s9 = sld [smem:[#allocation9_spill]] }
0x1cb0   : > { %v6879_v20 = vpop.eup %6878 }
0x1cb1   : > { %v3139_v36 = vmul.f32 %v6879_v20, %v7829_v15 }
0x1cb3   : > { %3456 = vrot.lane.b32.xlu0 %v3139_v36, %s8541_s8 }
0x1cc3   : > { %v3446_v40 = vpop.f32.mrb[26].mxu1 }
0x1cc4   : > { %v6237_v61 = vpop.f32.mrb[27].mxu1 }
0x1cc5   : > { %v5755_v61 = vld [vmem:[%s8422_s4 + $0x78] sm:$0xff] }
0x1cf0   : > { %v3368_v23 = vpop.xlane.xlu1 %3367 }
0x1cf1   : > { %v3372_v22 = vadd.f32 %v3371_v9, %v3368_v23  ;;  %v3571_v23 = vrot.slane %v7620_v19, %v7551_v52 }
0x1cf3   : > { %6880 = vrcp.f32 %v3372_v22 }
0x1cf4   : > { %v2435_v18 = vpop.xlane.xlu1 %2434 }
0x1cf5   : > { %v2439_v27 = vadd.f32 %v2438_v47, %v2435_v18  ;;  %v3669_v47 = vrot.slane %v7620_v19, %v7559_v50 }
0x1cf7   : > { %6882 = vrcp.f32 %v2439_v27 }
0x1cfd   : > { %v6881_v1 = vpop.eup %6880 }
0x1cfe   : > { %v3450_v17 = vmul.f32 %v6881_v1, %v3446_v40  ;;  %v5754_v40 = vld [vmem:[%s8422_s4 + $0x70] sm:$0xff] }
0x1cff   : > { %v6547_v9 = vpack.c.bf16 %v5755_v61, %v5754_v40 }
0x1d00   : > { %3460 = vrot.lane.b32.xlu1 %v3450_v17, %s8542_s7 }
0x1d01   : > { %v6883_v28 = vpop.eup %6882 }
0x1d02   : > { %v2517_v15 = vmul.f32 %v6883_v28, %v7707_v26  ;;  %v6775_v26 = vpack.i.bf16 %v7587_v44, %v7582_v8  ;;  %v5753_v8 = vld [vmem:[%s8422_s4 + $0x68] sm:$0xff] }
0x1d1d   : > { %v3453_v30 = vpop.permute.xlu1 %3452 }
0x1d1e   : > { %v3463_v56 = vsel %vm556_vm2, %v2517_v15, %v3453_v30 }
0x1d25   : > { %v3457_v25 = vpop.permute.xlu0 %3456 }
0x1d26   : > { %v3464_v39 = vsel %vm783_vm13, %v3463_v56, %v3457_v25 }
0x1d72   : > { %v3461_v45 = vpop.permute.xlu1 %3460 }
0x1d73   : > { %v3465_v41 = vsel %vm1816_vm14, %v3464_v39, %v3461_v45 }
0x1d74   : > { %6247 = vmatmul.mubr.msk.f32.vlgmr.msra.gmra.mrb[28].mxu1 %vm330_vm0, %v3465_v41 }
0x1d75   : > { %6268 = vmatprep.mubr.msk.f32.mxu1 %vm6988_vm1, %v6989_v24 }
0x1e47   : > { %v3540_v48 = vpop.f32.mrb[28].mxu1 }
0x1e48   : > { %v3544_v54 = vadd.f32 %v3540_v48, %v7605_v21  ;;  %v6248_v58 = vpop.f32.mrb[29].mxu1  ;;  %v5752_v21 = vld [vmem:[%s8422_s4 + $0x60] sm:$0xff] }
0x1e49   : > { %v6544_v44 = vpack.c.bf16 %v5753_v8, %v5752_v21  ;;  %v7957_v58 = vld [vmem:[%s8420_s2 + $0x48] sm:$0xff] }
0x1e4a   : > { %v3545_v63 = vsel %vm330_vm0, %v3544_v54, 0.0 }
0x1e4b   : > { %3546 = vadd.xlane.f32.xlu1 %v3545_v63  ;;  %6545 = vmatpush3.bf16.msra.mxu1 %v6544_v44  ;;  %v3765_v44 = vrot.slane %v7620_v19, %v7597_v34 }
0x1e4c   : > { %6546 = vmatprep.subr.bf16.mxu1 %v6987_v16 }
0x1e4f   : > { %6548 = vmatpush3.bf16.msra.mxu1 %v6547_v9 }
0x1e50   : > { %6282 = vmatprep.subr.mxu1 %v6989_v24 }
0x1e5c   : > { %6776 = vrot.lane.b32.xlu1 %v6775_v26, %s8543_s10  ;;  %v7964_v26 = vld [vmem:[%s8420_s2 + $0x50] sm:$0xff] }
0x1ed8   : > { %v3547_v14 = vpop.xlane.xlu1 %3546 }
0x1ed9   : > { %v3548_v38 = vmul.f32 0.03125, %v3547_v14  ;;  %v7969_v14 = vld [vmem:[%s8420_s2 + $0x58] sm:$0xff] }
0x1edb   : > { %v3549_v57 = vsub.f32 %v3544_v54, %v3548_v38  ;;  %v7952_v54 = vld [vmem:[%s8420_s2 + $0x40] sm:$0xff]  ;;  %v6553_v38 = vpack.c.bf16 %v7969_v14, %v7964_v26 }
0x1edc   : > { %v6777_v29 = vpop.permute.xlu1 %6776  ;;  %v6550_v63 = vpack.c.bf16 %v7957_v58, %v7952_v54 }
0x1edd   : > { %v3550_v59 = vmul.f32 %v3549_v57, %v3549_v57  ;;  %v6779_v4 = vunpack.i.h.bf16 %v6777_v29  ;;  %v6778_v51 = vunpack.i.l.bf16 %v6777_v29 }
0x1edf   : > { %v3551_v60 = vsel %vm330_vm0, %v3550_v59, 0.0  ;;  %v6541_v7 = vpack.c.bf16 %v6779_v4, %v6778_v51 }
0x1ee0   : > { %3552 = vadd.xlane.f32.xlu0 %v3551_v60 }
0x1ef6   : > { %6771 = vrot.lane.b32.xlu0 %v6770_v62, %s8543_s10  ;;  %v3760_v62 = vrot.slane %v7620_v19, %v7594_v12 }
0x1f6d   : > { %v3553_v33 = vpop.xlane.xlu0 %3552 }
0x1f6e   : > { %v3554_v2 = vmul.f32 0.03125, %v3553_v33 }
0x1f70   : > { %v3555_v53 = vadd.f32 1e-05, %v3554_v2 }
0x1f71   : > { %v6772_v0 = vpop.permute.xlu0 %6771 }
0x1f72   : > { %6884 = vrsqrt.f32 %v3555_v53  ;;  %v6774_v6 = vunpack.i.h.bf16 %v6772_v0  ;;  %v6773_v31 = vunpack.i.l.bf16 %v6772_v0  ;;  %v7992_v0 = vld [vmem:[%s8423_s5 + $0x10] sm:$0xff] }
0x1f73   : > { %v3850_v4 = vrot.slane %v7992_v0, %v7227_v49 }
0x1f74   : > { %v6538_v3 = vpack.c.bf16 %v6774_v6, %v6773_v31 }
0x1f76   : > { %6539 = vmatpush3.bf16.msra.mxu0 %v6538_v3 }
0x1f77   : > { %6540 = vmatprep.subr.bf16.mxu0 %v6987_v16 }
0x1f7a   : > { %6542 = vmatpush3.bf16.msra.mxu0 %v6541_v7 }
0x1f7b   : > { %6549 = vmatprep.subr.bf16.mxu0 %v6987_v16 }
0x1f7c   : > { %v6885_v10 = vpop.eup %6884 }
0x1f7d   : > { %v3557_v11 = vmul.f32 %v6885_v10, %v3549_v57 }
0x1f7f   : > { %v3562_v20 = vmul.f32 %v3561_v55, %v3557_v11 }
0x1f81   : > { %v3567_v36 = vadd.f32 %v3566_v13, %v3562_v20  ;;  %v3855_v13 = vrot.slane %v7992_v0, %v7217_v46 }
0x1f83   : > { %6258 = vmatmul.mubr.msk.f32.vlgmr.msra.gmra.mrb[34].mxu0 %vm330_vm0, %v3567_v36 }
0x1f84   : > { %6279 = vmatprep.mubr.msk.f32.mxu0 %vm6988_vm1, %v6989_v24  ;;  %6551 = vmatpush3.bf16.msra.mxu0 %v6550_v63 }
0x1f85   : > { %6552 = vmatprep.subr.bf16.mxu0 %v6987_v16 }
0x1f88   : > { %6554 = vmatpush3.bf16.msra.mxu0 %v6553_v38 }
0x1f89   : > { %6298 = vmatprep.subr.mxu0 %v6989_v24 }
0x2056   : > { %v3657_v22 = vpop.f32.mrb[34].mxu0 }
0x2057   : > { %v3658_v1 = vadd.f32 %v3657_v22, %v3571_v23  ;;  %v6259_v17 = vpop.f32.mrb[35].mxu0 }
0x2059   : > { %v3661_v18 = vmax.f32 %v3658_v1, 0.0 }
0x205b   : > { %6269 = vmatmul.mubr.msk.f32.vlgmr.msra.gmra.mrb[30].mxu1 %vm330_vm0, %v3661_v18 }
0x205c   : > { %6284 = vmatprep.mubr.msk.f32.mxu1 %vm6988_vm1, %v6989_v24 }
0x212e   : > { %v3739_v27 = vpop.f32.mrb[30].mxu1 }
0x212f   : > { %v3740_v28 = vadd.f32 %v3739_v27, %v3669_v47  ;;  %v6270_v30 = vpop.f32.mrb[31].mxu1 }
0x2131   : > { %v3743_v15 = vadd.f32 %v3740_v28, %v3567_v36 }
0x2133   : > { %v3744_v25 = vsel %vm330_vm0, %v3743_v15, 0.0 }
0x2134   : > { %3745 = vadd.xlane.f32.xlu1 %v3744_v25 }
0x2145   : > { %6781 = vrot.lane.b32.xlu1 %v7207_v42, %s8527_s22 }
0x2149   : > { %6786 = vrot.lane.b32.xlu1 %v7211_v43, %s8527_s22 }
0x21c1   : > { %v3746_v56 = vpop.xlane.xlu1 %3745 }
0x21c2   : > { %v3747_v39 = vmul.f32 0.03125, %v3746_v56 }
0x21c4   : > { %v3748_v45 = vsub.f32 %v3743_v15, %v3747_v39 }
0x21c5   : > { %v6782_v19 = vpop.permute.xlu1 %6781 }
0x21c6   : > { %v3749_v41 = vmul.f32 %v3748_v45, %v3748_v45  ;;  %v6784_v6 = vunpack.i.h.bf16 %v6782_v19  ;;  %v6783_v31 = vunpack.i.l.bf16 %v6782_v19 }
0x21c8   : > { %v3750_v48 = vsel %vm330_vm0, %v3749_v41, 0.0  ;;  %v6556_v7 = vpack.c.bf16 %v6784_v6, %v6783_v31 }
0x21c9   : > { %3751 = vadd.xlane.f32.xlu0 %v3750_v48  ;;  %v6787_v55 = vpop.permute.xlu1 %6786 }
0x21ca   : > { %v6789_v49 = vunpack.i.h.bf16 %v6787_v55  ;;  %v6788_v10 = vunpack.i.l.bf16 %v6787_v55 }
0x21cc   : > { %v6560_v11 = vpack.c.bf16 %v6789_v49, %v6788_v10 }
0x2256   : > { %v3752_v57 = vpop.xlane.xlu0 %3751 }
0x2257   : > { %v3753_v59 = vmul.f32 0.03125, %v3752_v57 }
0x2259   : > { %v3754_v60 = vadd.f32 1e-05, %v3753_v59 }
0x225b   : > { %6886 = vrsqrt.f32 %v3754_v60 }
0x2265   : > { %v6887_v21 = vpop.eup %6886 }
0x2266   : > { %v3756_v8 = vmul.f32 %v6887_v21, %v3748_v45 }
0x2268   : > { %v3761_v33 = vmul.f32 %v3760_v62, %v3756_v8 }
0x226a   : > { %v7979_v2 = vadd.f32 %v3765_v44, %v3761_v33 }
0x226c   : > { %6280 = vmatmul.mubr.msk.f32.vlgmr.msra.gmra.mrb[36].mxu0 %vm330_vm0, %v7979_v2 }
0x226d   : > { %6300 = vmatprep.mubr.msk.f32.mxu0 %vm6988_vm1, %v6989_v24 }
0x233f   : > { %v7985_v29 = vpop.f32.mrb[36].mxu0 }
0x2340   : > { %3858 = vrot.lane.b32.xlu0 %v7985_v29, %s8519_s28  ;;  %v6281_v53 = vpop.f32.mrb[37].mxu0  ;;  %v7998_v3 = vadd.f32 %v3850_v4, %v7985_v29  ;;  %v8014_v20 = vadd.f32 %v3855_v13, %v7985_v29  ;;  %s8547_s28 = smov 24  }
0x23b2   : > { %v3859_v51 = vpop.permute.xlu0 %3858 }
0x23b3   : > { %6283 = vmatpush3.xpose.msk.msra.mxu1 %vm556_vm2, %v3859_v51 }
0x23b4   : > { %6555 = vmatprep.subr.bf16.mxu1 %v6987_v16 }
0x23b6   : > { %6285 = vmatmul.mubr.msk.f32.vlgmr.msra.gmra.mrb[32].mxu1 %vm556_vm2, %v7998_v3 }
0x23b7   : > { %6558 = vmatpush3.bf16.xpose.msk.msra.mxu1 %vm7197_vm3, %v6556_v7  ;;  %6295 = vmatprep.mubr.msk.f32.mxu1 %vm6988_vm1, %v6989_v24 }
0x23b8   : > { %6559 = vmatprep.subr.bf16.mxu1 %v6987_v16 }
0x23bf   : > { %6562 = vmatpush3.bf16.xpose.msk.msra.mxu1 %vm7197_vm3, %v6560_v11 }
0x23c0   : > { %6319 = vmatprep.subr.mxu1 %v6989_v24 }
0x23c6   : > { %6296 = vmatmul.mubr.msk.f32.vlgmr.msra.gmra.mrb[34].mxu1 %vm556_vm2, %v8014_v20 }
0x23c7   : > { %6321 = vmatprep.mubr.msk.f32.mxu1 %vm6988_vm1, %v6989_v24 }
0x2489   : > { %v3931_v36 = vpop.f32.mrb[32].mxu1 }
0x248a   : > { %v6286_v40 = vpop.f32.mrb[33].mxu1 }
0x2499   : > { %v4020_v61 = vpop.f32.mrb[34].mxu1 }
0x249a   : > { %4028 = vrot.lane.b32.xlu1 %v4020_v61, %s8533_s3  ;;  %4025 = vrot.lane.b32.xlu0 %v4020_v61, %s8534_s6  ;;  %v6297_v9 = vpop.f32.mrb[35].mxu1 }
0x249e   : > { %4034 = vrot.lane.b32.xlu1 %v4020_v61, %s8529_s0  ;;  %4031 = vrot.lane.b32.xlu0 %v4020_v61, %s8520_s25 }
0x24a2   : > { %4040 = vrot.lane.b32.xlu1 %v4020_v61, %s8521_s29  ;;  %4037 = vrot.lane.b32.xlu0 %v4020_v61, %s8522_s16 }
0x24a6   : > { %4055 = vrot.lane.b32.xlu1 %v3931_v36, %s8523_s17  ;;  %4043 = vrot.lane.b32.xlu0 %v4020_v61, %s8524_s27 }
0x250c   : > { %v4029_v46 = vpop.permute.xlu1 %4028  ;;  %v4026_v23 = vpop.permute.xlu0 %4025 }
0x250d   : > { %v4046_v22 = vsel %vm739_vm4, %v4020_v61, %v4026_v23 }
0x250e   : > { %v4047_v17 = vsel %vm741_vm5, %v4046_v22, %v4029_v46 }
0x2510   : > { %v4035_v1 = vpop.permute.xlu1 %4034  ;;  %v4032_v18 = vpop.permute.xlu0 %4031 }
0x2511   : > { %v4048_v47 = vsel %vm743_vm6, %v4047_v17, %v4032_v18 }
0x2512   : > { %v4049_v28 = vsel %vm745_vm7, %v4048_v47, %v4035_v1 }
0x2514   : > { %v4041_v27 = vpop.permute.xlu1 %4040  ;;  %v4038_v30 = vpop.permute.xlu0 %4037 }
0x2515   : > { %v4050_v15 = vsel %vm747_vm8, %v4049_v28, %v4038_v30 }
0x2516   : > { %v4051_v56 = vsel %vm749_vm9, %v4050_v15, %v4041_v27 }
0x2518   : > { %v4056_v25 = vpop.permute.xlu1 %4055  ;;  %v4044_v39 = vpop.permute.xlu0 %4043 }
0x2519   : > { %v4052_v45 = vsel %vm751_vm10, %v4051_v56, %v4044_v39 }
0x251a   : > { %v8035_v41 = vmul.f32 0.35355338, %v4052_v45  ;;  %v4058_v48 = vadd.f32 %v4056_v25, %v4052_v45 }
0x251c   : > { %v4059_v63 = vmul.f32 0.35355338, %v4058_v48  ;;  %v4065_v38 = vsel %vm765_vm11, %v8035_v41, -inf }
0x251d   : > { %4066 = vmax.xlane.f32.xlu1 %v4065_v38 }
0x251e   : > { %4061 = vrot.lane.b32.xlu0 %v4059_v63, %s8525_s14 }
0x252e   : > { %4169 = vrot.lane.b32.xlu1 %v7985_v29, %s8526_s21 }
0x2532   : > { %6791 = vrot.lane.b32.xlu1 %v7207_v42, %s8531_s26 }
0x2536   : > { %6796 = vrot.lane.b32.xlu1 %v7211_v43, %s8531_s26 }
0x2590   : > { %v4062_v57 = vpop.permute.xlu0 %4061 }
0x2591   : > { %v4064_v59 = vsel %vm7319_vm12, %v4062_v57, -1e+30 }
0x2592   : > { %v4068_v60 = vsel %vm556_vm2, %v4064_v59, -inf }
0x2593   : > { %4069 = vmax.xlane.f32.xlu0 %v4068_v60 }
0x25a9   : > { %4090 = vrot.lane.b32.xlu0 %v7985_v29, %s8527_s22 }
0x25aa   : > { %v4067_v62 = vpop.xlane.xlu1 %4066 }
0x25ad   : > { %4167 = vrot.lane.b32.xlu0 %v7998_v3, %s8528_s23 }
0x25ae   : > { %v4170_v19 = vpop.permute.xlu1 %4169 }
0x25b1   : > { %4245 = vrot.lane.b32.xlu0 %v8014_v20, %s8528_s23 }
0x25b2   : > { %v6792_v4 = vpop.permute.xlu1 %6791 }
0x25b3   : > { %v6794_v31 = vunpack.i.h.bf16 %v6792_v4  ;;  %v6793_v51 = vunpack.i.l.bf16 %v6792_v4 }
0x25b5   : > { %v6564_v7 = vpack.c.bf16 %v6794_v31, %v6793_v51 }
0x25b6   : > { %v6797_v49 = vpop.permute.xlu1 %6796 }
0x25b7   : > { %v6799_v10 = vunpack.i.h.bf16 %v6797_v49  ;;  %v6798_v11 = vunpack.i.l.bf16 %v6797_v49 }
0x25b9   : > { %v6568_v13 = vpack.c.bf16 %v6799_v10, %v6798_v11 }
0x2620   : > { %v4070_v21 = vpop.xlane.xlu0 %4069 }
0x2621   : > { %v8055_v8 = vmax.f32 %v4067_v62, %v4070_v21 }
0x2623   : > { %v4075_v44 = vsub.f32 %v4064_v59, %v8055_v8 }
0x2624   : > { %v4091_v33 = vpop.permute.xlu0 %4090 }
0x2625   : > { %v4076_v53 = vmul.f32 1.442695, %v4075_v44  ;;  %6299 = vmatpush3.msra.mxu0 %v4091_v33 }
0x2626   : > { %6303 = vmatprep.subr.mxu0 %v6989_v24 }
0x2627   : > { %6888 = vpow2.f32 %v4076_v53 }
0x2628   : > { %v4168_v55 = vpop.permute.xlu0 %4167 }
0x262c   : > { %v4246_v36 = vpop.permute.xlu0 %4245 }
0x2631   : > { %v8059_v6 = vpop.eup %6888 }
0x2632   : > { %6301 = vmatmul.mubr.msk.f32.vlgmr.msra.gmra.mrb[38].mxu0 %vm556_vm2, %v8059_v6 }
0x2633   : > { %6304 = vmatpush3.xpose.msk.msra.mxu0 %vm556_vm2, %v4170_v19  ;;  %6305 = vmatprep.mubr.msk.f32.mxu0 %vm6988_vm1, %v6989_v24 }
0x2634   : > { %6563 = vmatprep.subr.bf16.mxu0 %v6987_v16 }
0x2636   : > { %6306 = vmatmul.mubr.msk.f32.vlgmr.msra.gmra.mrb[40].mxu0 %vm556_vm2, %v4168_v55 }
0x2637   : > { %6566 = vmatpush3.bf16.xpose.msk.msra.mxu0 %vm7197_vm3, %v6564_v7  ;;  %6316 = vmatprep.mubr.msk.f32.mxu0 %vm6988_vm1, %v6989_v24 }
0x2638   : > { %6567 = vmatprep.subr.bf16.mxu0 %v6987_v16 }
0x263f   : > { %6570 = vmatpush3.bf16.xpose.msk.msra.mxu0 %vm7197_vm3, %v6568_v13 }
0x2640   : > { %6340 = vmatprep.subr.mxu0 %v6989_v24 }
0x2646   : > { %6317 = vmatmul.mubr.msk.f32.vlgmr.msra.gmra.mrb[42].mxu0 %vm556_vm2, %v4246_v36 }
0x2647   : > { %6342 = vmatprep.mubr.msk.f32.mxu0 %vm6988_vm1, %v6989_v24 }
0x2705   : > { %v8079_v40 = vpop.f32.mrb[38].mxu0 }
0x2706   : > { %v6302_v61 = vpop.f32.mrb[39].mxu0 }
0x2709   : > { %v4241_v9 = vpop.f32.mrb[40].mxu0 }
0x270a   : > { %v6307_v46 = vpop.f32.mrb[41].mxu0 }
0x2719   : > { %v4331_v23 = vpop.f32.mrb[42].mxu0 }
0x271a   : > { %4339 = vrot.lane.b32.xlu0 %v4331_v23, %s8533_s3  ;;  %4336 = vrot.lane.b32.xlu1 %v4331_v23, %s8534_s6  ;;  %v6318_v22 = vpop.f32.mrb[43].mxu0 }
0x271e   : > { %4345 = vrot.lane.b32.xlu0 %v4331_v23, %s8529_s0  ;;  %4342 = vrot.lane.b32.xlu1 %v4331_v23, %s8520_s25 }
0x2722   : > { %4351 = vrot.lane.b32.xlu0 %v4331_v23, %s8521_s29  ;;  %4348 = vrot.lane.b32.xlu1 %v4331_v23, %s8522_s16 }
0x2726   : > { %4366 = vrot.lane.b32.xlu0 %v4241_v9, %s8523_s17  ;;  %4354 = vrot.lane.b32.xlu1 %v4331_v23, %s8524_s27 }
0x278c   : > { %v4340_v1 = vpop.permute.xlu0 %4339  ;;  %v4337_v17 = vpop.permute.xlu1 %4336 }
0x278d   : > { %v4357_v18 = vsel %vm739_vm4, %v4331_v23, %v4337_v17 }
0x278e   : > { %v4358_v27 = vsel %vm741_vm5, %v4357_v18, %v4340_v1 }
0x2790   : > { %v4346_v47 = vpop.permute.xlu0 %4345  ;;  %v4343_v28 = vpop.permute.xlu1 %4342 }
0x2791   : > { %v4359_v30 = vsel %vm743_vm6, %v4358_v27, %v4343_v28 }
0x2792   : > { %v4360_v25 = vsel %vm745_vm7, %v4359_v30, %v4346_v47 }
0x2794   : > { %v4352_v15 = vpop.permute.xlu0 %4351  ;;  %v4349_v56 = vpop.permute.xlu1 %4348 }
0x2795   : > { %v4361_v39 = vsel %vm747_vm8, %v4360_v25, %v4349_v56 }
0x2796   : > { %v4362_v48 = vsel %vm749_vm9, %v4361_v39, %v4352_v15 }
0x2798   : > { %v4367_v45 = vpop.permute.xlu0 %4366  ;;  %v4355_v63 = vpop.permute.xlu1 %4354 }
0x2799   : > { %v4363_v38 = vsel %vm751_vm10, %v4362_v48, %v4355_v63 }
0x279a   : > { %v8096_v57 = vmul.f32 0.35355338, %v4363_v38  ;;  %v4369_v59 = vadd.f32 %v4367_v45, %v4363_v38 }
0x279c   : > { %v4370_v60 = vmul.f32 0.35355338, %v4369_v59  ;;  %v4376_v62 = vsel %vm765_vm11, %v8096_v57, -inf }
0x279d   : > { %4377 = vmax.xlane.f32.xlu0 %v4376_v62 }
0x279e   : > { %4372 = vrot.lane.b32.xlu1 %v4370_v60, %s8525_s14 }
0x27a2   : > { %4480 = vrot.lane.b32.xlu1 %v7985_v29, %s8530_s24  ;;  %s8545_s24 = smov 8  }
0x27b3   : > { %4401 = vrot.lane.b32.xlu0 %v7985_v29, %s8531_s26  ;;  %s8546_s26 = smov 16  }
0x27b7   : > { %6801 = vrot.lane.b32.xlu0 %v7207_v42, %s8536_s11 }
0x27bb   : > { %6806 = vrot.lane.b32.xlu0 %v7211_v43, %s8536_s11 }
0x2810   : > { %v4373_v21 = vpop.permute.xlu1 %4372 }
0x2811   : > { %v4375_v44 = vsel %vm7319_vm12, %v4373_v21, -1e+30 }
0x2812   : > { %v4379_v33 = vsel %vm556_vm2, %v4375_v44, -inf }
0x2813   : > { %4380 = vmax.xlane.f32.xlu1 %v4379_v33 }
0x2814   : > { %v4481_v4 = vpop.permute.xlu1 %4480 }
0x2824   : > { %4478 = vrot.lane.b32.xlu1 %v7998_v3, %s8532_s1 }
0x2828   : > { %4556 = vrot.lane.b32.xlu1 %v8014_v20, %s8532_s1  ;;  %s5808_s1 = sshll.u32 %s8553_s9, 4 }
0x282a   : > { %v4378_v53 = vpop.xlane.xlu0 %4377 }
0x282e   : > { %v4402_v19 = vpop.permute.xlu0 %4401 }
0x282f   : > { %6320 = vmatpush3.msra.mxu1 %v4402_v19 }
0x2830   : > { %6324 = vmatprep.subr.mxu1 %v6989_v24 }
0x2832   : > { %v6802_v49 = vpop.permute.xlu0 %6801 }
0x2833   : > { %v6804_v11 = vunpack.i.h.bf16 %v6802_v49  ;;  %v6803_v13 = vunpack.i.l.bf16 %v6802_v49 }
0x2835   : > { %v6572_v36 = vpack.c.bf16 %v6804_v11, %v6803_v13 }
0x2836   : > { %v6807_v9 = vpop.permute.xlu0 %6806 }
0x2837   : > { %v6809_v46 = vunpack.i.h.bf16 %v6807_v9  ;;  %v6808_v23 = vunpack.i.l.bf16 %v6807_v9 }
0x2839   : > { %v6576_v22 = vpack.c.bf16 %v6809_v46, %v6808_v23 }
0x28a0   : > { %v4381_v31 = vpop.xlane.xlu1 %4380 }
0x28a1   : > { %v8117_v51 = vmax.f32 %v4378_v53, %v4381_v31 }
0x28a3   : > { %v4386_v7 = vsub.f32 %v4375_v44, %v8117_v51 }
0x28a4   : > { %v4479_v61 = vpop.permute.xlu1 %4478 }
0x28a5   : > { %v4387_v55 = vmul.f32 1.442695, %v4386_v7 }
0x28a7   : > { %6890 = vpow2.f32 %v4387_v55 }
0x28a8   : > { %v4557_v1 = vpop.permute.xlu1 %4556 }
0x28b1   : > { %v8120_v10 = vpop.eup %6890 }
0x28b2   : > { %6322 = vmatmul.mubr.msk.f32.vlgmr.msra.gmra.mrb[36].mxu1 %vm556_vm2, %v8120_v10 }
0x28b3   : > { %6325 = vmatpush3.xpose.msk.msra.mxu1 %vm556_vm2, %v4481_v4  ;;  %6326 = vmatprep.mubr.msk.f32.mxu1 %vm6988_vm1, %v6989_v24 }
0x28b4   : > { %6571 = vmatprep.subr.bf16.mxu1 %v6987_v16 }
0x28b6   : > { %6327 = vmatmul.mubr.msk.f32.vlgmr.msra.gmra.mrb[38].mxu1 %vm556_vm2, %v4479_v61 }
0x28b7   : > { %6574 = vmatpush3.bf16.xpose.msk.msra.mxu1 %vm7197_vm3, %v6572_v36  ;;  %6337 = vmatprep.mubr.msk.f32.mxu1 %vm6988_vm1, %v6989_v24 }
0x28b8   : > { %6575 = vmatprep.subr.bf16.mxu1 %v6987_v16 }
0x28bf   : > { %6578 = vmatpush3.bf16.xpose.msk.msra.mxu1 %vm7197_vm3, %v6576_v22 }
0x28c0   : > { %6361 = vmatprep.subr.mxu1 %v6989_v24 }
0x28c6   : > { %6338 = vmatmul.mubr.msk.f32.vlgmr.msra.gmra.mrb[40].mxu1 %vm556_vm2, %v4557_v1 }
0x28c7   : > { %6363 = vmatprep.mubr.msk.f32.mxu1 %vm6988_vm1, %v6989_v24 }
0x2985   : > { %v8140_v17 = vpop.f32.mrb[36].mxu1 }
0x2986   : > { %v6323_v18 = vpop.f32.mrb[37].mxu1 }
0x2989   : > { %v4552_v47 = vpop.f32.mrb[38].mxu1 }
0x298a   : > { %v6328_v27 = vpop.f32.mrb[39].mxu1 }
0x2999   : > { %v4642_v28 = vpop.f32.mrb[40].mxu1 }
0x299a   : > { %4650 = vrot.lane.b32.xlu1 %v4642_v28, %s8533_s3  ;;  %4647 = vrot.lane.b32.xlu0 %v4642_v28, %s8534_s6  ;;  %v6339_v30 = vpop.f32.mrb[41].mxu1 }
0x299e   : > { %4656 = vrot.lane.b32.xlu1 %v4642_v28, %s8529_s0  ;;  %4653 = vrot.lane.b32.xlu0 %v4642_v28, %s8520_s25 }
0x29a2   : > { %4662 = vrot.lane.b32.xlu1 %v4642_v28, %s8521_s29  ;;  %4659 = vrot.lane.b32.xlu0 %v4642_v28, %s8522_s16 }
0x29a6   : > { %4677 = vrot.lane.b32.xlu1 %v4552_v47, %s8523_s17  ;;  %4665 = vrot.lane.b32.xlu0 %v4642_v28, %s8524_s27 }
0x2a0c   : > { %v4651_v15 = vpop.permute.xlu1 %4650  ;;  %v4648_v25 = vpop.permute.xlu0 %4647 }
0x2a0d   : > { %v4668_v56 = vsel %vm739_vm4, %v4642_v28, %v4648_v25 }
0x2a0e   : > { %v4669_v45 = vsel %vm741_vm5, %v4668_v56, %v4651_v15 }
0x2a10   : > { %v4657_v39 = vpop.permute.xlu1 %4656  ;;  %v4654_v48 = vpop.permute.xlu0 %4653 }
0x2a11   : > { %v4670_v63 = vsel %vm743_vm6, %v4669_v45, %v4654_v48 }
0x2a12   : > { %v4671_v59 = vsel %vm745_vm7, %v4670_v63, %v4657_v39 }
0x2a14   : > { %v4663_v38 = vpop.permute.xlu1 %4662  ;;  %v4660_v60 = vpop.permute.xlu0 %4659 }
0x2a15   : > { %v4672_v62 = vsel %vm747_vm8, %v4671_v59, %v4660_v60 }
0x2a16   : > { %v4673_v44 = vsel %vm749_vm9, %v4672_v62, %v4663_v38 }
0x2a18   : > { %v4678_v21 = vpop.permute.xlu1 %4677  ;;  %v4666_v33 = vpop.permute.xlu0 %4665 }
0x2a19   : > { %v4674_v53 = vsel %vm751_vm10, %v4673_v44, %v4666_v33 }
0x2a1a   : > { %v8157_v19 = vmul.f32 0.35355338, %v4674_v53  ;;  %v4680_v4 = vadd.f32 %v4678_v21, %v4674_v53 }
0x2a1c   : > { %v4681_v31 = vmul.f32 0.35355338, %v4680_v4  ;;  %v4687_v7 = vsel %vm765_vm11, %v8157_v19, -inf }
0x2a1d   : > { %4688 = vmax.xlane.f32.xlu1 %v4687_v7 }
0x2a1e   : > { %4683 = vrot.lane.b32.xlu0 %v4681_v31, %s8525_s14 }
0x2a2e   : > { %4791 = vrot.lane.b32.xlu1 %v7985_v29, %s8535_s18  ;;  %s8555_s18 = sld [smem:[#allocation20_spill]] }
0x2a32   : > { %6811 = vrot.lane.b32.xlu1 %v7207_v42, %s8539_s30 }
0x2a34   : > { %s8375_s23 = scalar_lea.hbm %s8555_s18, %s5808_s1 }
0x2a36   : > { %6816 = vrot.lane.b32.xlu1 %v7211_v43, %s8539_s30 }
0x2a90   : > { %v4684_v55 = vpop.permute.xlu0 %4683 }
0x2a91   : > { %v4686_v49 = vsel %vm7319_vm12, %v4684_v55, -1e+30 }
0x2a92   : > { %v4690_v11 = vsel %vm556_vm2, %v4686_v49, -inf }
0x2a93   : > { %4691 = vmax.xlane.f32.xlu0 %v4690_v11 }
0x2aa9   : > { %4712 = vrot.lane.b32.xlu0 %v7985_v29, %s8536_s11 }
0x2aaa   : > { %v4689_v42 = vpop.xlane.xlu1 %4688 }
0x2aad   : > { %4789 = vrot.lane.b32.xlu0 %v7998_v3, %s8537_s15 }
0x2aae   : > { %v4792_v46 = vpop.permute.xlu1 %4791 }
0x2ab1   : > { %4867 = vrot.lane.b32.xlu0 %v8014_v20, %s8537_s15 }
0x2ab2   : > { %v6812_v23 = vpop.permute.xlu1 %6811 }
0x2ab3   : > { %v6814_v3 = vunpack.i.h.bf16 %v6812_v23  ;;  %v6813_v1 = vunpack.i.l.bf16 %v6812_v23 }
0x2ab5   : > { %v6580_v20 = vpack.c.bf16 %v6814_v3, %v6813_v1 }
0x2ab6   : > { %v6817_v47 = vpop.permute.xlu1 %6816 }
0x2ab7   : > { %v6819_v27 = vunpack.i.h.bf16 %v6817_v47  ;;  %v6818_v28 = vunpack.i.l.bf16 %v6817_v47 }
0x2ab9   : > { %v6584_v30 = vpack.c.bf16 %v6819_v27, %v6818_v28 }
0x2b20   : > { %v4692_v13 = vpop.xlane.xlu0 %4691 }
0x2b21   : > { %v8177_v36 = vmax.f32 %v4689_v42, %v4692_v13 }
0x2b23   : > { %v4697_v43 = vsub.f32 %v4686_v49, %v8177_v36 }
0x2b24   : > { %v4713_v61 = vpop.permute.xlu0 %4712 }
0x2b25   : > { %v4698_v9 = vmul.f32 1.442695, %v4697_v43  ;;  %6341 = vmatpush3.msra.mxu0 %v4713_v61 }
0x2b26   : > { %6345 = vmatprep.subr.mxu0 %v6989_v24 }
0x2b27   : > { %6892 = vpow2.f32 %v4698_v9  ;;  %v4694_v9 = vsub.f32 %v8157_v19, %v8177_v36 }
0x2b28   : > { %v4790_v18 = vpop.permute.xlu0 %4789 }
0x2b29   : > { %v4695_v23 = vmul.f32 1.442695, %v4694_v9 }
0x2b2b   : > { %6894 = vpow2.f32 %v4695_v23 }
0x2b2c   : > { %v4868_v15 = vpop.permute.xlu0 %4867 }
0x2b31   : > { %v8181_v22 = vpop.eup %6892 }
0x2b32   : > { %6343 = vmatmul.mubr.msk.f32.vlgmr.msra.gmra.mrb[44].mxu0 %vm556_vm2, %v8181_v22 }
0x2b33   : > { %6346 = vmatpush3.xpose.msk.msra.mxu0 %vm556_vm2, %v4792_v46  ;;  %6347 = vmatprep.mubr.msk.f32.mxu0 %vm6988_vm1, %v6989_v24  ;;  %v4072_v46 = vsub.f32 %v8035_v41, %v8055_v8  ;;  %v4383_v41 = vsub.f32 %v8096_v57, %v8117_v51 }
0x2b34   : > { %6579 = vmatprep.subr.bf16.mxu0 %v6987_v16 }
0x2b35   : > { %v4073_v3 = vmul.f32 1.442695, %v4072_v46  ;;  %v6895_v1 = vpop.eup %6894 }
0x2b36   : > { %6348 = vmatmul.mubr.msk.f32.vlgmr.msra.gmra.mrb[46].mxu0 %vm556_vm2, %v4790_v18  ;;  %v4396_v18 = vsel %vm556_vm2, %v8120_v10, 0.0 }
0x2b37   : > { %6582 = vmatpush3.bf16.xpose.msk.msra.mxu0 %vm7197_vm3, %v6580_v20  ;;  %6358 = vmatprep.mubr.msk.f32.mxu0 %vm6988_vm1, %v6989_v24  ;;  %6896 = vpow2.f32 %v4073_v3 }
0x2b38   : > { %6583 = vmatprep.subr.bf16.mxu0 %v6987_v16 }
0x2b3f   : > { %6586 = vmatpush3.bf16.xpose.msk.msra.mxu0 %vm7197_vm3, %v6584_v30 }
0x2b40   : > { %6593 = vmatprep.subr.bf16.mxu0 %v6987_v16 }
0x2b41   : > { %v6897_v20 = vpop.eup %6896 }
0x2b46   : > { %6359 = vmatmul.mubr.msk.f32.vlgmr.msra.gmra.mrb[48].mxu0 %vm556_vm2, %v4868_v15 }
0x2b47   : > { %6385 = vmatprep.mubr.msk.f32.mxu0 %vm6988_vm1, %v6989_v24 }
0x2c05   : > { %v8201_v25 = vpop.f32.mrb[44].mxu0 }
0x2c06   : > { %v6344_v56 = vpop.f32.mrb[45].mxu0 }
0x2c09   : > { %v4863_v39 = vpop.f32.mrb[46].mxu0 }
0x2c0a   : > { %v6349_v45 = vpop.f32.mrb[47].mxu0 }
0x2c19   : > { %v4953_v48 = vpop.f32.mrb[48].mxu0 }
0x2c1a   : > { %4961 = vrot.lane.b32.xlu0 %v4953_v48, %s8533_s3  ;;  %4958 = vrot.lane.b32.xlu1 %v4953_v48, %s8534_s6  ;;  %v6360_v37 = vpop.f32.mrb[49].mxu0 }
0x2c1e   : > { %4967 = vrot.lane.b32.xlu0 %v4953_v48, %s8529_s0  ;;  %4964 = vrot.lane.b32.xlu1 %v4953_v48, %s8520_s25  ;;  %s8544_s0 = smov 121   ;;  %s8548_s25 = smov 32  }
0x2c22   : > { %4973 = vrot.lane.b32.xlu0 %v4953_v48, %s8521_s29  ;;  %4970 = vrot.lane.b32.xlu1 %v4953_v48, %s8522_s16 }
0x2c26   : > { %4988 = vrot.lane.b32.xlu0 %v4863_v39, %s8523_s17  ;;  %4976 = vrot.lane.b32.xlu1 %v4953_v48, %s8524_s27 }
0x2c8c   : > { %v4962_v63 = vpop.permute.xlu0 %4961  ;;  %v4959_v38 = vpop.permute.xlu1 %4958 }
0x2c8d   : > { %v4979_v59 = vsel %vm739_vm4, %v4953_v48, %v4959_v38  ;;  %v4707_v38 = vsel %vm556_vm2, %v8181_v22, 0.0 }
0x2c8e   : > { %v4980_v62 = vsel %vm741_vm5, %v4979_v59, %v4962_v63 }
0x2c90   : > { %v4968_v60 = vpop.permute.xlu0 %4967  ;;  %v4965_v21 = vpop.permute.xlu1 %4964 }
0x2c91   : > { %v4981_v44 = vsel %vm743_vm6, %v4980_v62, %v4965_v21 }
0x2c92   : > { %v4982_v53 = vsel %vm745_vm7, %v4981_v44, %v4968_v60  ;;  %v4085_v60 = vsel %vm556_vm2, %v8059_v6, 0.0  ;;  %v5795_v6 = vld [vmem:[%s8422_s4 + $0x80] sm:$0xff] }
0x2c94   : > { %v4974_v33 = vpop.permute.xlu0 %4973  ;;  %v4971_v4 = vpop.permute.xlu1 %4970 }
0x2c95   : > { %v4983_v31 = vsel %vm747_vm8, %v4982_v53, %v4971_v4 }
0x2c96   : > { %v4984_v55 = vsel %vm749_vm9, %v4983_v31, %v4974_v33 }
0x2c98   : > { %v4989_v7 = vpop.permute.xlu0 %4988  ;;  %v4977_v49 = vpop.permute.xlu1 %4976 }
0x2c99   : > { %v4985_v11 = vsel %vm751_vm10, %v4984_v55, %v4977_v49  ;;  %v5796_v49 = vld [vmem:[%s8422_s4 + $0x88] sm:$0xff] }
0x2c9a   : > { %v4986_v42 = vmul.f32 0.35355338, %v4985_v11  ;;  %v4991_v13 = vadd.f32 %v4989_v7, %v4985_v11  ;;  %v5797_v11 = vld [vmem:[%s8422_s4 + $0x90] sm:$0xff] }
0x2c9c   : > { %v4992_v43 = vmul.f32 0.35355338, %v4991_v13  ;;  %v4998_v61 = vsel %vm765_vm11, %v4986_v42, -inf  ;;  %v5798_v13 = vld [vmem:[%s8422_s4 + $0x98] sm:$0xff] }
0x2c9d   : > { %4999 = vmax.xlane.f32.xlu0 %v4998_v61 }
0x2c9e   : > { %4994 = vrot.lane.b32.xlu1 %v4992_v43, %s8525_s14  ;;  %v6591_v43 = vpack.c.bf16 %v5798_v13, %v5797_v11  ;;  %v5803_v13 = vld [vmem:[%s8422_s4 + $0xb0] sm:$0xff] }
0x2cb3   : > { %5023 = vrot.lane.b32.xlu0 %v7985_v29, %s8539_s30  ;;  %v4384_v29 = vmul.f32 1.442695, %v4383_v41  ;;  %s8550_s30 = sld [smem:[#allocation19_spill]] }
0x2cb5   : > { %6898 = vpow2.f32 %v4384_v29 }
0x2cb7   : > { %4701 = vrot.lane.b32.xlu0 %v6895_v1, %s8544_s0 }
0x2cb9   : > { %s8551_s15 = smov %s8550_s30 }
0x2cbb   : > { %4079 = vrot.lane.b32.xlu0 %v6897_v20, %s8544_s0 }
0x2cbf   : > { %v6899_v47 = vpop.eup %6898 }
0x2cda   : > { %4397 = vadd.xlane.f32.xlu0 %v4396_v18 }
0x2d10   : > { %v4995_v19 = vpop.permute.xlu1 %4994 }
0x2d11   : > { %v4997_v8 = vsel %vm7319_vm12, %v4995_v19, -1e+30 }
0x2d12   : > { %v5001_v36 = vsel %vm556_vm2, %v4997_v8, -inf }
0x2d13   : > { %5002 = vmax.xlane.f32.xlu1 %v5001_v36 }
0x2d24   : > { %4390 = vrot.lane.b32.xlu1 %v6899_v47, %s8544_s0 }
0x2d2a   : > { %v5000_v27 = vpop.xlane.xlu0 %4999 }
0x2d2e   : > { %v5024_v28 = vpop.permute.xlu0 %5023 }
0x2d2f   : > { %6362 = vmatpush3.msra.mxu1 %v5024_v28 }
0x2d30   : > { %6587 = vmatprep.subr.bf16.mxu1 %v6987_v16 }
0x2d32   : > { %v4702_v10 = vpop.permute.xlu0 %4701 }
0x2d33   : > { %v4704_v30 = vsel %vm783_vm13, %v4702_v10, 0.0 }
0x2d34   : > { %4705 = vadd.xlane.f32.xlu0 %v4704_v30 }
0x2d36   : > { %v4080_v44 = vpop.permute.xlu0 %4079 }
0x2d37   : > { %v4082_v33 = vsel %vm783_vm13, %v4080_v44, 0.0 }
0x2d67   : > { %v4398_v53 = vpop.xlane.xlu0 %4397 }
0x2da0   : > { %v5003_v57 = vpop.xlane.xlu1 %5002 }
0x2da1   : > { %v5004_v5 = vmax.f32 %v5000_v27, %v5003_v57 }
0x2da3   : > { %v5005_v51 = vsub.f32 %v4986_v42, %v5004_v5  ;;  %v5008_v15 = vsub.f32 %v4997_v8, %v5004_v5  ;;  %v6588_v42 = vpack.c.bf16 %v5796_v49, %v5795_v6  ;;  %v5215_v49 = vrot.slane %v7992_v0, %v7534_v35 }
0x2da4   : > { %v4391_v37 = vpop.permute.xlu1 %4390  ;;  %v5220_v35 = vrot.slane %v7992_v0, %v7551_v52 }
0x2da5   : > { %v5006_v56 = vmul.f32 1.442695, %v5005_v51  ;;  %v5009_v39 = vmul.f32 1.442695, %v5008_v15  ;;  %v4393_v63 = vsel %vm783_vm13, %v4391_v37, 0.0 }
0x2da7   : > { %6900 = vpow2.f32 %v5006_v56 }
0x2da8   : > { %6902 = vpow2.f32 %v5009_v39 }
0x2db1   : > { %v6901_v45 = vpop.eup %6900 }
0x2db2   : > { %v6903_v48 = vpop.eup %6902  ;;  %5012 = vrot.lane.b32.xlu1 %v6901_v45, %s8544_s0  ;;  %s321_s0 = sand.u32 1, %s8552_s20  }
0x2db3   : > { %6364 = vmatmul.mubr.msk.f32.vlgmr.msra.gmra.mrb[42].mxu1 %vm556_vm2, %v6903_v48  ;;  %v5018_v59 = vsel %vm556_vm2, %v6903_v48, 0.0  ;;  %s322_s3 = scalar_lea.vmem [#allocation2], %s321_s0 }
0x2db4   : > { %6374 = vmatprep.mubr.msk.f32.mxu1 %vm6988_vm1, %v6989_v24  ;;  %6589 = vmatpush3.bf16.msra.mxu1 %v6588_v42  ;;  %s5606_s6 = sshll.u32 %s322_s3, 4  ;;  %s8377_s6 = int_to_ptr.vmem [resolvable:$true] %s5606_s6 }
0x2db5   : > { %6590 = vmatprep.subr.bf16.mxu1 %v6987_v16 }
0x2db8   : > { %6592 = vmatpush3.bf16.msra.mxu1 %v6591_v43 }
0x2db9   : > { %6599 = vmatprep.subr.bf16.mxu1 %v6987_v16 }
0x2dc1   : > { %v4706_v22 = vpop.xlane.xlu0 %4705 }
0x2dd6   : > { %4394 = vadd.xlane.f32.xlu1 %v4393_v63 }
0x2dda   : > { %4708 = vadd.xlane.f32.xlu1 %v4707_v38 }
0x2dde   : > { %5019 = vadd.xlane.f32.xlu1 %v5018_v59  ;;  %v6825_v59 = vpack.i.bf16 %v7969_v14, %v7964_v26 }
0x2de2   : > { %4086 = vadd.xlane.f32.xlu1 %v4085_v60 }
0x2e24   : > { %v5013_v62 = vpop.permute.xlu1 %5012 }
0x2e25   : > { %v5015_v21 = vsel %vm783_vm13, %v5013_v62, 0.0 }
0x2e26   : > { %5016 = vadd.xlane.f32.xlu0 %v5015_v21 }
0x2e2a   : > { %4083 = vadd.xlane.f32.xlu0 %v4082_v33 }
0x2e63   : > { %v4395_v4 = vpop.xlane.xlu1 %4394 }
0x2e64   : > { %v4399_v31 = vadd.f32 %v4398_v53, %v4395_v4 }
0x2e66   : > { %6904 = vrcp.f32 %v4399_v31 }
0x2e67   : > { %v4709_v7 = vpop.xlane.xlu1 %4708 }
0x2e68   : > { %v4710_v55 = vadd.f32 %v4709_v7, %v4706_v22  ;;  %v5210_v7 = vrot.slane %v7992_v0, %v7530_v32  ;;  %v5804_v32 = vld [vmem:[%s8422_s4 + $0xb8] sm:$0xff] }
0x2e69   : > { %v6603_v43 = vpack.c.bf16 %v5804_v32, %v5803_v13 }
0x2e6a   : > { %6906 = vrcp.f32 %v4710_v55 }
0x2e6b   : > { %v5020_v20 = vpop.xlane.xlu1 %5019 }
0x2e6f   : > { %v4087_v36 = vpop.xlane.xlu1 %4086 }
0x2e70   : > { %v6905_v61 = vpop.eup %6904 }
0x2e71   : > { %v4477_v9 = vmul.f32 %v6905_v61, %v8140_v17 }
0x2e73   : > { %5101 = vrot.lane.b32.xlu0 %v4477_v9, %s8545_s24  ;;  %s5594_s24 = scalar_lea.sflag [#allocation3], %s321_s0 }
0x2e74   : > { %v6907_v46 = vpop.eup %6906 }
0x2e75   : > { %v4788_v23 = vmul.f32 %v6907_v46, %v8201_v25 }
0x2e77   : > { %5105 = vrot.lane.b32.xlu1 %v4788_v23, %s8546_s26  ;;  %s6923_s26 = scalar_lea.vmem %s8377_s6, 16 }
0x2e78   : > { %p6924_p11 = scmp.ne.s32.totalorder %s8377_s6, %s6923_s26 }
0x2e7a   : > { %p6925_p12 = pnand %p6924_p11, %p7104_p5 }
0x2e7c   : > { %p6926_p13 = pneg %p6925_p12 }
0x2e86   : > { %v5095_v3 = vpop.f32.mrb[42].mxu1 }
0x2e87   : > { %v6365_v1 = vpop.f32.mrb[43].mxu1 }
0x2eb3   : > { %v5017_v18 = vpop.xlane.xlu0 %5016 }
0x2eb4   : > { %v5021_v19 = vadd.f32 %v5020_v20, %v5017_v18 }
0x2eb6   : > { %6908 = vrcp.f32 %v5021_v19 }
0x2eb7   : > { %v4084_v17 = vpop.xlane.xlu0 %4083 }
0x2eb8   : > { %v4088_v29 = vadd.f32 %v4087_v36, %v4084_v17 }
0x2eba   : > { %6910 = vrcp.f32 %v4088_v29 }
0x2ec0   : > { %v6909_v41 = vpop.eup %6908 }
0x2ec1   : > { %v5099_v8 = vmul.f32 %v6909_v41, %v5095_v3  ;;  %v5318_v3 = vrot.slane %v7992_v0, %v7559_v50  ;;  %v5417_v50 = vld [vmem:[%s8549_s13 + $0x8] sm:$0xff] }
0x2ec3   : > { %5109 = vrot.lane.b32.xlu1 %v5099_v8, %s8547_s28  ;;  %s7015_s28 = smov [#allocation2]  }
0x2ec4   : > { %v6911_v47 = vpop.eup %6910 }
0x2ec5   : > { %v4166_v25 = vmul.f32 %v6911_v47, %v8079_v40  ;;  %v6820_v40 = vpack.i.bf16 %v7957_v58, %v7952_v54  ;;  %v5801_v54 = vld [vmem:[%s8422_s4 + $0xa0] sm:$0xff]  ;;  %v5802_v58 = vld [vmem:[%s8422_s4 + $0xa8] sm:$0xff] }
0x2ec6   : > { %v6600_v44 = vpack.c.bf16 %v5802_v58, %v5801_v54  ;;  %v5420_v54 = vld [vmem:[%s8549_s13 + $0x20] sm:$0x1] }
0x2ee5   : > { %v5102_v27 = vpop.permute.xlu0 %5101 }
0x2ee6   : > { %v5112_v10 = vsel %vm556_vm2, %v4166_v25, %v5102_v27  ;;  %v5418_v27 = vld [vmem:[%s8549_s13 + $0x10] sm:$0xff] }
0x2ee9   : > { %v5106_v28 = vpop.permute.xlu1 %5105 }
0x2eea   : > { %v5113_v30 = vsel %vm783_vm13, %v5112_v10, %v5106_v28  ;;  %v5419_v28 = vld [vmem:[%s8549_s13 + $0x18] sm:$0xff]  ;;  %v5496_v10 = vld [vmem:[%s8550_s30] sm:$0xff] }
0x2eeb   : > { %v6609_v25 = vpack.c.bf16 %v5419_v28, %v5418_v27 }
0x2f35   : > { %v5110_v57 = vpop.permute.xlu1 %5109 }
0x2f36   : > { %v5114_v5 = vsel %vm1816_vm14, %v5113_v30, %v5110_v57  ;;  %v5497_v30 = vld [vmem:[%s8551_s15 + $0x8] sm:$0xff] }
0x2f37   : > { %6375 = vmatmul.mubr.msk.f32.vlgmr.msra.gmra.mrb[44].mxu1 %vm330_vm0, %v5114_v5  ;;  %v6612_v57 = vpack.c.bf16 %v5497_v30, %v5496_v10 }
0x2f38   : > { %6396 = vmatprep.mubr.msk.f32.mxu1 %vm6988_vm1, %v6989_v24  ;;  %6601 = vmatpush3.bf16.msra.mxu1 %v6600_v44 }
0x2f39   : > { %6602 = vmatprep.subr.bf16.mxu1 %v6987_v16 }
0x2f3c   : > { %6604 = vmatpush3.bf16.msra.mxu1 %v6603_v43 }
0x2f3d   : > { %6611 = vmatprep.subr.bf16.mxu1 %v6987_v16 }
0x300a   : > { %v5189_v51 = vpop.f32.mrb[44].mxu1 }
0x300b   : > { %v5193_v15 = vadd.f32 %v5189_v51, %v7979_v2  ;;  %v6376_v56 = vpop.f32.mrb[45].mxu1 }
0x300c   : > { %v5409_v56 = vrot.slane %v7992_v0, %v7594_v12  ;;  %v5500_v12 = vld [vmem:[%s8551_s15 + $0x20] sm:$0xff] }
0x300d   : > { %v5194_v39 = vsel %vm330_vm0, %v5193_v15, 0.0 }
0x300e   : > { %5195 = vadd.xlane.f32.xlu0 %v5194_v39 }
0x3024   : > { %6821 = vrot.lane.b32.xlu0 %v6820_v40, %s8548_s25 }
0x309b   : > { %v5196_v45 = vpop.xlane.xlu0 %5195 }
0x309c   : > { %v5197_v48 = vmul.f32 0.03125, %v5196_v45  ;;  %v5414_v45 = vrot.slane %v7992_v0, %v7597_v34  ;;  %v5501_v34 = vld [vmem:[%s8551_s15 + $0x28] sm:$0xff] }
0x309d   : > { %v6618_v0 = vpack.c.bf16 %v5501_v34, %v5500_v12 }
0x309e   : > { %v5198_v37 = vsub.f32 %v5193_v15, %v5197_v48 }
0x309f   : > { %v6822_v2 = vpop.permute.xlu0 %6821 }
0x30a0   : > { %v5199_v63 = vmul.f32 %v5198_v37, %v5198_v37  ;;  %v6824_v60 = vunpack.i.h.bf16 %v6822_v2  ;;  %v6823_v62 = vunpack.i.l.bf16 %v6822_v2 }
0x30a2   : > { %v5200_v38 = vsel %vm330_vm0, %v5199_v63, 0.0  ;;  %v6594_v21 = vpack.c.bf16 %v6824_v60, %v6823_v62  ;;  %v5502_v60 = vld [vmem:[%s8551_s15 + $0x30] sm:$0xff]  ;;  %v5503_v62 = vld [vmem:[%s8551_s15 + $0x38] sm:$0xff] }
0x30a3   : > { %5201 = vadd.xlane.f32.xlu1 %v5200_v38  ;;  %v5498_v38 = vld [vmem:[%s8551_s15 + $0x10] sm:$0xff] }
0x30a4   : > { %6595 = vmatpush3.bf16.msra.mxu0 %v6594_v21  ;;  %v6621_v21 = vpack.c.bf16 %v5503_v62, %v5502_v60 }
0x30a5   : > { %6596 = vmatprep.subr.bf16.mxu0 %v6987_v16 }
0x30b4   : > { %6826 = vrot.lane.b32.xlu1 %v6825_v59, %s8548_s25  ;;  %v5499_v59 = vld [vmem:[%s8551_s15 + $0x18] sm:$0xff]  ;;  %s6927_s25 = sshll.u32 %s7015_s28, 4  ;;  %s6928_s25 = int_to_ptr.vmem [resolvable:$false] %s6927_s25 }
0x30b5   : > { %v6615_v2 = vpack.c.bf16 %v5499_v59, %v5498_v38  ;;  %s6929_s29 = scalar_lea.vmem %s6928_s25, 32  ;;  %p6930_p0 = scmp.lt.s32.totalorder %s8377_s6, %s6928_s25 }
0x30b6   : > { %p6931_p1 = scmp.lt.s32.totalorder %s6929_s29, %s6923_s26 }
0x30b8   : > { %p6932_p2 = por %p6931_p1, %p6930_p0 }
0x30ba   : > { %p6933_p3 = pnand %p6932_p2, %p6926_p13 }
0x3130   : > { %v5202_v26 = vpop.xlane.xlu1 %5201 }
0x3131   : > { %v5203_v14 = vmul.f32 0.03125, %v5202_v26 }
0x3133   : > { %v5204_v33 = vadd.f32 1e-05, %v5203_v14 }
0x3134   : > { %v6827_v53 = vpop.permute.xlu1 %6826 }
0x3135   : > { %6912 = vrsqrt.f32 %v5204_v33  ;;  %v6829_v4 = vunpack.i.h.bf16 %v6827_v53  ;;  %v6828_v31 = vunpack.i.l.bf16 %v6827_v53  ;;  %v5504_v33 = vld [vmem:[%s8551_s15 + $0x40] sm:$0x1] }
0x3137   : > { %v6597_v22 = vpack.c.bf16 %v6829_v4, %v6828_v31 }
0x3139   : > { %6598 = vmatpush3.bf16.msra.mxu0 %v6597_v22 }
0x313a   : > { %6605 = vmatprep.subr.bf16.mxu0 %v6987_v16 }
0x313f   : > { %v6913_v55 = vpop.eup %6912 }
0x3140   : > { %v5206_v6 = vmul.f32 %v6913_v55, %v5198_v37 }
0x3142   : > { %v5211_v11 = vmul.f32 %v5210_v7, %v5206_v6 }
0x3144   : > { %v5216_v42 = vadd.f32 %v5215_v49, %v5211_v11 }
0x3146   : > { %6386 = vmatmul.mubr.msk.f32.vlgmr.msra.gmra.mrb[50].mxu0 %vm330_vm0, %v5216_v42 }
0x3147   : > { %6407 = vmatprep.mubr.msk.f32.mxu0 %vm6988_vm1, %v6989_v24 }
0x3219   : > { %v5306_v61 = vpop.f32.mrb[50].mxu0 }
0x321a   : > { %v5307_v9 = vadd.f32 %v5306_v61, %v5220_v35  ;;  %v6387_v46 = vpop.f32.mrb[51].mxu0 }
0x321c   : > { %v5310_v23 = vmax.f32 %v5307_v9, 0.0 }
0x321e   : > { %6397 = vmatmul.mubr.msk.f32.vlgmr.msra.gmra.mrb[46].mxu1 %vm330_vm0, %v5310_v23 }
0x321f   : > { %6426 = vmatprep.mubr.msk.f32.mxu1 %vm6988_vm1, %v6989_v24  ;;  %v5416_v24 = vld [vmem:[%s8549_s13] sm:$0xff]  ;;  %6613 = vmatpush3.bf16.msra.mxu1 %v6612_v57 }
0x3220   : > { %v6606_v47 = vpack.c.bf16 %v5417_v50, %v5416_v24  ;;  %6614 = vmatprep.subr.bf16.mxu1 %v6987_v16 }
0x3222   : > { %6607 = vmatpush3.bf16.msra.mxu0 %v6606_v47 }
0x3223   : > { %6608 = vmatprep.subr.bf16.mxu0 %v6987_v16  ;;  %6616 = vmatpush3.bf16.msra.mxu1 %v6615_v2 }
0x3224   : > { %6617 = vmatprep.subr.bf16.mxu1 %v6987_v16 }
0x3226   : > { %6610 = vmatpush3.bf16.msra.mxu0 %v6609_v25 }
0x3227   : > { %6619 = vmatpush3.bf16.msra.mxu1 %v6618_v0 }
0x3228   : > { %6620 = vmatprep.subr.bf16.mxu1 %v6987_v16 }
0x322b   : > { %6622 = vmatpush3.bf16.msra.mxu1 %v6621_v21 }
0x32f1   : > { %v5388_v1 = vpop.f32.mrb[46].mxu1 }
0x32f2   : > { %v5389_v20 = vadd.f32 %v5388_v1, %v5318_v3  ;;  %v6398_v18 = vpop.f32.mrb[47].mxu1 }
0x32f4   : > { %v5392_v19 = vadd.f32 %v5389_v20, %v5216_v42 }
0x32f6   : > { %v5393_v41 = vsel %vm330_vm0, %v5392_v19, 0.0 }
0x32f7   : > { %5394 = vadd.xlane.f32.xlu0 %v5393_v41 }
0x3384   : > { %v5395_v52 = vpop.xlane.xlu0 %5394 }
0x3385   : > { %v5396_v8 = vmul.f32 0.03125, %v5395_v52 }
0x3387   : > { %v5397_v17 = vsub.f32 %v5392_v19, %v5396_v8 }
0x3389   : > { %v5398_v36 = vmul.f32 %v5397_v17, %v5397_v17 }
0x338b   : > { %v5399_v29 = vsel %vm330_vm0, %v5398_v36, 0.0 }
0x338c   : > { %5400 = vadd.xlane.f32.xlu1 %v5399_v29 }
0x3419   : > { %v5401_v5 = vpop.xlane.xlu1 %5400 }
0x341a   : > { %v5402_v51 = vmul.f32 0.03125, %v5401_v5 }
0x341c   : > { %v5403_v15 = vadd.f32 1e-05, %v5402_v51 }
0x341e   : > { %6914 = vrsqrt.f32 %v5403_v15 }
0x3428   : > { %v6915_v39 = vpop.eup %6914 }
0x3429   : > { %v5405_v40 = vmul.f32 %v6915_v39, %v5397_v17 }
0x342b   : > { %v5410_v48 = vmul.f32 %v5409_v56, %v5405_v40 }
0x342d   : > { %v5415_v37 = vadd.f32 %v5414_v45, %v5410_v48 }
0x342f   : > { %v5422_v63 = vrot.slane %v5415_v37, 7 }
0x3431   : > { %6408 = vmatmul.mubr.msk.f32.vlgmr.msra.gmra.mrb[52].mxu0 %vm330_vm0, %v5422_v63  ;;  %vm5579_vm0 = vcmask 8192  }
0x3504   : > { %v5491_v58 = vpop.f32.mrb[52].mxu0 }
0x3505   : > { %v5492_v44 = vadd.f32 %v5491_v58, %v5420_v54  ;;  %v6409_v26 = vpop.f32.mrb[53].mxu0 }
0x3507   : > { %6916 = vtanh.f32 %v5492_v44 }
0x3511   : > { %v6917_v14 = vpop.eup %6916 }
0x3512   : > { %6427 = vmatmul.mubr.msk.f32.vlgmr.msra.gmra.mrb[48].mxu1 %vm5505_vm15, %v6917_v14 }
0x35e5   : > { %v5575_v53 = vpop.f32.mrb[48].mxu1 }
0x35e6   : > { %v5576_v16 = vadd.f32 %v5575_v53, %v5504_v33  ;;  %v6428_v4 = vpop.f32.mrb[49].mxu1 }
0x35e8   : > { %v5580_v31 = vsel %vm5579_vm0, %v5576_v16, -inf }
0x35e9   : > { %5581 = vmax.xlane.f32.xlu0 %v5580_v31 }
0x3676   : > { %v5582_v22 = vpop.xlane.xlu0 %5581 }
0x3677   : > { %v5583_v7 = vsub.f32 %v5576_v16, %v5582_v22 }
0x3679   : > { %v5584_v55 = vmul.f32 1.442695, %v5583_v7 }
0x367b   : > { %6918 = vpow2.f32 %v5584_v55 }
0x3685   : > { %v6919_v6 = vpop.eup %6918 }
0x3686   : > { %v5586_v49 = vsel %vm5579_vm0, %v6919_v6, 0.0 }
0x3687   : > { %5587 = vadd.xlane.f32.xlu0 %v5586_v49 }
0x3714   : > { %v5588_v11 = vpop.xlane.xlu0 %5587 }
0x3715   : > { %6920 = vlog2.f32 %v5588_v11 }
0x371f   : > { %v6921_v42 = vpop.eup %6920 }
0x3720   : > { %v5590_v13 = vmul.f32 0.6931472, %v6921_v42 }
0x3722   : > { %v5591_v32 = vsub.f32 %v5583_v7, %v5590_v13 }
0x3724   : > { %5592 = vst.msk [vmem:[%s322_s3] sm:$0x1] %vm5579_vm0, %v5591_v32 }
0x3725   : > { %6936 = shalt.err (!%p6933_p3)
}
0x3726   : > { %s6937_s16 = scalar_lea.hbm %s8375_s23, 16  ;;  %s6941_s14 = scalar_lea.hbm %s8555_s18, 32 }
0x3727   : > { %p6938_p4 = scmp.ne.s32.totalorder %s8375_s23, %s6937_s16  ;;  %p6942_p9 = scmp.lt.u32.totalorder %s8375_s23, %s8555_s18 }
0x3728   : > { %p6943_p10 = scmp.lt.u32.totalorder %s6941_s14, %s6937_s16  ;;  %p6945_p12 = scmp.lt.u32.totalorder %s6937_s16, %s8375_s23 }
0x3729   : > { %p6939_p7 = pnand %p6938_p4, %p7104_p5 }
0x372a   : > { %p6944_p11 = por %p6943_p10, %p6942_p9 }
0x372b   : > { %p6940_p8 = pneg %p6939_p7 }
0x372c   : > { %p6946_p13 = por %p6945_p12, %p6944_p11 }
0x372e   : > { %p6947_p0 = pnand %p6946_p13, %p6940_p8 }
0x3730   : > { %6950 = shalt.err (!%p6947_p0)
}
0x3731   : > { %6623 = dma.vmem_to_hbm [thread:$0]  (%p7104_p5), %s8377_s6, 16, %s8375_s23, %s5594_s24  }
0x3732 PF: > { %s8556_s7 = sld [smem:[#allocation8_spill]]  ;;  %s8557_s10 = sld [smem:[#allocation5_spill]] }
0x3738   : > { %p6629_p1 = scmp.ge.s32.totalorder %s8556_s7, 2  ;;  %s5618_s19 = sand.u32 1, %s8557_s10  }
0x3739   : > { %s5619_s20 = scalar_lea.sflag [#allocation3], %s5618_s19 }
0x373a   : > { %p6626_p2 = pnand %p6629_p1, %p7108_p6 }
0x373c   : > { %6968 = dma.done.wait (!%p6626_p2), %s5619_s20, 16  }
0x373d   : > { %6970 = vsyncadd (!%p6626_p2), %s5619_s20, 4294967280  ;;  %s8559_s12 = sld [smem:[#allocation10_spill]]  ;;  %s8560_s30 = sld [smem:[#allocation6_spill]] }
0x373e   : > { %s8561_s10 = sld [smem:[#allocation7_spill]]  ;;  %s8562_s11 = sld [smem:[#allocation11_spill]] }
0x3743   : > { %p19_p3 = scmp.ge.s32.totalorder %s8559_s12, 4  }
0x3745   :  { %21 = sbr.rel (!%p19_p3) target bundleno = 11 (0xb), region = 97 }
0x374c   :  { %5623 = vsyncpa [#allocation3], 1 }
0x374d   :  { %5625 = vsyncpa [#allocation3 + $0x1], 1 }

</bundles_post_ra>
